<compile_context>
chip_gen: v7x
topology: tpu7x:2x2x1
jax: 0.10.0
libtpu: 0.0.40
codegen_flags: <defaults>
</compile_context>

<pallas_src>
import functools

import jax
import jax.numpy as jnp
from jax.experimental import pallas as pl
from jax.experimental.pallas import tpu as pltpu

HIDDEN = 1000                      # hard-coded in the PyTorch module
HIDDEN_PAD = 1024                  # next multiple of 128


def _round_up(x, m):
    return ((x + m - 1) // m) * m


def _cdiv(a, b):
    return (a + b - 1) // b


def discriminator_kernel(z_ref,
                         w1_ref, b1_ref,
                         w2_ref, b2_ref,
                         w3_ref, b3_ref,
                         w4_ref, b4_ref,
                         out_ref,
                         *, matmul_precision=None):
    # nn.LeakyReLU(True) => negative_slope == 1.0 => identity; nothing emitted.
    h = z_ref[...]

    # Hidden layers: cast activations to the weight dtype (bf16 MXU path by
    # default, f32 + precision=HIGHEST on the exact path); accumulate in f32.
    h = jnp.dot(h.astype(w1_ref.dtype), w1_ref[...],
                preferred_element_type=jnp.float32,
                precision=matmul_precision) + b1_ref[...]
    h = jnp.dot(h.astype(w2_ref.dtype), w2_ref[...],
                preferred_element_type=jnp.float32,
                precision=matmul_precision) + b2_ref[...]
    h = jnp.dot(h.astype(w3_ref.dtype), w3_ref[...],
                preferred_element_type=jnp.float32,
                precision=matmul_precision) + b3_ref[...]

    # Final 1024 -> 1 layer: VPU multiply + lane reduction (keeps the N=1
    # reduction off the MXU), bias from SMEM, then nn.ReLU().
    y = jnp.sum(h * w4_ref[...], axis=-1, keepdims=True) + b4_ref[0, 0]
    out_ref[...] = jnp.maximum(y, 0.0)


def init_torch_params(key, z_dim):
    """PyTorch-layout Linear params: W (out, in), b (out,), U(+/-1/sqrt(fan_in))."""
    dims = [(HIDDEN, z_dim), (HIDDEN, HIDDEN), (HIDDEN, HIDDEN), (1, HIDDEN)]
    params = []
    for (fan_out, fan_in) in dims:
        key, kw, kb = jax.random.split(key, 3)
        bound = 1.0 / (fan_in ** 0.5)
        w = jax.random.uniform(kw, (fan_out, fan_in), jnp.float32, -bound, bound)
        b = jax.random.uniform(kb, (fan_out,), jnp.float32, -bound, bound)
        params.append((w, b))
    return params


def prepare_params(torch_params, *, exact=False):
    """Transpose to (in, out), zero-pad z_dim->mult(128) and hidden->1024.

    Default stores the three big weight matrices in bf16 (halves the dominant
    weight-DMA traffic; accumulation in the kernel stays f32).  exact=True
    keeps f32 weights and the kernel then uses precision=HIGHEST dots.
    Padding rows/cols are exactly zero, so results match the unpadded model.
    """
    weights_dtype = jnp.float32 if exact else jnp.bfloat16
    (w1, b1), (w2, b2), (w3, b3), (w4, b4) = torch_params
    z_dim = w1.shape[1]
    z_dim_pad = _round_up(z_dim, 128)

    def pad_wt(w, in_pad, out_pad):
        wt = w.T                                  # (in, out)
        wt = jnp.pad(wt, ((0, in_pad - wt.shape[0]), (0, out_pad - wt.shape[1])))
        return wt.astype(weights_dtype)

    def pad_b(b, out_pad):
        return jnp.pad(b, (0, out_pad - b.shape[0])).reshape(1, out_pad).astype(jnp.float32)

    return [
        pad_wt(w1, z_dim_pad, HIDDEN_PAD), pad_b(b1, HIDDEN_PAD),
        pad_wt(w2, HIDDEN_PAD, HIDDEN_PAD), pad_b(b2, HIDDEN_PAD),
        pad_wt(w3, HIDDEN_PAD, HIDDEN_PAD), pad_b(b3, HIDDEN_PAD),
        # Final layer kept f32 (used on the VPU; 4 KiB):
        jnp.pad(w4, ((0, 0), (0, HIDDEN_PAD - w4.shape[1]))).astype(jnp.float32),  # (1, 1024)
        b4.reshape(1, 1).astype(jnp.float32),                                      # SMEM scalar
    ]


def discriminator_forward(z, params, *, block_rows=512, vmem_limit_bytes=32 << 20):
    """z: (B, z_dim) f32; params: output of prepare_params()."""
    B, z_dim = z.shape
    w1 = params[0]
    z_dim_pad, hp = w1.shape
    exact = (w1.dtype == jnp.float32)
    precision = jax.lax.Precision.HIGHEST if exact else None

    # Pad features to the prepared (128-aligned) z_dim.
    if z_dim_pad != z_dim:
        z = jnp.pad(z, ((0, 0), (0, z_dim_pad - z_dim)))

    # Batch tile: multiple of 8 sublanes, <= block_rows, minimal padding waste.
    n_target = max(1, _cdiv(B, block_rows))
    tm = _round_up(_cdiv(B, n_target), 8)
    n_steps = _cdiv(B, tm)
    b_pad = n_steps * tm
    if b_pad != B:
        z = jnp.pad(z, ((0, b_pad - B), (0, 0)))

    # With a 1-2 step grid, splitting across the two v7x TCs would duplicate
    # the resident-weight DMA in exactly the DMA-bound regime; stay on one TC.
    dim_sem = ("arbitrary",) if n_steps <= 2 else ("parallel",)

    const = lambda i: (0, 0)   # weights/biases: same block every grid step
    resident = pl.Buffered(1)  # constant blocks: single buffer (no dead copy)
    in_specs = [
        pl.BlockSpec((tm, z_dim_pad), lambda i: (i, 0)),                   # z tile
        pl.BlockSpec((z_dim_pad, hp), const, pipeline_mode=resident),      # w1
        pl.BlockSpec((1, hp), const, pipeline_mode=resident),              # b1
        pl.BlockSpec((hp, hp), const, pipeline_mode=resident),             # w2
        pl.BlockSpec((1, hp), const, pipeline_mode=resident),              # b2
        pl.BlockSpec((hp, hp), const, pipeline_mode=resident),             # w3
        pl.BlockSpec((1, hp), const, pipeline_mode=resident),              # b3
        pl.BlockSpec((1, hp), const, pipeline_mode=resident),              # w4 (row form)
        pl.BlockSpec(memory_space=pltpu.MemorySpace.SMEM),                 # b4 scalar
    ]
    out_specs = pl.BlockSpec((tm, 1), lambda i: (i, 0))

    kernel = functools.partial(discriminator_kernel, matmul_precision=precision)

    out = pl.pallas_call(
        kernel,
        out_shape=jax.ShapeDtypeStruct((b_pad, 1), jnp.float32),
        grid=(n_steps,),
        in_specs=in_specs,
        out_specs=out_specs,
        compiler_params=pltpu.CompilerParams(
            dimension_semantics=dim_sem,
            vmem_limit_bytes=vmem_limit_bytes,   # safe on v5e/v6e/v7x
        ),
    )(z, *params)

    out = out[:B]
    # matches torch .squeeze(): drops all size-1 dims -> (B,) for B > 1
    return jnp.squeeze(out)


def discriminator_ref(z, torch_params):
    """Pure-JAX reference in the original PyTorch layout (true-f32 matmuls)."""
    hi = jax.lax.Precision.HIGHEST
    (w1, b1), (w2, b2), (w3, b3), (w4, b4) = torch_params
    h = jnp.dot(z, w1.T, precision=hi) + b1      # LeakyReLU(slope=1.0) == identity
    h = jnp.dot(h, w2.T, precision=hi) + b2
    h = jnp.dot(h, w3.T, precision=hi) + b3
    h = jnp.maximum(jnp.dot(h, w4.T, precision=hi) + b4, 0.0)
    return jnp.squeeze(h)


if __name__ == "__main__":
    key = jax.random.PRNGKey(0)
    z_dim = 32
    batch = 4

    k_params, k_z, k_z2 = jax.random.split(key, 3)
    torch_params = init_torch_params(k_params, z_dim)
    z = jax.random.normal(k_z, (batch, z_dim), jnp.float32)

    ref = discriminator_ref(z, torch_params)

    # Default path: bf16 weights, f32 accumulation (bandwidth-optimal).
    params = prepare_params(torch_params)
    out = jax.block_until_ready(discriminator_forward(z, params))
    assert out.shape == (batch,), out.shape
    assert float(jnp.max(jnp.abs(out - ref))) < 5e-2, (out, ref)

    # Exact path: f32 weights + precision=HIGHEST dots.
    params_f32 = prepare_params(torch_params, exact=True)
    out_f32 = jax.block_until_ready(discriminator_forward(z, params_f32))
    assert out_f32.shape == (batch,)
    assert jnp.allclose(out_f32, ref, atol=1e-4, rtol=1e-4), (out_f32, ref)

    # Multi-step grid with non-multiple-of-tile batch (exercises padding,
    # parallel dimension_semantics and the per-step weight residency).
    z_big = jax.random.normal(k_z2, (20, z_dim), jnp.float32)
    ref_big = discriminator_ref(z_big, torch_params)
    out_big = jax.block_until_ready(
        discriminator_forward(z_big, params, block_rows=8))
    assert out_big.shape == (20,), out_big.shape
    assert float(jnp.max(jnp.abs(out_big - ref_big))) < 5e-2, (out_big, ref_big)

    print("KERNEL_OK")
</pallas_src>

<mosaic_0001>
module attributes {stable_mosaic.version = 11 : i64} {
  func.func @discriminator_kernel(%arg0: i32, %arg1: memref<8x128xf32, #tpu.memory_space<vmem>>, %arg2: memref<128x1024xbf16, #tpu.memory_space<vmem>>, %arg3: memref<1x1024xf32, #tpu.memory_space<vmem>>, %arg4: memref<1024x1024xbf16, #tpu.memory_space<vmem>>, %arg5: memref<1x1024xf32, #tpu.memory_space<vmem>>, %arg6: memref<1024x1024xbf16, #tpu.memory_space<vmem>>, %arg7: memref<1x1024xf32, #tpu.memory_space<vmem>>, %arg8: memref<1x1024xf32, #tpu.memory_space<vmem>>, %arg9: memref<1x1xf32, #tpu.memory_space<smem>>, %arg10: memref<8x1xf32, #tpu.memory_space<vmem>>) attributes {dimension_semantics = [#tpu.dimension_semantics<arbitrary>], iteration_bounds = array<i64: 1>, scalar_prefetch = 0 : i64, scratch_operands = 0 : i64, tpu.core_type = #tpu.core_type<tc>, window_params = [{transform_indices = @transform_0, window_bounds = array<i64: 8, 128>}, {pipeline_mode = #tpu.pipeline_mode<synchronous>, transform_indices = @transform_1, window_bounds = array<i64: 128, 1024>}, {pipeline_mode = #tpu.pipeline_mode<synchronous>, transform_indices = @transform_2, window_bounds = array<i64: 1, 1024>}, {pipeline_mode = #tpu.pipeline_mode<synchronous>, transform_indices = @transform_3, window_bounds = array<i64: 1024, 1024>}, {pipeline_mode = #tpu.pipeline_mode<synchronous>, transform_indices = @transform_4, window_bounds = array<i64: 1, 1024>}, {pipeline_mode = #tpu.pipeline_mode<synchronous>, transform_indices = @transform_5, window_bounds = array<i64: 1024, 1024>}, {pipeline_mode = #tpu.pipeline_mode<synchronous>, transform_indices = @transform_6, window_bounds = array<i64: 1, 1024>}, {pipeline_mode = #tpu.pipeline_mode<synchronous>, transform_indices = @transform_7, window_bounds = array<i64: 1, 1024>}, {transform_indices = @transform_8, window_bounds = array<i64: 1, 1>}, {transform_indices = @transform_9, window_bounds = array<i64: 8, 1>}]} {
    %c0 = arith.constant 0 : index
    %c0_0 = arith.constant 0 : index
    %0 = vector.load %arg1[%c0, %c0_0] : memref<8x128xf32, #tpu.memory_space<vmem>>, vector<8x128xf32>
    %1 = arith.truncf %0 : vector<8x128xf32> to vector<8x128xbf16>
    %c0_1 = arith.constant 0 : index
    %c0_2 = arith.constant 0 : index
    %2 = vector.load %arg2[%c0_1, %c0_2] : memref<128x1024xbf16, #tpu.memory_space<vmem>>, vector<128x1024xbf16>
    %cst = arith.constant dense<0.000000e+00> : vector<8x1024xf32>
    %3 = tpu.matmul %1, %2, %cst {dimension_numbers = #tpu.dot_dimension_numbers<[1], [0], [0], [1], [0, 0, 1, 1], [], []>} : vector<8x128xbf16>, vector<128x1024xbf16>, vector<8x1024xf32> -> vector<8x1024xf32>
    %c0_3 = arith.constant 0 : index
    %c0_4 = arith.constant 0 : index
    %4 = vector.load %arg3[%c0_3, %c0_4] : memref<1x1024xf32, #tpu.memory_space<vmem>>, vector<1x1024xf32>
    %5 = vector.broadcast %4 : vector<1x1024xf32> to vector<8x1024xf32>
    %6 = arith.addf %3, %5 : vector<8x1024xf32>
    %7 = arith.truncf %6 : vector<8x1024xf32> to vector<8x1024xbf16>
    %c0_5 = arith.constant 0 : index
    %c0_6 = arith.constant 0 : index
    %8 = vector.load %arg4[%c0_5, %c0_6] : memref<1024x1024xbf16, #tpu.memory_space<vmem>>, vector<1024x1024xbf16>
    %cst_7 = arith.constant dense<0.000000e+00> : vector<8x1024xf32>
    %9 = tpu.matmul %7, %8, %cst_7 {dimension_numbers = #tpu.dot_dimension_numbers<[1], [0], [0], [1], [0, 0, 1, 1], [], []>} : vector<8x1024xbf16>, vector<1024x1024xbf16>, vector<8x1024xf32> -> vector<8x1024xf32>
    %c0_8 = arith.constant 0 : index
    %c0_9 = arith.constant 0 : index
    %10 = vector.load %arg5[%c0_8, %c0_9] : memref<1x1024xf32, #tpu.memory_space<vmem>>, vector<1x1024xf32>
    %11 = vector.broadcast %10 : vector<1x1024xf32> to vector<8x1024xf32>
    %12 = arith.addf %9, %11 : vector<8x1024xf32>
    %13 = arith.truncf %12 : vector<8x1024xf32> to vector<8x1024xbf16>
    %c0_10 = arith.constant 0 : index
    %c0_11 = arith.constant 0 : index
    %14 = vector.load %arg6[%c0_10, %c0_11] : memref<1024x1024xbf16, #tpu.memory_space<vmem>>, vector<1024x1024xbf16>
    %cst_12 = arith.constant dense<0.000000e+00> : vector<8x1024xf32>
    %15 = tpu.matmul %13, %14, %cst_12 {dimension_numbers = #tpu.dot_dimension_numbers<[1], [0], [0], [1], [0, 0, 1, 1], [], []>} : vector<8x1024xbf16>, vector<1024x1024xbf16>, vector<8x1024xf32> -> vector<8x1024xf32>
    %c0_13 = arith.constant 0 : index
    %c0_14 = arith.constant 0 : index
    %16 = vector.load %arg7[%c0_13, %c0_14] : memref<1x1024xf32, #tpu.memory_space<vmem>>, vector<1x1024xf32>
    %17 = vector.broadcast %16 : vector<1x1024xf32> to vector<8x1024xf32>
    %18 = arith.addf %15, %17 : vector<8x1024xf32>
    %c0_15 = arith.constant 0 : index
    %c0_16 = arith.constant 0 : index
    %19 = vector.load %arg8[%c0_15, %c0_16] : memref<1x1024xf32, #tpu.memory_space<vmem>>, vector<1x1024xf32>
    %20 = vector.broadcast %19 : vector<1x1024xf32> to vector<8x1024xf32>
    %21 = arith.mulf %18, %20 : vector<8x1024xf32>
    %cst_17 = arith.constant dense<0.000000e+00> : vector<8xf32>
    %22 = vector.multi_reduction <add>, %21, %cst_17 [1] : vector<8x1024xf32> to vector<8xf32>
    %23 = vector.shape_cast %22 : vector<8xf32> to vector<8x1xf32>
    %c0_18 = arith.constant 0 : index
    %c0_19 = arith.constant 0 : index
    %24 = memref.load %arg9[%c0_18, %c0_19] : memref<1x1xf32, #tpu.memory_space<smem>>
    %25 = vector.broadcast %24 : f32 to vector<8x1xf32>
    %26 = arith.addf %23, %25 : vector<8x1xf32>
    %cst_20 = arith.constant 0.000000e+00 : f32
    %27 = vector.broadcast %cst_20 : f32 to vector<8x1xf32>
    %28 = arith.maximumf %26, %27 : vector<8x1xf32>
    %c0_21 = arith.constant 0 : index
    %c0_22 = arith.constant 0 : index
    %29 = vector.load %arg10[%c0_21, %c0_22] : memref<8x1xf32, #tpu.memory_space<vmem>>, vector<8x1xf32>
    tpu.vector_store %arg10[%c0_21, %c0_22], %28 {strides = array<i32>} : memref<8x1xf32, #tpu.memory_space<vmem>>, vector<8x1xf32>,
    return
  }
  func.func @transform_0(%arg0: i32) -> (i32, i32) {
    %c0_i32 = arith.constant 0 : i32
    %c0_i32_0 = arith.constant 0 : i32
    return %arg0, %c0_i32 : i32, i32
  }
  func.func @transform_1(%arg0: i32) -> (i32, i32) {
    %c0_i32 = arith.constant 0 : i32
    %c0_i32_0 = arith.constant 0 : i32
    %c0_i32_1 = arith.constant 0 : i32
    return %c0_i32, %c0_i32_0 : i32, i32
  }
  func.func @transform_2(%arg0: i32) -> (i32, i32) {
    %c0_i32 = arith.constant 0 : i32
    %c0_i32_0 = arith.constant 0 : i32
    %c0_i32_1 = arith.constant 0 : i32
    return %c0_i32, %c0_i32_0 : i32, i32
  }
  func.func @transform_3(%arg0: i32) -> (i32, i32) {
    %c0_i32 = arith.constant 0 : i32
    %c0_i32_0 = arith.constant 0 : i32
    %c0_i32_1 = arith.constant 0 : i32
    return %c0_i32, %c0_i32_0 : i32, i32
  }
  func.func @transform_4(%arg0: i32) -> (i32, i32) {
    %c0_i32 = arith.constant 0 : i32
    %c0_i32_0 = arith.constant 0 : i32
    %c0_i32_1 = arith.constant 0 : i32
    return %c0_i32, %c0_i32_0 : i32, i32
  }
  func.func @transform_5(%arg0: i32) -> (i32, i32) {
    %c0_i32 = arith.constant 0 : i32
    %c0_i32_0 = arith.constant 0 : i32
    %c0_i32_1 = arith.constant 0 : i32
    return %c0_i32, %c0_i32_0 : i32, i32
  }
  func.func @transform_6(%arg0: i32) -> (i32, i32) {
    %c0_i32 = arith.constant 0 : i32
    %c0_i32_0 = arith.constant 0 : i32
    %c0_i32_1 = arith.constant 0 : i32
    return %c0_i32, %c0_i32_0 : i32, i32
  }
  func.func @transform_7(%arg0: i32) -> (i32, i32) {
    %c0_i32 = arith.constant 0 : i32
    %c0_i32_0 = arith.constant 0 : i32
    %c0_i32_1 = arith.constant 0 : i32
    return %c0_i32, %c0_i32_0 : i32, i32
  }
  func.func @transform_8(%arg0: i32) -> (i32, i32) {
    %c0_i32 = arith.constant 0 : i32
    %c0_i32_0 = arith.constant 0 : i32
    %c0_i32_1 = arith.constant 0 : i32
    return %c0_i32, %c0_i32_0 : i32, i32
  }
  func.func @transform_9(%arg0: i32) -> (i32, i32) {
    %c0_i32 = arith.constant 0 : i32
    %c0_i32_0 = arith.constant 0 : i32
    return %arg0, %c0_i32 : i32, i32
  }
}

</mosaic_0001>

<bundles_post_ra>
// kernel: tpu_custom_call.1
= control target key start
LH: loop header
LB: loop body
LE: loop exit
PB: predicated region body
PF: predicated region fallthrough
CT: control target
= control target key end

     0   :  { %15 = vsyncpa [#allocation4], 0  ;;  %s10164_s0 = inlined_call_operand.hbm [shape: f32[8,128], index: 0, kind: input, shape index: {}]   ;;  %s10165_s1 = inlined_call_operand.hbm [shape: bf16[128,1024], index: 1, kind: input, shape index: {}]   ;;  %s10166_s2 = inlined_call_operand.hbm [shape: f32[1,1024], index: 2, kind: input, shape index: {}]   ;;  %s10167_s3 = inlined_call_operand.hbm [shape: bf16[1024,1024], index: 3, kind: input, shape index: {}]   ;;  %s10168_s4 = inlined_call_operand.hbm [shape: f32[1,1024], index: 4, kind: input, shape index: {}]   ;;  %s10169_s5 = inlined_call_operand.hbm [shape: bf16[1024,1024], index: 5, kind: input, shape index: {}]   ;;  %s10170_s6 = inlined_call_operand.hbm [shape: f32[1,1024], index: 6, kind: input, shape index: {}]   ;;  %s10171_s7 = inlined_call_operand.hbm [shape: f32[1,1024], index: 7, kind: input, shape index: {}]   ;;  %s10172_s8 = inlined_call_operand.<no memory space> [shape: f32[1,1], index: 8, kind: input, shape index: {}]   ;;  %s10173_s9 = inlined_call_operand.vmem [shape: f32[8,1], index: 9, kind: output, shape index: {}]  }
   0x1   :  { %16 = vsyncpa [#allocation6], 0 }
   0x2   :  { %17 = vsyncpa [#allocation9], 0 }
   0x3   :  { %18 = vsyncpa [#allocation12], 0 }
   0x4   :  { %19 = vsyncpa [#allocation15], 0  ;;  %s9754_s30 = smov [#allocation5]   ;;  %s9568_s13 = scalar_lea.hbm %s10165_s1, 8192 }
   0x5   :  { %s35_s10 = sshll.u32 %s9754_s30, 4  ;;  %p9569_p0 = scmp.ne.s32.totalorder %s10165_s1, %s9568_s13  ;;  %s36_s10 = int_to_ptr.vmem [resolvable:$true] %s35_s10 }
   0x6   :  { %p9572_p1 = scmp.lt.u32.totalorder %s9568_s13, %s10165_s1 }
   0x8   :  { %p9574_p2 = pnand %p9572_p1, %p9569_p0 }
   0xa   :  { %9577 = shalt.err (!%p9574_p2)
}
   0xb   :  { %s9578_s18 = scalar_lea.vmem %s36_s10, 8192  ;;  %p9583_p4 = scmp.lt.s32.totalorder %s36_s10, %s36_s10 }
   0xc   :  { %p9579_p3 = scmp.ne.s32.totalorder %s36_s10, %s9578_s18  ;;  %p9584_p5 = scmp.lt.s32.totalorder %s9578_s18, %s9578_s18 }
   0xe   :  { %p9585_p6 = por %p9584_p5, %p9583_p4 }
  0x10   :  { %p9586_p7 = pnand %p9585_p6, %p9579_p3 }
  0x12   :  { %9589 = shalt.err (!%p9586_p7)
}
  0x13   :  { %s9755_s19 = smov 512   ;;  %s9756_s20 = smov 32  }
  0x14   :  { %41 = dma.hbm_to_vmem [thread:$0]  %s10165_s1, 8192, %s36_s10, [#allocation6], %s9755_s19, %s9755_s19, %s9756_s20  }
  0x15   :  { %s9757_s23 = smov [#allocation8]   ;;  %s9758_s25 = smov [#allocation11]  }
  0x16   :  { %s57_s24 = sshll.u32 %s9757_s23, 4  ;;  %s79_s26 = sshll.u32 %s9758_s25, 4  ;;  %s58_s24 = int_to_ptr.vmem [resolvable:$true] %s57_s24  ;;  %s80_s26 = int_to_ptr.vmem [resolvable:$true] %s79_s26 }
  0x17   :  { %s9590_s29 = scalar_lea.hbm %s10167_s3, 65536 }
  0x18   :  { %p9591_p8 = scmp.ne.s32.totalorder %s10167_s3, %s9590_s29  ;;  %p9594_p9 = scmp.lt.u32.totalorder %s9590_s29, %s10167_s3 }
  0x1a   :  { %p9596_p10 = pnand %p9594_p9, %p9591_p8 }
  0x1c   :  { %9599 = shalt.err (!%p9596_p10)
}
  0x1d   :  { %s9600_s1 = scalar_lea.vmem %s58_s24, 65536  ;;  %p9605_p12 = scmp.lt.s32.totalorder %s58_s24, %s58_s24 }
  0x1e   :  { %p9601_p11 = scmp.ne.s32.totalorder %s58_s24, %s9600_s1  ;;  %p9606_p13 = scmp.lt.s32.totalorder %s9600_s1, %s9600_s1 }
  0x20   :  { %p9607_p0 = por %p9606_p13, %p9605_p12 }
  0x22   :  { %p9608_p1 = pnand %p9607_p0, %p9601_p11 }
  0x24   :  { %9611 = shalt.err (!%p9608_p1)
}
  0x25   :  { %63 = dma.hbm_to_vmem [thread:$0]  %s10167_s3, 65536, %s58_s24, [#allocation9], %s9755_s19, %s9755_s19, %s9756_s20  }
  0x26   :  { %s9612_s17 = scalar_lea.hbm %s10169_s5, 65536 }
  0x27   :  { %p9613_p2 = scmp.ne.s32.totalorder %s10169_s5, %s9612_s17  ;;  %p9616_p3 = scmp.lt.u32.totalorder %s9612_s17, %s10169_s5 }
  0x29   :  { %p9618_p4 = pnand %p9616_p3, %p9613_p2 }
  0x2b   :  { %9621 = shalt.err (!%p9618_p4)
}
  0x2c   :  { %s9622_s25 = scalar_lea.vmem %s80_s26, 65536  ;;  %p9627_p6 = scmp.lt.s32.totalorder %s80_s26, %s80_s26 }
  0x2d   :  { %p9623_p5 = scmp.ne.s32.totalorder %s80_s26, %s9622_s25  ;;  %p9628_p7 = scmp.lt.s32.totalorder %s9622_s25, %s9622_s25 }
  0x2f   :  { %p9629_p8 = por %p9628_p7, %p9627_p6 }
  0x31   :  { %p9630_p9 = pnand %p9629_p8, %p9623_p5 }
  0x33   :  { %9633 = shalt.err (!%p9630_p9)
}
  0x34   :  { %85 = dma.hbm_to_vmem [thread:$0]  %s10169_s5, 65536, %s80_s26, [#allocation12], %s9755_s19, %s9755_s19, %s9756_s20  }
  0x35   :  { %s9759_s27 = smov [#allocation3]   ;;  %s9760_s29 = smov [#allocation7]  }
  0x36   :  { %s26_s28 = sshll.u32 %s9759_s27, 4  ;;  %s48_s30 = sshll.u32 %s9760_s29, 4  ;;  %s27_s28 = int_to_ptr.vmem [resolvable:$true] %s26_s28  ;;  %s49_s30 = int_to_ptr.vmem [resolvable:$true] %s48_s30 }
  0x37   :  { %s9634_s13 = scalar_lea.hbm %s10164_s0, 128 }
  0x38   :  { %p9635_p10 = scmp.ne.s32.totalorder %s10164_s0, %s9634_s13  ;;  %p9638_p11 = scmp.lt.u32.totalorder %s9634_s13, %s10164_s0 }
  0x3a   :  { %p9640_p12 = pnand %p9638_p11, %p9635_p10 }
  0x3c   :  { %9643 = shalt.err (!%p9640_p12)
}
  0x3d   :  { %s9644_s5 = scalar_lea.vmem %s27_s28, 128  ;;  %p9649_p0 = scmp.lt.s32.totalorder %s27_s28, %s27_s28 }
  0x3e   :  { %p9645_p13 = scmp.ne.s32.totalorder %s27_s28, %s9644_s5  ;;  %p9650_p1 = scmp.lt.s32.totalorder %s9644_s5, %s9644_s5 }
  0x40   :  { %p9651_p2 = por %p9650_p1, %p9649_p0 }
  0x42   :  { %p9652_p3 = pnand %p9651_p2, %p9645_p13 }
  0x44   :  { %9655 = shalt.err (!%p9652_p3)
}
  0x45   :  { %29 = dma.hbm_to_vmem [thread:$0]  %s10164_s0, 128, %s27_s28, [#allocation4]  }
  0x46   :  { %s9656_s17 = scalar_lea.hbm %s10166_s2, 128 }
  0x47   :  { %p9657_p4 = scmp.ne.s32.totalorder %s10166_s2, %s9656_s17  ;;  %p9660_p5 = scmp.lt.u32.totalorder %s9656_s17, %s10166_s2 }
  0x49   :  { %p9662_p6 = pnand %p9660_p5, %p9657_p4 }
  0x4b   :  { %9665 = shalt.err (!%p9662_p6)
}
  0x4c   :  { %s9666_s25 = scalar_lea.vmem %s49_s30, 128  ;;  %p9671_p8 = scmp.lt.s32.totalorder %s49_s30, %s49_s30 }
  0x4d   :  { %p9667_p7 = scmp.ne.s32.totalorder %s49_s30, %s9666_s25  ;;  %p9672_p9 = scmp.lt.s32.totalorder %s9666_s25, %s9666_s25 }
  0x4f   :  { %p9673_p10 = por %p9672_p9, %p9671_p8 }
  0x51   :  { %p9674_p11 = pnand %p9673_p10, %p9667_p7 }
  0x53   :  { %9677 = shalt.err (!%p9674_p11)
}
  0x54   :  { %51 = dma.hbm_to_vmem [thread:$0]  %s10166_s2, 128, %s49_s30, [#allocation6]  }
  0x55   :  { %s9761_s24 = smov [#allocation10]   ;;  %s9762_s28 = smov [#allocation13]  }
  0x56   :  { %s70_s27 = sshll.u32 %s9761_s24, 4  ;;  %s92_s29 = sshll.u32 %s9762_s28, 4  ;;  %s71_s27 = int_to_ptr.vmem [resolvable:$true] %s70_s27  ;;  %s93_s29 = int_to_ptr.vmem [resolvable:$true] %s92_s29 }
  0x57   :  { %s9678_s13 = scalar_lea.hbm %s10168_s4, 128 }
  0x58   :  { %p9679_p12 = scmp.ne.s32.totalorder %s10168_s4, %s9678_s13  ;;  %p9682_p13 = scmp.lt.u32.totalorder %s9678_s13, %s10168_s4 }
  0x5a   :  { %p9684_p0 = pnand %p9682_p13, %p9679_p12 }
  0x5c   :  { %9687 = shalt.err (!%p9684_p0)
}
  0x5d   :  { %s9688_s2 = scalar_lea.vmem %s71_s27, 128  ;;  %p9693_p2 = scmp.lt.s32.totalorder %s71_s27, %s71_s27 }
  0x5e   :  { %p9689_p1 = scmp.ne.s32.totalorder %s71_s27, %s9688_s2  ;;  %p9694_p3 = scmp.lt.s32.totalorder %s9688_s2, %s9688_s2 }
  0x60   :  { %p9695_p4 = por %p9694_p3, %p9693_p2 }
  0x62   :  { %p9696_p5 = pnand %p9695_p4, %p9689_p1 }
  0x64   :  { %9699 = shalt.err (!%p9696_p5)
}
  0x65   :  { %73 = dma.hbm_to_vmem [thread:$0]  %s10168_s4, 128, %s71_s27, [#allocation9]  }
  0x66   :  { %s9700_s26 = scalar_lea.hbm %s10170_s6, 128 }
  0x67   :  { %p9701_p6 = scmp.ne.s32.totalorder %s10170_s6, %s9700_s26  ;;  %p9704_p7 = scmp.lt.u32.totalorder %s9700_s26, %s10170_s6 }
  0x69   :  { %p9706_p8 = pnand %p9704_p7, %p9701_p6 }
  0x6b   :  { %9709 = shalt.err (!%p9706_p8)
}
  0x6c   :  { %s9710_s22 = scalar_lea.vmem %s93_s29, 128  ;;  %p9715_p10 = scmp.lt.s32.totalorder %s93_s29, %s93_s29 }
  0x6d   :  { %p9711_p9 = scmp.ne.s32.totalorder %s93_s29, %s9710_s22  ;;  %p9716_p11 = scmp.lt.s32.totalorder %s9710_s22, %s9710_s22 }
  0x6f   :  { %p9717_p12 = por %p9716_p11, %p9715_p10 }
  0x71   :  { %p9718_p13 = pnand %p9717_p12, %p9711_p9 }
  0x73   :  { %9721 = shalt.err (!%p9718_p13)
}
  0x74   :  { %95 = dma.hbm_to_vmem [thread:$0]  %s10170_s6, 128, %s93_s29, [#allocation12]  }
  0x75   :  { %s9763_s25 = smov [#allocation14]   ;;  %s9722_s27 = scalar_lea.hbm %s10171_s7, 128 }
  0x76   :  { %s102_s0 = sshll.u32 %s9763_s25, 4  ;;  %p9723_p0 = scmp.ne.s32.totalorder %s10171_s7, %s9722_s27  ;;  %s103_s0 = int_to_ptr.vmem [resolvable:$true] %s102_s0 }
  0x77   :  { %p9726_p1 = scmp.lt.u32.totalorder %s9722_s27, %s10171_s7 }
  0x79   :  { %p9728_p2 = pnand %p9726_p1, %p9723_p0 }
  0x7b   :  { %9731 = shalt.err (!%p9728_p2)
}
  0x7c   :  { %s9732_s1 = scalar_lea.vmem %s103_s0, 128  ;;  %p9737_p4 = scmp.lt.s32.totalorder %s103_s0, %s103_s0 }
  0x7d   :  { %p9733_p3 = scmp.ne.s32.totalorder %s103_s0, %s9732_s1  ;;  %p9738_p5 = scmp.lt.s32.totalorder %s9732_s1, %s9732_s1 }
  0x7f   :  { %p9739_p6 = por %p9738_p5, %p9737_p4 }
  0x81   :  { %p9740_p7 = pnand %p9739_p6, %p9733_p3 }
  0x83   :  { %9743 = shalt.err (!%p9740_p7)
}
  0x84   :  { %105 = dma.hbm_to_vmem [thread:$0]  %s10171_s7, 128, %s103_s0, [#allocation15]  }
  0x85   :  { %9744 = dma.done.wait [#allocation4], 128  }
  0x86   :  { %9745 = vsyncadd [#allocation4], 4294967168 }
  0x87   :  { %9746 = dma.done.wait [#allocation6], 8320  }
  0x88   :  { %9747 = vsyncadd [#allocation6], 4294958976 }
  0x89   :  { %9748 = dma.done.wait [#allocation9], 65664  }
  0x8a   :  { %9749 = vsyncadd [#allocation9], 4294901632 }
  0x8b   :  { %9750 = dma.done.wait [#allocation12], 65664  }
  0x8c   :  { %9751 = vsyncadd [#allocation12], 4294901632 }
  0x8d   :  { %9752 = dma.done.wait [#allocation15], 128  }
  0x8e   :  { %9753 = vsyncadd [#allocation15], 4294967168  ;;  %v9764_v0 = vmov 0   ;;  %v135_v1 = vld [vmem:[#allocation5] sm:$0xff]  ;;  %v136_v14 = vld [vmem:[#allocation5 + $0x8] sm:$0xff]  ;;  %vm8344_vm0 = vcmask 7168  }
  0x8f   :  { %593 = vmatprep.mubr.bf16.mxu0 %v9764_v0  ;;  %634 = vmatprep.mubr.bf16.mxu1 %v9764_v0  ;;  %v139_v2 = vld [vmem:[#allocation5 + $0x20] sm:$0xff]  ;;  %v140_v15 = vld [vmem:[#allocation5 + $0x28] sm:$0xff]  ;;  %v137_v58 = vld [vmem:[#allocation5 + $0x10] sm:$0xff] }
  0x90   :  { %v143_v3 = vld [vmem:[#allocation5 + $0x40] sm:$0xff]  ;;  %v8356_v4 = vcombine.high %v135_v1, %v139_v2  ;;  %v8355_v5 = vcombine.low %v135_v1, %v139_v2  ;;  %v144_v16 = vld [vmem:[#allocation5 + $0x48] sm:$0xff]  ;;  %v8358_v18 = vcombine.high %v136_v14, %v140_v15  ;;  %v8357_v19 = vcombine.low %v136_v14, %v140_v15  ;;  %v141_v59 = vld [vmem:[#allocation5 + $0x30] sm:$0xff] }
  0x91   :  { %v147_v6 = vld [vmem:[#allocation5 + $0x60] sm:$0xff]  ;;  %v148_v17 = vld [vmem:[#allocation5 + $0x68] sm:$0xff]  ;;  %v133_v62 = vld [vmem:[#allocation3] sm:$0xff]  ;;  %v8360_v2 = vcombine.high %v137_v58, %v141_v59 }
  0x92   :  { %v8364_v7 = vcombine.high %v143_v3, %v147_v6  ;;  %v151_v8 = vld [vmem:[#allocation5 + $0x80] sm:$0xff]  ;;  %561 = vmatprep.subr.bf16.mxu0 %v8356_v4  ;;  %v8363_v10 = vcombine.low %v143_v3, %v147_v6  ;;  %v8366_v20 = vcombine.high %v144_v16, %v148_v17  ;;  %v152_v22 = vld [vmem:[#allocation5 + $0x88] sm:$0xff]  ;;  %602 = vmatprep.subr.bf16.mxu1 %v8358_v18  ;;  %v145_v4 = vld [vmem:[#allocation5 + $0x50] sm:$0xff] }
  0x93   :  { %v155_v9 = vld [vmem:[#allocation5 + $0xa0] sm:$0xff]  ;;  %562 = vmatpush1.bf16.msra.mxu0 %v8355_v5  ;;  %v156_v23 = vld [vmem:[#allocation5 + $0xa8] sm:$0xff]  ;;  %603 = vmatpush1.bf16.msra.mxu1 %v8357_v19  ;;  %v8365_v27 = vcombine.low %v144_v16, %v148_v17  ;;  %v149_v5 = vld [vmem:[#allocation5 + $0x70] sm:$0xff]  ;;  %v9922_v6 = vpack.c.bf16 %v133_v62, %v133_v62 }
  0x94   :  { %563 = vmatprep.subr.bf16.mxu0 %v8364_v7  ;;  %v8372_v11 = vcombine.high %v151_v8, %v155_v9  ;;  %v159_v12 = vld [vmem:[#allocation5 + $0xc0] sm:$0xff]  ;;  %v8371_v21 = vcombine.low %v151_v8, %v155_v9  ;;  %604 = vmatprep.subr.bf16.mxu1 %v8366_v20  ;;  %v8374_v28 = vcombine.high %v152_v22, %v156_v23  ;;  %v160_v30 = vld [vmem:[#allocation5 + $0xc8] sm:$0xff]  ;;  %v138_v9 = vld [vmem:[#allocation5 + $0x18] sm:$0xff] }
  0x95   :  { %v163_v13 = vld [vmem:[#allocation5 + $0xe0] sm:$0xff]  ;;  %v164_v31 = vld [vmem:[#allocation5 + $0xe8] sm:$0xff]  ;;  %v8373_v35 = vcombine.low %v152_v22, %v156_v23  ;;  %v8359_v8 = vcombine.low %v137_v58, %v141_v59  ;;  %v157_v14 = vld [vmem:[#allocation5 + $0xb0] sm:$0xff]  ;;  %v8367_v16 = vcombine.low %v145_v4, %v149_v5 }
  0x96   :  { %v8380_v24 = vcombine.high %v159_v12, %v163_v13  ;;  %v167_v25 = vld [vmem:[#allocation5 + $0x100] sm:$0xff]  ;;  %v8379_v29 = vcombine.low %v159_v12, %v163_v13  ;;  %v8382_v36 = vcombine.high %v160_v30, %v164_v31  ;;  %v168_v38 = vld [vmem:[#allocation5 + $0x108] sm:$0xff]  ;;  %v8381_v43 = vcombine.low %v160_v30, %v164_v31  ;;  %v153_v13 = vld [vmem:[#allocation5 + $0x90] sm:$0xff] }
  0x97   :  { %564 = vmatpush1.bf16.msra.mxu0 %v8363_v10  ;;  %v171_v26 = vld [vmem:[#allocation5 + $0x120] sm:$0xff]  ;;  %605 = vmatpush1.bf16.msra.mxu1 %v8365_v27  ;;  %v172_v39 = vld [vmem:[#allocation5 + $0x128] sm:$0xff]  ;;  %v142_v10 = vld [vmem:[#allocation5 + $0x38] sm:$0xff]  ;;  %v8376_v19 = vcombine.high %v153_v13, %v157_v14 }
  0x98   :  { %565 = vmatprep.subr.bf16.mxu0 %v8372_v11  ;;  %v8388_v32 = vcombine.high %v167_v25, %v171_v26  ;;  %v175_v33 = vld [vmem:[#allocation5 + $0x140] sm:$0xff]  ;;  %606 = vmatprep.subr.bf16.mxu1 %v8374_v28  ;;  %v8387_v37 = vcombine.low %v167_v25, %v171_v26  ;;  %v8390_v44 = vcombine.high %v168_v38, %v172_v39  ;;  %v176_v46 = vld [vmem:[#allocation5 + $0x148] sm:$0xff]  ;;  %v146_v17 = vld [vmem:[#allocation5 + $0x58] sm:$0xff] }
  0x99   :  { %v179_v34 = vld [vmem:[#allocation5 + $0x160] sm:$0xff]  ;;  %v180_v47 = vld [vmem:[#allocation5 + $0x168] sm:$0xff]  ;;  %v8389_v51 = vcombine.low %v168_v38, %v172_v39  ;;  %v8368_v11 = vcombine.high %v145_v4, %v149_v5  ;;  %v8362_v15 = vcombine.high %v138_v9, %v142_v10  ;;  %v150_v18 = vld [vmem:[#allocation5 + $0x78] sm:$0xff]  ;;  %v8361_v22 = vcombine.low %v138_v9, %v142_v10 }
  0x9a   :  { %v8396_v40 = vcombine.high %v175_v33, %v179_v34  ;;  %v183_v41 = vld [vmem:[#allocation5 + $0x180] sm:$0xff]  ;;  %v8395_v45 = vcombine.low %v175_v33, %v179_v34  ;;  %v8398_v52 = vcombine.high %v176_v46, %v180_v47  ;;  %v184_v54 = vld [vmem:[#allocation5 + $0x188] sm:$0xff]  ;;  %v8397_v57 = vcombine.low %v176_v46, %v180_v47  ;;  %v161_v20 = vld [vmem:[#allocation5 + $0xd0] sm:$0xff] }
  0x9b   :  { %566 = vmatpush1.bf16.msra.mxu0 %v8371_v21  ;;  %v187_v42 = vld [vmem:[#allocation5 + $0x1a0] sm:$0xff]  ;;  %607 = vmatpush1.bf16.msra.mxu1 %v8373_v35  ;;  %v188_v55 = vld [vmem:[#allocation5 + $0x1a8] sm:$0xff]  ;;  %v165_v21 = vld [vmem:[#allocation5 + $0xf0] sm:$0xff]  ;;  %v8370_v23 = vcombine.high %v146_v17, %v150_v18  ;;  %v8369_v30 = vcombine.low %v146_v17, %v150_v18 }
  0x9c   :  { %567 = vmatprep.subr.bf16.mxu0 %v8380_v24  ;;  %608 = vmatprep.subr.bf16.mxu1 %v8382_v36  ;;  %v8404_v48 = vcombine.high %v183_v41, %v187_v42  ;;  %v191_v49 = vld [vmem:[#allocation5 + $0x1c0] sm:$0xff]  ;;  %v8403_v53 = vcombine.low %v183_v41, %v187_v42  ;;  %v8406_v60 = vcombine.high %v184_v54, %v188_v55  ;;  %v192_v63 = vld [vmem:[#allocation5 + $0x1c8] sm:$0xff]  ;;  %v154_v25 = vld [vmem:[#allocation5 + $0x98] sm:$0xff] }
  0x9d   :  { %v195_v50 = vld [vmem:[#allocation5 + $0x1e0] sm:$0xff]  ;;  %v196_v1 = vld [vmem:[#allocation5 + $0x1e8] sm:$0xff]  ;;  %v8405_v3 = vcombine.low %v184_v54, %v188_v55  ;;  %v8375_v24 = vcombine.low %v153_v13, %v157_v14  ;;  %v158_v26 = vld [vmem:[#allocation5 + $0xb8] sm:$0xff]  ;;  %v8384_v27 = vcombine.high %v161_v20, %v165_v21 }
  0x9e   :  { %v8412_v56 = vcombine.high %v191_v49, %v195_v50  ;;  %v8411_v61 = vcombine.low %v191_v49, %v195_v50  ;;  %v8414_v7 = vcombine.high %v192_v63, %v196_v1  ;;  %v8413_v12 = vcombine.low %v192_v63, %v196_v1  ;;  %v169_v28 = vld [vmem:[#allocation5 + $0x110] sm:$0xff]  ;;  %v162_v33 = vld [vmem:[#allocation5 + $0xd8] sm:$0xff]  ;;  %v741_v5 = vld [vmem:[#allocation8 + $0x40] sm:$0xff] }
  0x9f   :  { %568 = vmatpush1.bf16.msra.mxu0 %v8379_v29  ;;  %609 = vmatpush1.bf16.msra.mxu1 %v8381_v43  ;;  %v173_v29 = vld [vmem:[#allocation5 + $0x130] sm:$0xff]  ;;  %v8378_v31 = vcombine.high %v154_v25, %v158_v26  ;;  %v166_v34 = vld [vmem:[#allocation5 + $0xf8] sm:$0xff]  ;;  %v8377_v38 = vcombine.low %v154_v25, %v158_v26  ;;  %v749_v14 = vld [vmem:[#allocation8 + $0x80] sm:$0xff] }
  0xa0   :  { %569 = vmatprep.subr.bf16.mxu0 %v8388_v32  ;;  %610 = vmatprep.subr.bf16.mxu1 %v8390_v44  ;;  %v8383_v32 = vcombine.low %v161_v20, %v165_v21  ;;  %v8392_v35 = vcombine.high %v169_v28, %v173_v29  ;;  %v177_v36 = vld [vmem:[#allocation5 + $0x150] sm:$0xff]  ;;  %v8386_v39 = vcombine.high %v162_v33, %v166_v34  ;;  %v170_v41 = vld [vmem:[#allocation5 + $0x118] sm:$0xff] }
  0xa1   :  { %v174_v42 = vld [vmem:[#allocation5 + $0x138] sm:$0xff]  ;;  %v185_v43 = vld [vmem:[#allocation5 + $0x190] sm:$0xff] }
  0xa2   :  { %v189_v44 = vld [vmem:[#allocation5 + $0x1b0] sm:$0xff]  ;;  %v8394_v46 = vcombine.high %v170_v41, %v174_v42  ;;  %v182_v49 = vld [vmem:[#allocation5 + $0x178] sm:$0xff] }
  0xa3   :  { %570 = vmatpush1.bf16.msra.mxu0 %v8387_v37  ;;  %611 = vmatpush1.bf16.msra.mxu1 %v8389_v51  ;;  %v181_v37 = vld [vmem:[#allocation5 + $0x170] sm:$0xff]  ;;  %v8408_v50 = vcombine.high %v185_v43, %v189_v44  ;;  %v8407_v55 = vcombine.low %v185_v43, %v189_v44  ;;  %v194_v1 = vld [vmem:[#allocation5 + $0x1d8] sm:$0xff]  ;;  %v781_v44 = vld [vmem:[#allocation8 + $0x180] sm:$0xff] }
  0xa4   :  { %571 = vmatprep.subr.bf16.mxu0 %v8396_v40  ;;  %612 = vmatprep.subr.bf16.mxu1 %v8398_v52  ;;  %v8391_v40 = vcombine.low %v169_v28, %v173_v29  ;;  %v8399_v47 = vcombine.low %v177_v36, %v181_v37  ;;  %v193_v51 = vld [vmem:[#allocation5 + $0x1d0] sm:$0xff] }
  0xa5   :  { %v197_v52 = vld [vmem:[#allocation5 + $0x1f0] sm:$0xff] }
  0xa6   :  { %v8416_v58 = vcombine.high %v193_v51, %v197_v52  ;;  %v8415_v63 = vcombine.low %v193_v51, %v197_v52  ;;  %v734_v10 = vld [vmem:[#allocation8 + $0x8] sm:$0xff]  ;;  %v789_v52 = vld [vmem:[#allocation8 + $0x1c0] sm:$0xff] }
  0xa7   :  { %572 = vmatpush1.bf16.msra.mxu0 %v8395_v45  ;;  %613 = vmatpush1.bf16.msra.mxu1 %v8397_v57  ;;  %v8385_v45 = vcombine.low %v162_v33, %v166_v34  ;;  %v190_v57 = vld [vmem:[#allocation5 + $0x1b8] sm:$0xff]  ;;  %v742_v18 = vld [vmem:[#allocation8 + $0x48] sm:$0xff] }
  0xa8   :  { %573 = vmatprep.subr.bf16.mxu0 %v8404_v48  ;;  %614 = vmatprep.subr.bf16.mxu1 %v8406_v60  ;;  %v178_v48 = vld [vmem:[#allocation5 + $0x158] sm:$0xff]  ;;  %v733_v60 = vld [vmem:[#allocation8] sm:$0xff]  ;;  %v750_v26 = vld [vmem:[#allocation8 + $0x88] sm:$0xff] }
  0xa9   :  { %v8402_v54 = vcombine.high %v178_v48, %v182_v49  ;;  %v8401_v59 = vcombine.low %v178_v48, %v182_v49  ;;  %v758_v34 = vld [vmem:[#allocation8 + $0xc8] sm:$0xff] }
  0xaa   :  { %v774_v48 = vld [vmem:[#allocation8 + $0x148] sm:$0xff] }
  0xab   :  { %574 = vmatpush1.bf16.msra.mxu0 %v8403_v53  ;;  %615 = vmatpush1.bf16.msra.mxu1 %v8405_v3  ;;  %v8393_v53 = vcombine.low %v170_v41, %v174_v42  ;;  %v766_v41 = vld [vmem:[#allocation8 + $0x108] sm:$0xff] }
  0xac   :  { %575 = vmatprep.subr.bf16.mxu0 %v8412_v56  ;;  %616 = vmatprep.subr.bf16.mxu1 %v8414_v7  ;;  %v186_v56 = vld [vmem:[#allocation5 + $0x198] sm:$0xff]  ;;  %v745_v7 = vld [vmem:[#allocation8 + $0x60] sm:$0xff]  ;;  %v770_v42 = vld [vmem:[#allocation8 + $0x128] sm:$0xff] }
  0xad   :  { %v8410_v62 = vcombine.high %v186_v56, %v190_v57  ;;  %v8409_v4 = vcombine.low %v186_v56, %v190_v57  ;;  %v8427_v17 = vcombine.low %v741_v5, %v745_v7  ;;  %v778_v49 = vld [vmem:[#allocation8 + $0x168] sm:$0xff]  ;;  %v8453_v51 = vcombine.low %v766_v41, %v770_v42 }
  0xae   :  { %v782_v56 = vld [vmem:[#allocation8 + $0x188] sm:$0xff] }
  0xaf   :  { %576 = vmatpush1.bf16.msra.mxu0 %v8411_v61  ;;  %617 = vmatpush1.bf16.msra.mxu1 %v8413_v12  ;;  %v737_v61 = vld [vmem:[#allocation8 + $0x20] sm:$0xff]  ;;  %v8428_v12 = vcombine.high %v741_v5, %v745_v7  ;;  %v786_v57 = vld [vmem:[#allocation8 + $0x1a8] sm:$0xff] }
  0xb0   :  { %643 = vmatprep.subr.bf16.mxu0 %v8360_v2  ;;  %684 = vmatprep.subr.bf16.mxu1 %v8362_v15  ;;  %v198_v2 = vld [vmem:[#allocation5 + $0x1f8] sm:$0xff]  ;;  %v8420_v3 = vcombine.high %v733_v60, %v737_v61  ;;  %v8419_v9 = vcombine.low %v733_v60, %v737_v61  ;;  %v753_v15 = vld [vmem:[#allocation8 + $0xa0] sm:$0xff] }
  0xb1   :  { %v8417_v13 = vcombine.low %v194_v1, %v198_v2  ;;  %v8436_v20 = vcombine.high %v749_v14, %v753_v15  ;;  %v8435_v25 = vcombine.low %v749_v14, %v753_v15  ;;  %v797_v60 = vld [vmem:[#allocation8 + $0x200] sm:$0xff] }
  0xb2   :  { %594 = vmatmul.mubr.bf16.vlgmr.msra.gmra.mrb[0].mxu0 %v9922_v6  ;;  %635 = vmatmul.mubr.bf16.vlgmr.msra.gmra.mrb[0].mxu1 %v9922_v6  ;;  %v801_v61 = vld [vmem:[#allocation8 + $0x220] sm:$0xff] }
  0xb3   :  { %644 = vmatpush1.bf16.msra.mxu0 %v8359_v8  ;;  %675 = vmatprep.mubr.bf16.mxu0 %v9764_v0  ;;  %v8418_v8 = vcombine.high %v194_v1, %v198_v2  ;;  %v790_v1 = vld [vmem:[#allocation8 + $0x1c8] sm:$0xff]  ;;  %v805_v5 = vld [vmem:[#allocation8 + $0x240] sm:$0xff] }
  0xb4   :  { %645 = vmatprep.subr.bf16.mxu0 %v8368_v11  ;;  %685 = vmatpush1.bf16.msra.mxu1 %v8361_v22  ;;  %v738_v11 = vld [vmem:[#allocation8 + $0x28] sm:$0xff]  ;;  %v757_v22 = vld [vmem:[#allocation8 + $0xc0] sm:$0xff] }
  0xb5   :  { %716 = vmatprep.mubr.bf16.mxu1 %v9764_v0  ;;  %686 = vmatprep.subr.bf16.mxu1 %v8370_v23  ;;  %v8400_v0 = vcombine.high %v177_v36, %v181_v37  ;;  %v8421_v21 = vcombine.low %v734_v10, %v738_v11  ;;  %v761_v23 = vld [vmem:[#allocation8 + $0xe0] sm:$0xff]  ;;  %v794_v2 = vld [vmem:[#allocation8 + $0x1e8] sm:$0xff] }
  0xb6   :  { %v8444_v28 = vcombine.high %v757_v22, %v761_v23  ;;  %v8443_v33 = vcombine.low %v757_v22, %v761_v23  ;;  %v809_v7 = vld [vmem:[#allocation8 + $0x260] sm:$0xff] }
  0xb7   :  { %646 = vmatpush1.bf16.msra.mxu0 %v8367_v16  ;;  %v8422_v16 = vcombine.high %v734_v10, %v738_v11  ;;  %v798_v10 = vld [vmem:[#allocation8 + $0x208] sm:$0xff]  ;;  %v813_v14 = vld [vmem:[#allocation8 + $0x280] sm:$0xff] }
  0xb8   :  { %647 = vmatprep.subr.bf16.mxu0 %v8376_v19  ;;  %687 = vmatpush1.bf16.msra.mxu1 %v8369_v30  ;;  %v746_v19 = vld [vmem:[#allocation8 + $0x68] sm:$0xff]  ;;  %v765_v30 = vld [vmem:[#allocation8 + $0x100] sm:$0xff] }
  0xb9   :  { %688 = vmatprep.subr.bf16.mxu1 %v8378_v31  ;;  %v8429_v29 = vcombine.low %v742_v18, %v746_v19  ;;  %v769_v31 = vld [vmem:[#allocation8 + $0x120] sm:$0xff]  ;;  %v802_v11 = vld [vmem:[#allocation8 + $0x228] sm:$0xff] }
  0xba   :  { %v8452_v36 = vcombine.high %v765_v30, %v769_v31  ;;  %v817_v15 = vld [vmem:[#allocation8 + $0x2a0] sm:$0xff] }
  0xbb   :  { %648 = vmatpush1.bf16.msra.mxu0 %v8375_v24  ;;  %v8430_v24 = vcombine.high %v742_v18, %v746_v19  ;;  %v806_v18 = vld [vmem:[#allocation8 + $0x248] sm:$0xff]  ;;  %v821_v22 = vld [vmem:[#allocation8 + $0x2c0] sm:$0xff] }
  0xbc   :  { %649 = vmatprep.subr.bf16.mxu0 %v8384_v27  ;;  %689 = vmatpush1.bf16.msra.mxu1 %v8377_v38  ;;  %v754_v27 = vld [vmem:[#allocation8 + $0xa8] sm:$0xff]  ;;  %v773_v38 = vld [vmem:[#allocation8 + $0x140] sm:$0xff] }
  0xbd   :  { %690 = vmatprep.subr.bf16.mxu1 %v8386_v39  ;;  %v8437_v37 = vcombine.low %v750_v26, %v754_v27  ;;  %v777_v39 = vld [vmem:[#allocation8 + $0x160] sm:$0xff]  ;;  %v810_v19 = vld [vmem:[#allocation8 + $0x268] sm:$0xff] }
  0xbe   :  { %v825_v23 = vld [vmem:[#allocation8 + $0x2e0] sm:$0xff] }
  0xbf   :  { %650 = vmatpush1.bf16.msra.mxu0 %v8383_v32  ;;  %v8438_v32 = vcombine.high %v750_v26, %v754_v27  ;;  %v814_v26 = vld [vmem:[#allocation8 + $0x288] sm:$0xff] }
  0xc0   :  { %651 = vmatprep.subr.bf16.mxu0 %v8392_v35  ;;  %691 = vmatpush1.bf16.msra.mxu1 %v8385_v45  ;;  %v762_v35 = vld [vmem:[#allocation8 + $0xe8] sm:$0xff]  ;;  %v785_v45 = vld [vmem:[#allocation8 + $0x1a0] sm:$0xff] }
  0xc1   :  { %692 = vmatprep.subr.bf16.mxu1 %v8394_v46  ;;  %v8445_v43 = vcombine.low %v758_v34, %v762_v35  ;;  %v8454_v46 = vcombine.high %v766_v41, %v770_v42  ;;  %v818_v27 = vld [vmem:[#allocation8 + $0x2a8] sm:$0xff] }
  0xc2   :  { %v830_v41 = vld [vmem:[#allocation8 + $0x308] sm:$0xff] }
  0xc3   :  { %652 = vmatpush1.bf16.msra.mxu0 %v8391_v40  ;;  %v8451_v40 = vcombine.low %v765_v30, %v769_v31  ;;  %v829_v30 = vld [vmem:[#allocation8 + $0x300] sm:$0xff]  ;;  %v834_v42 = vld [vmem:[#allocation8 + $0x328] sm:$0xff] }
  0xc4   :  { %653 = vmatprep.subr.bf16.mxu0 %v8400_v0  ;;  %693 = vmatpush1.bf16.msra.mxu1 %v8393_v53  ;;  %v8460_v0 = vcombine.high %v773_v38, %v777_v39  ;;  %v793_v53 = vld [vmem:[#allocation8 + $0x1e0] sm:$0xff] }
  0xc5   :  { %694 = vmatprep.subr.bf16.mxu1 %v8402_v54  ;;  %v8462_v54 = vcombine.high %v774_v48, %v778_v49  ;;  %v833_v31 = vld [vmem:[#allocation8 + $0x320] sm:$0xff] }
  0xc7   :  { %654 = vmatpush1.bf16.msra.mxu0 %v8399_v47  ;;  %v8459_v47 = vcombine.low %v773_v38, %v777_v39  ;;  %v837_v38 = vld [vmem:[#allocation8 + $0x340] sm:$0xff] }
  0xc8   :  { %655 = vmatprep.subr.bf16.mxu0 %v8408_v50  ;;  %695 = vmatpush1.bf16.msra.mxu1 %v8401_v59  ;;  %v8468_v50 = vcombine.high %v781_v44, %v785_v45  ;;  %v8461_v59 = vcombine.low %v774_v48, %v778_v49  ;;  %v841_v39 = vld [vmem:[#allocation8 + $0x360] sm:$0xff]  ;;  %v838_v48 = vld [vmem:[#allocation8 + $0x348] sm:$0xff] }
  0xc9   :  { %696 = vmatprep.subr.bf16.mxu1 %v8410_v62  ;;  %v8470_v62 = vcombine.high %v782_v56, %v786_v57  ;;  %v842_v49 = vld [vmem:[#allocation8 + $0x368] sm:$0xff] }
  0xcb   :  { %656 = vmatpush1.bf16.msra.mxu0 %v8407_v55  ;;  %v8467_v55 = vcombine.low %v781_v44, %v785_v45  ;;  %v845_v44 = vld [vmem:[#allocation8 + $0x380] sm:$0xff] }
  0xcc   :  { %657 = vmatprep.subr.bf16.mxu0 %v8416_v58  ;;  %697 = vmatpush1.bf16.msra.mxu1 %v8409_v4  ;;  %v8476_v58 = vcombine.high %v789_v52, %v793_v53  ;;  %v8469_v4 = vcombine.low %v782_v56, %v786_v57  ;;  %v849_v45 = vld [vmem:[#allocation8 + $0x3a0] sm:$0xff]  ;;  %v846_v56 = vld [vmem:[#allocation8 + $0x388] sm:$0xff] }
  0xcd   :  { %698 = vmatprep.subr.bf16.mxu1 %v8418_v8  ;;  %v8478_v8 = vcombine.high %v790_v1, %v794_v2  ;;  %v850_v57 = vld [vmem:[#allocation8 + $0x3a8] sm:$0xff] }
  0xcf   :  { %658 = vmatpush1.bf16.msra.mxu0 %v8415_v63  ;;  %v8475_v63 = vcombine.low %v789_v52, %v793_v53  ;;  %v853_v52 = vld [vmem:[#allocation8 + $0x3c0] sm:$0xff] }
  0xd0   :  { %3847 = vmatprep.subr.bf16.mxu0 %v8420_v3  ;;  %699 = vmatpush1.bf16.msra.mxu1 %v8417_v13  ;;  %v8484_v3 = vcombine.high %v797_v60, %v801_v61  ;;  %v8477_v13 = vcombine.low %v790_v1, %v794_v2  ;;  %v857_v53 = vld [vmem:[#allocation8 + $0x3e0] sm:$0xff]  ;;  %v8534_v1 = vcombine.high %v846_v56, %v850_v57 }
  0xd1   :  { %4011 = vmatprep.subr.bf16.mxu1 %v8422_v16  ;;  %v8486_v16 = vcombine.high %v798_v10, %v802_v11 }
  0xd2   :  { %676 = vmatmul.mubr.bf16.vlgmr.msra.gmra.mrb[4].mxu0 %v9922_v6 }
  0xd3   :  { %3848 = vmatpush1.bf16.msra.mxu0 %v8419_v9  ;;  %717 = vmatmul.mubr.bf16.vlgmr.msra.gmra.mrb[4].mxu1 %v9922_v6  ;;  %v8446_v6 = vcombine.high %v758_v34, %v762_v35  ;;  %v8483_v9 = vcombine.low %v797_v60, %v801_v61  ;;  %v822_v34 = vld [vmem:[#allocation8 + $0x2c8] sm:$0xff]  ;;  %v865_v60 = vld [vmem:[#allocation8 + $0x420] sm:$0xff] }
  0xd4   :  { %3849 = vmatprep.subr.bf16.mxu0 %v8428_v12  ;;  %4012 = vmatpush1.bf16.msra.mxu1 %v8421_v21  ;;  %v8492_v12 = vcombine.high %v805_v5, %v809_v7  ;;  %v8485_v21 = vcombine.low %v798_v10, %v802_v11  ;;  %v826_v35 = vld [vmem:[#allocation8 + $0x2e8] sm:$0xff] }
  0xd5   :  { %4013 = vmatprep.subr.bf16.mxu1 %v8430_v24  ;;  %v8494_v24 = vcombine.high %v806_v18, %v810_v19  ;;  %v862_v61 = vld [vmem:[#allocation8 + $0x408] sm:$0xff] }
  0xd7   :  { %3850 = vmatpush1.bf16.msra.mxu0 %v8427_v17  ;;  %v8491_v17 = vcombine.low %v805_v5, %v809_v7  ;;  %v854_v5 = vld [vmem:[#allocation8 + $0x3c8] sm:$0xff] }
  0xd8   :  { %3851 = vmatprep.subr.bf16.mxu0 %v8436_v20  ;;  %4014 = vmatpush1.bf16.msra.mxu1 %v8429_v29  ;;  %v8500_v20 = vcombine.high %v813_v14, %v817_v15  ;;  %v8493_v29 = vcombine.low %v806_v18, %v810_v19  ;;  %v858_v7 = vld [vmem:[#allocation8 + $0x3e8] sm:$0xff] }
  0xd9   :  { %4015 = vmatprep.subr.bf16.mxu1 %v8438_v32  ;;  %v8502_v32 = vcombine.high %v814_v26, %v818_v27  ;;  %v8542_v10 = vcombine.high %v854_v5, %v858_v7  ;;  %v8541_v11 = vcombine.low %v854_v5, %v858_v7 }
  0xdb   :  { %3852 = vmatpush1.bf16.msra.mxu0 %v8435_v25  ;;  %v8499_v25 = vcombine.low %v813_v14, %v817_v15 }
  0xdc   :  { %3853 = vmatprep.subr.bf16.mxu0 %v8444_v28  ;;  %4016 = vmatpush1.bf16.msra.mxu1 %v8437_v37  ;;  %v8508_v28 = vcombine.high %v821_v22, %v825_v23  ;;  %v8501_v37 = vcombine.low %v814_v26, %v818_v27  ;;  %v873_v27 = vld [vmem:[#allocation8 + $0x460] sm:$0xff] }
  0xdd   :  { %4017 = vmatprep.subr.bf16.mxu1 %v8446_v6  ;;  %v8510_v6 = vcombine.high %v822_v34, %v826_v35 }
  0xdf   :  { %3854 = vmatpush1.bf16.msra.mxu0 %v8443_v33  ;;  %v8507_v33 = vcombine.low %v821_v22, %v825_v23 }
  0xe0   :  { %3855 = vmatprep.subr.bf16.mxu0 %v8452_v36  ;;  %4018 = vmatpush1.bf16.msra.mxu1 %v8445_v43  ;;  %v8516_v36 = vcombine.high %v829_v30, %v833_v31  ;;  %v8509_v43 = vcombine.low %v822_v34, %v826_v35 }
  0xe1   :  { %4019 = vmatprep.subr.bf16.mxu1 %v8454_v46  ;;  %v8518_v46 = vcombine.high %v830_v41, %v834_v42 }
  0xe3   :  { %3856 = vmatpush1.bf16.msra.mxu0 %v8451_v40  ;;  %v8515_v40 = vcombine.low %v829_v30, %v833_v31 }
  0xe4   :  { %3857 = vmatprep.subr.bf16.mxu0 %v8460_v0  ;;  %4020 = vmatpush1.bf16.msra.mxu1 %v8453_v51  ;;  %v8524_v0 = vcombine.high %v837_v38, %v841_v39  ;;  %v8517_v51 = vcombine.low %v830_v41, %v834_v42 }
  0xe5   :  { %4021 = vmatprep.subr.bf16.mxu1 %v8462_v54  ;;  %v8526_v54 = vcombine.high %v838_v48, %v842_v49 }
  0xe7   :  { %3858 = vmatpush1.bf16.msra.mxu0 %v8459_v47  ;;  %v8523_v47 = vcombine.low %v837_v38, %v841_v39  ;;  %v878_v38 = vld [vmem:[#allocation8 + $0x488] sm:$0xff] }
  0xe8   :  { %3859 = vmatprep.subr.bf16.mxu0 %v8468_v50  ;;  %4022 = vmatpush1.bf16.msra.mxu1 %v8461_v59  ;;  %v8532_v50 = vcombine.high %v845_v44, %v849_v45  ;;  %v861_v59 = vld [vmem:[#allocation8 + $0x400] sm:$0xff]  ;;  %v882_v39 = vld [vmem:[#allocation8 + $0x4a8] sm:$0xff] }
  0xe9   :  { %4023 = vmatprep.subr.bf16.mxu1 %v8470_v62  ;;  %v8525_v62 = vcombine.low %v838_v48, %v842_v49  ;;  %v8547_v2 = vcombine.low %v861_v59, %v865_v60  ;;  %v889_v48 = vld [vmem:[#allocation8 + $0x4e0] sm:$0xff]  ;;  %v886_v49 = vld [vmem:[#allocation8 + $0x4c8] sm:$0xff] }
  0xeb   :  { %3860 = vmatpush1.bf16.msra.mxu0 %v8467_v55  ;;  %v8531_v55 = vcombine.low %v845_v44, %v849_v45  ;;  %v8566_v45 = vcombine.high %v878_v38, %v882_v39 }
  0xec   :  { %3861 = vmatprep.subr.bf16.mxu0 %v8476_v58  ;;  %4024 = vmatpush1.bf16.msra.mxu1 %v8469_v4  ;;  %v8540_v58 = vcombine.high %v853_v52, %v857_v53  ;;  %v8539_v4 = vcombine.low %v853_v52, %v857_v53  ;;  %v8565_v53 = vcombine.low %v878_v38, %v882_v39 }
  0xed   :  { %4025 = vmatprep.subr.bf16.mxu1 %v8478_v8  ;;  %v8548_v8 = vcombine.high %v861_v59, %v865_v60  ;;  %v898_v59 = vld [vmem:[#allocation8 + $0x528] sm:$0xff] }
  0xef   :  { %3862 = vmatpush1.bf16.msra.mxu0 %v8475_v63  ;;  %v866_v63 = vld [vmem:[#allocation8 + $0x428] sm:$0xff] }
  0xf0   :  { %3863 = vmatprep.subr.bf16.mxu0 %v8484_v3  ;;  %4026 = vmatpush1.bf16.msra.mxu1 %v8477_v13  ;;  %v8549_v3 = vcombine.low %v862_v61, %v866_v63  ;;  %v201_v13 = vlaneseq }
  0xf1   :  { %4027 = vmatprep.subr.bf16.mxu1 %v8486_v16  ;;  %v9935_v16 = vld [vmem:[#allocation7] sm:$0xff] }
  0xf2   :  { %v9930_v14 = vshrl.u32 %v201_v13, 7  ;;  %v914_v13 = vld [vmem:[#allocation8 + $0x5a8] sm:$0xff] }
  0xf3   :  { %3864 = vmatpush1.bf16.msra.mxu0 %v8483_v9  ;;  %v8533_v9 = vcombine.low %v846_v56, %v850_v57  ;;  %v893_v56 = vld [vmem:[#allocation8 + $0x500] sm:$0xff] }
  0xf4   :  { %3865 = vmatprep.subr.bf16.mxu0 %v8492_v12  ;;  %4028 = vmatpush1.bf16.msra.mxu1 %v8485_v21  ;;  %v8550_v12 = vcombine.high %v862_v61, %v866_v63  ;;  %v9933_v15 = vsub.s32 0, %v9930_v14  ;;  %v9945_v21 = vsub.s32 3, %v9930_v14  ;;  %v897_v57 = vld [vmem:[#allocation8 + $0x520] sm:$0xff] }
  0xf5   :  { %4029 = vmatprep.subr.bf16.mxu1 %v8494_v24  ;;  %v869_v24 = vld [vmem:[#allocation8 + $0x440] sm:$0xff]  ;;  %v8579_v5 = vcombine.low %v893_v56, %v897_v57 }
  0xf6   :  { %v204_v18 = vrot.slane %v9935_v16, %v9933_v15  ;;  %v8556_v34 = vcombine.high %v869_v24, %v873_v27  ;;  %v8555_v41 = vcombine.low %v869_v24, %v873_v27  ;;  %v921_v24 = vld [vmem:[#allocation8 + $0x5e0] sm:$0xff] }
  0xf7   :  { %3866 = vmatpush1.bf16.msra.mxu0 %v8491_v17  ;;  %v9938_v17 = vsub.s32 1, %v9930_v14 }
  0xf8   :  { %3867 = vmatprep.subr.bf16.mxu0 %v8500_v20  ;;  %4030 = vmatpush1.bf16.msra.mxu1 %v8493_v29  ;;  %v874_v29 = vld [vmem:[#allocation8 + $0x468] sm:$0xff] }
  0xf9   :  { %4031 = vmatprep.subr.bf16.mxu1 %v8502_v32  ;;  %v208_v19 = vrot.slane %v9935_v16, %v9938_v17  ;;  %v216_v32 = vrot.slane %v9935_v16, %v9945_v21 }
  0xfb   :  { %3868 = vmatpush1.bf16.msra.mxu0 %v8499_v25 }
  0xfc   :  { %3869 = vmatprep.subr.bf16.mxu0 %v8508_v28  ;;  %4032 = vmatpush1.bf16.msra.mxu1 %v8501_v37  ;;  %v870_v28 = vld [vmem:[#allocation8 + $0x448] sm:$0xff]  ;;  %v881_v37 = vld [vmem:[#allocation8 + $0x4a0] sm:$0xff] }
  0xfd   :  { %4033 = vmatprep.subr.bf16.mxu1 %v8510_v6  ;;  %v8558_v35 = vcombine.high %v870_v28, %v874_v29  ;;  %v8557_v42 = vcombine.low %v870_v28, %v874_v29 }
  0xff   :  { %3870 = vmatpush1.bf16.msra.mxu0 %v8507_v33 }
 0x100   :  { %3871 = vmatprep.subr.bf16.mxu0 %v8516_v36  ;;  %4034 = vmatpush1.bf16.msra.mxu1 %v8509_v43  ;;  %v877_v36 = vld [vmem:[#allocation8 + $0x480] sm:$0xff] }
 0x101   :  { %4035 = vmatprep.subr.bf16.mxu1 %v8518_v46  ;;  %v8564_v44 = vcombine.high %v877_v36, %v881_v37  ;;  %v885_v46 = vld [vmem:[#allocation8 + $0x4c0] sm:$0xff]  ;;  %v8563_v52 = vcombine.low %v877_v36, %v881_v37  ;;  %v930_v36 = vld [vmem:[#allocation8 + $0x628] sm:$0xff] }
 0x102   :  { %v8571_v60 = vcombine.low %v885_v46, %v889_v48 }
 0x103   :  { %3872 = vmatpush1.bf16.msra.mxu0 %v8515_v40 }
 0x104   :  { %3873 = vmatprep.subr.bf16.mxu0 %v8524_v0  ;;  %4036 = vmatpush1.bf16.msra.mxu1 %v8517_v51 }
 0x105   :  { %4037 = vmatprep.subr.bf16.mxu1 %v8526_v54  ;;  %v8572_v54 = vcombine.high %v885_v46, %v889_v48 }
 0x107   :  { %3874 = vmatpush1.bf16.msra.mxu0 %v8523_v47 }
 0x108   :  { %3875 = vmatprep.subr.bf16.mxu0 %v8532_v50  ;;  %4038 = vmatpush1.bf16.msra.mxu1 %v8525_v62  ;;  %v890_v50 = vld [vmem:[#allocation8 + $0x4e8] sm:$0xff]  ;;  %v8580_v62 = vcombine.high %v893_v56, %v897_v57 }
 0x109   :  { %4039 = vmatprep.subr.bf16.mxu1 %v8534_v1  ;;  %v8573_v61 = vcombine.low %v886_v49, %v890_v50  ;;  %v901_v1 = vld [vmem:[#allocation8 + $0x540] sm:$0xff]  ;;  %v946_v56 = vld [vmem:[#allocation8 + $0x6a8] sm:$0xff] }
 0x10b   :  { %3876 = vmatpush1.bf16.msra.mxu0 %v8531_v55  ;;  %v8574_v55 = vcombine.high %v886_v49, %v890_v50 }
 0x10c   :  { %3877 = vmatprep.subr.bf16.mxu0 %v8540_v58  ;;  %4040 = vmatpush1.bf16.msra.mxu1 %v8533_v9  ;;  %v894_v58 = vld [vmem:[#allocation8 + $0x508] sm:$0xff] }
 0x10d   :  { %4041 = vmatprep.subr.bf16.mxu1 %v8542_v10  ;;  %v8582_v63 = vcombine.high %v894_v58, %v898_v59  ;;  %v8581_v7 = vcombine.low %v894_v58, %v898_v59  ;;  %v909_v10 = vld [vmem:[#allocation8 + $0x580] sm:$0xff] }
 0x10f   :  { %3878 = vmatpush1.bf16.msra.mxu0 %v8539_v4  ;;  %v906_v4 = vld [vmem:[#allocation8 + $0x568] sm:$0xff] }
 0x110   :  { %3888 = vmatprep.subr.bf16.mxu0 %v8548_v8  ;;  %4042 = vmatpush1.bf16.msra.mxu1 %v8541_v11  ;;  %v913_v11 = vld [vmem:[#allocation8 + $0x5a0] sm:$0xff] }
 0x111   :  { %4052 = vmatprep.subr.bf16.mxu1 %v8550_v12  ;;  %v910_v12 = vld [vmem:[#allocation8 + $0x588] sm:$0xff]  ;;  %v8595_v27 = vcombine.low %v909_v10, %v913_v11 }
 0x112   :  { %v8597_v28 = vcombine.low %v910_v12, %v914_v13 }
 0x185   :  { %v595_v20 = vpop.f32.mrb[0].mxu0  ;;  %v9955_v6 = vpop.f32.mrb[0].mxu1 }
 0x186   :  { %v596_v22 = vadd.f32 %v595_v20, %v204_v18  ;;  %v597_v23 = vpop.f32.mrb[1].mxu0  ;;  %v638_v40 = vpop.f32.mrb[1].mxu1  ;;  %v8596_v20 = vcombine.high %v909_v10, %v913_v11  ;;  %v962_v10 = vld [vmem:[#allocation8 + $0x728] sm:$0xff] }
 0x187   :  { %v598_v25 = vadd.f32 %v597_v23, %v208_v19  ;;  %v599_v26 = vpop.f32.mrb[2].mxu0  ;;  %v639_v0 = vadd.f32 %v638_v40, %v216_v32  ;;  %v640_v43 = vpop.f32.mrb[2].mxu1  ;;  %v917_v23 = vld [vmem:[#allocation8 + $0x5c0] sm:$0xff] }
 0x188   :  { %v600_v30 = vpop.f32.mrb[3].mxu0  ;;  %v9951_v33 = vpack.c.bf16 %v596_v22, %v596_v22  ;;  %v641_v47 = vpop.f32.mrb[3].mxu1  ;;  %v8598_v22 = vcombine.high %v910_v12, %v914_v13  ;;  %v922_v26 = vld [vmem:[#allocation8 + $0x5e8] sm:$0xff]  ;;  %v8604_v29 = vcombine.high %v917_v23, %v921_v24  ;;  %v925_v32 = vld [vmem:[#allocation8 + $0x600] sm:$0xff]  ;;  %v8603_v37 = vcombine.low %v917_v23, %v921_v24 }
 0x189   :  { %v9947_v31 = vpack.c.bf16 %v598_v25, %v598_v25  ;;  %v9959_v51 = vpack.c.bf16 %v639_v0, %v639_v0  ;;  %v918_v25 = vld [vmem:[#allocation8 + $0x5c8] sm:$0xff]  ;;  %v937_v43 = vld [vmem:[#allocation8 + $0x660] sm:$0xff] }
 0x18a   :  { %v8606_v30 = vcombine.high %v918_v25, %v922_v26  ;;  %v8605_v38 = vcombine.low %v918_v25, %v922_v26  ;;  %v970_v23 = vld [vmem:[#allocation8 + $0x768] sm:$0xff] }
 0x18b   :  { %3879 = vmatprep.mubr.bf16.mxu0 %v9947_v31  ;;  %4043 = vmatprep.mubr.bf16.mxu1 %v9947_v31 }
 0x18c   :  { %3880 = vmatmul.mubr.bf16.vlgmr.msra.gmra.mrb[8].mxu0 %v9951_v33  ;;  %4044 = vmatmul.mubr.bf16.vlgmr.msra.gmra.mrb[8].mxu1 %v9951_v33 }
 0x18d   :  { %3889 = vmatpush1.bf16.msra.mxu0 %v8547_v2  ;;  %4053 = vmatpush1.bf16.msra.mxu1 %v8549_v3  ;;  %v905_v2 = vld [vmem:[#allocation8 + $0x560] sm:$0xff]  ;;  %v902_v3 = vld [vmem:[#allocation8 + $0x548] sm:$0xff] }
 0x18e   :  { %3890 = vmatprep.subr.bf16.mxu0 %v8556_v34  ;;  %4054 = vmatprep.subr.bf16.mxu1 %v8558_v35  ;;  %v8588_v8 = vcombine.high %v901_v1, %v905_v2  ;;  %v8590_v9 = vcombine.high %v902_v3, %v906_v4  ;;  %v8587_v18 = vcombine.low %v901_v1, %v905_v2  ;;  %v929_v34 = vld [vmem:[#allocation8 + $0x620] sm:$0xff]  ;;  %v926_v35 = vld [vmem:[#allocation8 + $0x608] sm:$0xff] }
 0x18f   :  { %3920 = vmatprep.mubr.bf16.mxu0 %v9959_v51  ;;  %4084 = vmatprep.mubr.bf16.mxu1 %v9959_v51  ;;  %v8589_v19 = vcombine.low %v902_v3, %v906_v4  ;;  %v8612_v40 = vcombine.high %v925_v32, %v929_v34  ;;  %v8611_v48 = vcombine.low %v925_v32, %v929_v34  ;;  %v954_v1 = vld [vmem:[#allocation8 + $0x6e8] sm:$0xff]  ;;  %v977_v32 = vld [vmem:[#allocation8 + $0x7a0] sm:$0xff] }
 0x190   :  { %v8613_v49 = vcombine.low %v926_v35, %v930_v36  ;;  %v974_v34 = vld [vmem:[#allocation8 + $0x788] sm:$0xff] }
 0x191   :  { %3891 = vmatpush1.bf16.msra.mxu0 %v8555_v41  ;;  %4055 = vmatpush1.bf16.msra.mxu1 %v8557_v42  ;;  %v8614_v41 = vcombine.high %v926_v35, %v930_v36  ;;  %v933_v42 = vld [vmem:[#allocation8 + $0x640] sm:$0xff]  ;;  %v978_v35 = vld [vmem:[#allocation8 + $0x7a8] sm:$0xff] }
 0x192   :  { %3892 = vmatprep.subr.bf16.mxu0 %v8564_v44  ;;  %4056 = vmatprep.subr.bf16.mxu1 %v8566_v45  ;;  %v934_v44 = vld [vmem:[#allocation8 + $0x648] sm:$0xff]  ;;  %v8620_v50 = vcombine.high %v933_v42, %v937_v43  ;;  %v8619_v57 = vcombine.low %v933_v42, %v937_v43  ;;  %v8662_v43 = vcombine.high %v974_v34, %v978_v35 }
 0x193   :  { %v938_v45 = vld [vmem:[#allocation8 + $0x668] sm:$0xff] }
 0x194   :  { %v8621_v58 = vcombine.low %v934_v44, %v938_v45 }
 0x195   :  { %3893 = vmatpush1.bf16.msra.mxu0 %v8563_v52  ;;  %4057 = vmatpush1.bf16.msra.mxu1 %v8565_v53  ;;  %v8622_v52 = vcombine.high %v934_v44, %v938_v45  ;;  %v941_v53 = vld [vmem:[#allocation8 + $0x680] sm:$0xff] }
 0x196   :  { %3894 = vmatprep.subr.bf16.mxu0 %v8572_v54  ;;  %4058 = vmatprep.subr.bf16.mxu1 %v8574_v55  ;;  %v945_v54 = vld [vmem:[#allocation8 + $0x6a0] sm:$0xff]  ;;  %v942_v55 = vld [vmem:[#allocation8 + $0x688] sm:$0xff] }
 0x197   :  { %v8628_v59 = vcombine.high %v941_v53, %v945_v54  ;;  %v8627_v2 = vcombine.low %v941_v53, %v945_v54  ;;  %v8629_v3 = vcombine.low %v942_v55, %v946_v56  ;;  %v981_v44 = vld [vmem:[#allocation8 + $0x7c0] sm:$0xff] }
 0x198   :  { %v985_v45 = vld [vmem:[#allocation8 + $0x7e0] sm:$0xff] }
 0x199   :  { %3895 = vmatpush1.bf16.msra.mxu0 %v8571_v60  ;;  %4059 = vmatpush1.bf16.msra.mxu1 %v8573_v61  ;;  %v8630_v60 = vcombine.high %v942_v55, %v946_v56  ;;  %v949_v61 = vld [vmem:[#allocation8 + $0x6c0] sm:$0xff]  ;;  %v8668_v53 = vcombine.high %v981_v44, %v985_v45 }
 0x19a   :  { %3896 = vmatprep.subr.bf16.mxu0 %v8580_v62  ;;  %4060 = vmatprep.subr.bf16.mxu1 %v8582_v63  ;;  %v953_v62 = vld [vmem:[#allocation8 + $0x6e0] sm:$0xff]  ;;  %v950_v63 = vld [vmem:[#allocation8 + $0x6c8] sm:$0xff] }
 0x19b   :  { %v8636_v4 = vcombine.high %v949_v61, %v953_v62  ;;  %v8635_v11 = vcombine.low %v949_v61, %v953_v62  ;;  %v8637_v12 = vcombine.low %v950_v63, %v954_v1  ;;  %v989_v55 = vld [vmem:[#allocation8 + $0x800] sm:$0xff]  ;;  %v8667_v61 = vcombine.low %v981_v44, %v985_v45 }
 0x19c   :  { %v993_v56 = vld [vmem:[#allocation8 + $0x820] sm:$0xff] }
 0x19d   :  { %3897 = vmatpush1.bf16.msra.mxu0 %v8579_v5  ;;  %4061 = vmatpush1.bf16.msra.mxu1 %v8581_v7  ;;  %v8638_v5 = vcombine.high %v950_v63, %v954_v1  ;;  %v957_v7 = vld [vmem:[#allocation8 + $0x700] sm:$0xff]  ;;  %v8676_v63 = vcombine.high %v989_v55, %v993_v56 }
 0x19e   :  { %3898 = vmatprep.subr.bf16.mxu0 %v8588_v8  ;;  %4062 = vmatprep.subr.bf16.mxu1 %v8590_v9  ;;  %v961_v8 = vld [vmem:[#allocation8 + $0x720] sm:$0xff]  ;;  %v958_v9 = vld [vmem:[#allocation8 + $0x708] sm:$0xff] }
 0x19f   :  { %v8644_v13 = vcombine.high %v957_v7, %v961_v8  ;;  %v8643_v24 = vcombine.low %v957_v7, %v961_v8  ;;  %v8645_v25 = vcombine.low %v958_v9, %v962_v10 }
 0x1a1   :  { %3899 = vmatpush1.bf16.msra.mxu0 %v8587_v18  ;;  %4063 = vmatpush1.bf16.msra.mxu1 %v8589_v19  ;;  %v8646_v18 = vcombine.high %v958_v9, %v962_v10  ;;  %v965_v19 = vld [vmem:[#allocation8 + $0x740] sm:$0xff]  ;;  %v8675_v9 = vcombine.low %v989_v55, %v993_v56 }
 0x1a2   :  { %3900 = vmatprep.subr.bf16.mxu0 %v8596_v20  ;;  %4064 = vmatprep.subr.bf16.mxu1 %v8598_v22  ;;  %v969_v20 = vld [vmem:[#allocation8 + $0x760] sm:$0xff]  ;;  %v966_v22 = vld [vmem:[#allocation8 + $0x748] sm:$0xff] }
 0x1a5   :  { %3901 = vmatpush1.bf16.msra.mxu0 %v8595_v27  ;;  %4065 = vmatpush1.bf16.msra.mxu1 %v8597_v28  ;;  %v9963_v39 = vpop.f32.mrb[4].mxu0  ;;  %v8652_v27 = vcombine.high %v965_v19, %v969_v20  ;;  %v8654_v28 = vcombine.high %v966_v22, %v970_v23 }
 0x1a6   :  { %3902 = vmatprep.subr.bf16.mxu0 %v8604_v29  ;;  %4066 = vmatprep.subr.bf16.mxu1 %v8606_v30  ;;  %v9965_v0 = vpop.f32.mrb[5].mxu0  ;;  %v9967_v26 = vpop.f32.mrb[4].mxu1  ;;  %v973_v29 = vld [vmem:[#allocation8 + $0x780] sm:$0xff] }
 0x1a7   :  { %v681_v46 = vpop.f32.mrb[6].mxu0  ;;  %v9969_v30 = vpop.f32.mrb[5].mxu1  ;;  %v8660_v42 = vcombine.high %v973_v29, %v977_v32 }
 0x1a8   :  { %v682_v47 = vpop.f32.mrb[7].mxu0  ;;  %v722_v36 = vpop.f32.mrb[6].mxu1  ;;  %v982_v46 = vld [vmem:[#allocation8 + $0x7c8] sm:$0xff] }
 0x1a9   :  { %3903 = vmatpush1.bf16.msra.mxu0 %v8603_v37  ;;  %4067 = vmatpush1.bf16.msra.mxu1 %v8605_v38  ;;  %v9972_v37 = vsub.s32 2, %v9930_v14  ;;  %v723_v38 = vpop.f32.mrb[7].mxu1  ;;  %v986_v47 = vld [vmem:[#allocation8 + $0x7e8] sm:$0xff] }
 0x1aa   :  { %3904 = vmatprep.subr.bf16.mxu0 %v8612_v40  ;;  %4068 = vmatprep.subr.bf16.mxu1 %v8614_v41  ;;  %v8651_v40 = vcombine.low %v965_v19, %v969_v20  ;;  %v8653_v41 = vcombine.low %v966_v22, %v970_v23  ;;  %v8670_v54 = vcombine.high %v982_v46, %v986_v47  ;;  %v1010_v19 = vld [vmem:[#allocation8 + $0x8a8] sm:$0xff]  ;;  %v1021_v38 = vld [vmem:[#allocation8 + $0x900] sm:$0xff] }
 0x1ab   :  { %v8669_v62 = vcombine.low %v982_v46, %v986_v47  ;;  %v1029_v47 = vld [vmem:[#allocation8 + $0x940] sm:$0xff] }
 0x1ad   :  { %3905 = vmatpush1.bf16.msra.mxu0 %v8611_v48  ;;  %4069 = vmatpush1.bf16.msra.mxu1 %v8613_v49  ;;  %v9975_v48 = vsub.s32 5, %v9930_v14  ;;  %v212_v49 = vrot.slane %v9935_v16, %v9972_v37 }
 0x1ae   :  { %3906 = vmatprep.subr.bf16.mxu0 %v8620_v50  ;;  %4070 = vmatprep.subr.bf16.mxu1 %v8622_v52  ;;  %v8659_v50 = vcombine.low %v973_v29, %v977_v32  ;;  %v8661_v52 = vcombine.low %v974_v34, %v978_v35  ;;  %v1018_v29 = vld [vmem:[#allocation8 + $0x8e8] sm:$0xff] }
 0x1b1   :  { %3907 = vmatpush1.bf16.msra.mxu0 %v8619_v57  ;;  %4071 = vmatpush1.bf16.msra.mxu1 %v8621_v58  ;;  %v990_v57 = vld [vmem:[#allocation8 + $0x808] sm:$0xff] }
 0x1b2   :  { %3908 = vmatprep.subr.bf16.mxu0 %v8628_v59  ;;  %4072 = vmatprep.subr.bf16.mxu1 %v8630_v60  ;;  %v994_v58 = vld [vmem:[#allocation8 + $0x828] sm:$0xff]  ;;  %v224_v59 = vrot.slane %v9935_v16, %v9975_v48  ;;  %v637_v60 = vadd.f32 %v9955_v6, %v212_v49  ;;  %v1033_v49 = vld [vmem:[#allocation8 + $0x960] sm:$0xff] }
 0x1b3   :  { %v8678_v1 = vcombine.high %v990_v57, %v994_v58  ;;  %v8677_v6 = vcombine.low %v990_v57, %v994_v58  ;;  %v8716_v55 = vcombine.high %v1029_v47, %v1033_v49  ;;  %v1037_v57 = vld [vmem:[#allocation8 + $0x980] sm:$0xff] }
 0x1b4   :  { %v680_v7 = vadd.f32 %v9965_v0, %v224_v59  ;;  %v9983_v8 = vpack.c.bf16 %v637_v60, %v637_v60  ;;  %v1041_v58 = vld [vmem:[#allocation8 + $0x9a0] sm:$0xff]  ;;  %v1038_v59 = vld [vmem:[#allocation8 + $0x988] sm:$0xff] }
 0x1b5   :  { %3909 = vmatpush1.bf16.msra.mxu0 %v8627_v2  ;;  %4073 = vmatpush1.bf16.msra.mxu1 %v8629_v3  ;;  %v997_v2 = vld [vmem:[#allocation8 + $0x840] sm:$0xff]  ;;  %v1042_v60 = vld [vmem:[#allocation8 + $0x9a8] sm:$0xff] }
 0x1b6   :  { %3910 = vmatprep.subr.bf16.mxu0 %v8636_v4  ;;  %4074 = vmatprep.subr.bf16.mxu1 %v8638_v5  ;;  %v1001_v3 = vld [vmem:[#allocation8 + $0x860] sm:$0xff]  ;;  %v998_v4 = vld [vmem:[#allocation8 + $0x848] sm:$0xff]  ;;  %v9985_v20 = vpack.c.bf16 %v680_v7, %v680_v7  ;;  %v8723_v7 = vcombine.low %v1037_v57, %v1041_v58 }
 0x1b7   :  { %v1002_v5 = vld [vmem:[#allocation8 + $0x868] sm:$0xff]  ;;  %v8684_v10 = vcombine.high %v997_v2, %v1001_v3  ;;  %v8683_v0 = vcombine.low %v997_v2, %v1001_v3  ;;  %v1045_v2 = vld [vmem:[#allocation8 + $0x9c0] sm:$0xff] }
 0x1b8   :  { %v8685_v22 = vcombine.low %v998_v4, %v1002_v5  ;;  %v1049_v3 = vld [vmem:[#allocation8 + $0x9e0] sm:$0xff] }
 0x1b9   :  { %3911 = vmatpush1.bf16.msra.mxu0 %v8635_v11  ;;  %4075 = vmatpush1.bf16.msra.mxu1 %v8637_v12  ;;  %v8686_v11 = vcombine.high %v998_v4, %v1002_v5  ;;  %v1005_v12 = vld [vmem:[#allocation8 + $0x880] sm:$0xff]  ;;  %v1046_v4 = vld [vmem:[#allocation8 + $0x9c8] sm:$0xff] }
 0x1ba   :  { %3912 = vmatprep.subr.bf16.mxu0 %v8644_v13  ;;  %4076 = vmatprep.subr.bf16.mxu1 %v8646_v18  ;;  %v1009_v13 = vld [vmem:[#allocation8 + $0x8a0] sm:$0xff]  ;;  %v1006_v18 = vld [vmem:[#allocation8 + $0x888] sm:$0xff] }
 0x1bb   :  { %v8692_v23 = vcombine.high %v1005_v12, %v1009_v13  ;;  %v8691_v32 = vcombine.low %v1005_v12, %v1009_v13  ;;  %v8693_v34 = vcombine.low %v1006_v18, %v1010_v19  ;;  %v1050_v5 = vld [vmem:[#allocation8 + $0x9e8] sm:$0xff]  ;;  %v1057_v12 = vld [vmem:[#allocation8 + $0xa20] sm:$0xff] }
 0x1bc   :  { %v1054_v13 = vld [vmem:[#allocation8 + $0xa08] sm:$0xff] }
 0x1bd   :  { %3913 = vmatpush1.bf16.msra.mxu0 %v8643_v24  ;;  %4077 = vmatpush1.bf16.msra.mxu1 %v8645_v25  ;;  %v8694_v24 = vcombine.high %v1006_v18, %v1010_v19  ;;  %v1013_v25 = vld [vmem:[#allocation8 + $0x8c0] sm:$0xff]  ;;  %v1058_v18 = vld [vmem:[#allocation8 + $0xa28] sm:$0xff]  ;;  %v8731_v19 = vcombine.low %v1045_v2, %v1049_v3 }
 0x1be   :  { %3914 = vmatprep.subr.bf16.mxu0 %v8652_v27  ;;  %4078 = vmatprep.subr.bf16.mxu1 %v8654_v28  ;;  %v1017_v27 = vld [vmem:[#allocation8 + $0x8e0] sm:$0xff]  ;;  %v1014_v28 = vld [vmem:[#allocation8 + $0x8c8] sm:$0xff] }
 0x1bf   :  { %v8700_v35 = vcombine.high %v1013_v25, %v1017_v27  ;;  %v8702_v36 = vcombine.high %v1014_v28, %v1018_v29  ;;  %v8701_v44 = vcombine.low %v1014_v28, %v1018_v29  ;;  %v1066_v28 = vld [vmem:[#allocation8 + $0xa68] sm:$0xff] }
 0x1c1   :  { %3915 = vmatpush1.bf16.msra.mxu0 %v8651_v40  ;;  %4079 = vmatpush1.bf16.msra.mxu1 %v8653_v41  ;;  %v1025_v40 = vld [vmem:[#allocation8 + $0x920] sm:$0xff]  ;;  %v1022_v41 = vld [vmem:[#allocation8 + $0x908] sm:$0xff] }
 0x1c2   :  { %3916 = vmatprep.subr.bf16.mxu0 %v8660_v42  ;;  %4080 = vmatprep.subr.bf16.mxu1 %v8662_v43  ;;  %v1026_v42 = vld [vmem:[#allocation8 + $0x928] sm:$0xff]  ;;  %v8699_v43 = vcombine.low %v1013_v25, %v1017_v27  ;;  %v8708_v45 = vcombine.high %v1021_v38, %v1025_v40  ;;  %v1065_v25 = vld [vmem:[#allocation8 + $0xa60] sm:$0xff] }
 0x1c3   :  { %v8710_v46 = vcombine.high %v1022_v41, %v1026_v42  ;;  %v1062_v27 = vld [vmem:[#allocation8 + $0xa48] sm:$0xff] }
 0x1c5   :  { %3917 = vmatpush1.bf16.msra.mxu0 %v8659_v50  ;;  %4081 = vmatpush1.bf16.msra.mxu1 %v8661_v52  ;;  %v1030_v50 = vld [vmem:[#allocation8 + $0x948] sm:$0xff] }
 0x1c6   :  { %3918 = vmatprep.subr.bf16.mxu0 %v8668_v53  ;;  %4082 = vmatprep.subr.bf16.mxu1 %v8670_v54  ;;  %v1034_v52 = vld [vmem:[#allocation8 + $0x968] sm:$0xff]  ;;  %v8707_v53 = vcombine.low %v1021_v38, %v1025_v40  ;;  %v8709_v54 = vcombine.low %v1022_v41, %v1026_v42  ;;  %v1073_v38 = vld [vmem:[#allocation8 + $0xaa0] sm:$0xff] }
 0x1c7   :  { %v8718_v56 = vcombine.high %v1030_v50, %v1034_v52  ;;  %v1070_v40 = vld [vmem:[#allocation8 + $0xa88] sm:$0xff] }
 0x1c8   :  { %v1074_v41 = vld [vmem:[#allocation8 + $0xaa8] sm:$0xff] }
 0x1c9   :  { %3919 = vmatpush1.bf16.msra.mxu0 %v8667_v61  ;;  %4083 = vmatpush1.bf16.msra.mxu1 %v8669_v62  ;;  %v8715_v61 = vcombine.low %v1029_v47, %v1033_v49  ;;  %v8717_v62 = vcombine.low %v1030_v50, %v1034_v52  ;;  %v1081_v47 = vld [vmem:[#allocation8 + $0xae0] sm:$0xff]  ;;  %v1078_v49 = vld [vmem:[#allocation8 + $0xac8] sm:$0xff] }
 0x1ca   :  { %3929 = vmatprep.subr.bf16.mxu0 %v8676_v63  ;;  %4093 = vmatprep.subr.bf16.mxu1 %v8678_v1  ;;  %v8724_v63 = vcombine.high %v1037_v57, %v1041_v58  ;;  %v8726_v1 = vcombine.high %v1038_v59, %v1042_v60  ;;  %v1082_v50 = vld [vmem:[#allocation8 + $0xae8] sm:$0xff]  ;;  %v1089_v57 = vld [vmem:[#allocation8 + $0xb20] sm:$0xff] }
 0x1cb   :  { %v1086_v58 = vld [vmem:[#allocation8 + $0xb08] sm:$0xff] }
 0x1cc   :  { %3921 = vmatmul.mubr.bf16.vlgmr.msra.gmra.mrb[8].mxu0 %v9983_v8  ;;  %4085 = vmatmul.mubr.bf16.vlgmr.msra.gmra.mrb[8].mxu1 %v9983_v8 }
 0x1cd   :  { %3930 = vmatpush1.bf16.msra.mxu0 %v8675_v9  ;;  %4094 = vmatpush1.bf16.msra.mxu1 %v8677_v6  ;;  %v8725_v9 = vcombine.low %v1038_v59, %v1042_v60  ;;  %v8732_v6 = vcombine.high %v1045_v2, %v1049_v3  ;;  %v1090_v59 = vld [vmem:[#allocation8 + $0xb28] sm:$0xff]  ;;  %v1097_v2 = vld [vmem:[#allocation8 + $0xb60] sm:$0xff] }
 0x1ce   :  { %3931 = vmatprep.subr.bf16.mxu0 %v8684_v10  ;;  %4095 = vmatprep.subr.bf16.mxu1 %v8686_v11  ;;  %v8734_v10 = vcombine.high %v1046_v4, %v1050_v5  ;;  %v1053_v11 = vld [vmem:[#allocation8 + $0xa00] sm:$0xff]  ;;  %v1094_v3 = vld [vmem:[#allocation8 + $0xb48] sm:$0xff] }
 0x1cf   :  { %3961 = vmatprep.mubr.bf16.mxu0 %v9985_v20  ;;  %4125 = vmatprep.mubr.bf16.mxu1 %v9985_v20  ;;  %v8739_v29 = vcombine.low %v1053_v11, %v1057_v12 }
 0x1d1   :  { %3932 = vmatpush1.bf16.msra.mxu0 %v8683_v0  ;;  %4096 = vmatpush1.bf16.msra.mxu1 %v8685_v22  ;;  %v8733_v0 = vcombine.low %v1046_v4, %v1050_v5  ;;  %v8740_v22 = vcombine.high %v1053_v11, %v1057_v12  ;;  %v1098_v4 = vld [vmem:[#allocation8 + $0xb68] sm:$0xff]  ;;  %v1105_v11 = vld [vmem:[#allocation8 + $0xba0] sm:$0xff] }
 0x1d2   :  { %3933 = vmatprep.subr.bf16.mxu0 %v8692_v23  ;;  %4097 = vmatprep.subr.bf16.mxu1 %v8694_v24  ;;  %v8742_v23 = vcombine.high %v1054_v13, %v1058_v18  ;;  %v1061_v24 = vld [vmem:[#allocation8 + $0xa40] sm:$0xff]  ;;  %v1102_v12 = vld [vmem:[#allocation8 + $0xb88] sm:$0xff] }
 0x1d3   :  { %v8747_v42 = vcombine.low %v1061_v24, %v1065_v25 }
 0x1d5   :  { %3934 = vmatpush1.bf16.msra.mxu0 %v8691_v32  ;;  %4098 = vmatpush1.bf16.msra.mxu1 %v8693_v34  ;;  %v8741_v32 = vcombine.low %v1054_v13, %v1058_v18  ;;  %v8748_v34 = vcombine.high %v1061_v24, %v1065_v25  ;;  %v1106_v13 = vld [vmem:[#allocation8 + $0xba8] sm:$0xff]  ;;  %v9992_v18 = vsub.s32 4, %v9930_v14  ;;  %v1109_v24 = vld [vmem:[#allocation8 + $0xbc0] sm:$0xff] }
 0x1d6   :  { %3935 = vmatprep.subr.bf16.mxu0 %v8700_v35  ;;  %4099 = vmatprep.subr.bf16.mxu1 %v8702_v36  ;;  %v8750_v35 = vcombine.high %v1062_v27, %v1066_v28  ;;  %v1069_v36 = vld [vmem:[#allocation8 + $0xa80] sm:$0xff] }
 0x1d7   :  { %v8755_v52 = vcombine.low %v1069_v36, %v1073_v38  ;;  %v1113_v25 = vld [vmem:[#allocation8 + $0xbe0] sm:$0xff] }
 0x1d9   :  { %3936 = vmatpush1.bf16.msra.mxu0 %v8699_v43  ;;  %4100 = vmatpush1.bf16.msra.mxu1 %v8701_v44  ;;  %v8749_v43 = vcombine.low %v1062_v27, %v1066_v28  ;;  %v8756_v44 = vcombine.high %v1069_v36, %v1073_v38  ;;  %v1110_v27 = vld [vmem:[#allocation8 + $0xbc8] sm:$0xff]  ;;  %v8796_v36 = vcombine.high %v1109_v24, %v1113_v25 }
 0x1da   :  { %3937 = vmatprep.subr.bf16.mxu0 %v8708_v45  ;;  %4101 = vmatprep.subr.bf16.mxu1 %v8710_v46  ;;  %v8758_v45 = vcombine.high %v1070_v40, %v1074_v41  ;;  %v1077_v46 = vld [vmem:[#allocation8 + $0xac0] sm:$0xff]  ;;  %v1114_v28 = vld [vmem:[#allocation8 + $0xbe8] sm:$0xff] }
 0x1db   :  { %v8763_v60 = vcombine.low %v1077_v46, %v1081_v47  ;;  %v8798_v38 = vcombine.high %v1110_v27, %v1114_v28 }
 0x1dd   :  { %3938 = vmatpush1.bf16.msra.mxu0 %v8707_v53  ;;  %4102 = vmatpush1.bf16.msra.mxu1 %v8709_v54  ;;  %v8757_v53 = vcombine.low %v1070_v40, %v1074_v41  ;;  %v8764_v54 = vcombine.high %v1077_v46, %v1081_v47  ;;  %v1117_v40 = vld [vmem:[#allocation8 + $0xc00] sm:$0xff]  ;;  %v8795_v46 = vcombine.low %v1109_v24, %v1113_v25 }
 0x1de   :  { %3939 = vmatprep.subr.bf16.mxu0 %v8716_v55  ;;  %4103 = vmatprep.subr.bf16.mxu1 %v8718_v56  ;;  %v8766_v55 = vcombine.high %v1078_v49, %v1082_v50  ;;  %v1085_v56 = vld [vmem:[#allocation8 + $0xb00] sm:$0xff]  ;;  %v8797_v47 = vcombine.low %v1110_v27, %v1114_v28 }
 0x1df   :  { %v8771_v5 = vcombine.low %v1085_v56, %v1089_v57  ;;  %v1121_v41 = vld [vmem:[#allocation8 + $0xc20] sm:$0xff] }
 0x1e1   :  { %3940 = vmatpush1.bf16.msra.mxu0 %v8715_v61  ;;  %4104 = vmatpush1.bf16.msra.mxu1 %v8717_v62  ;;  %v8765_v61 = vcombine.low %v1078_v49, %v1082_v50  ;;  %v8772_v62 = vcombine.high %v1085_v56, %v1089_v57  ;;  %v8804_v49 = vcombine.high %v1117_v40, %v1121_v41 }
 0x1e2   :  { %3941 = vmatprep.subr.bf16.mxu0 %v8724_v63  ;;  %4105 = vmatprep.subr.bf16.mxu1 %v8726_v1  ;;  %v8774_v63 = vcombine.high %v1086_v58, %v1090_v59  ;;  %v1093_v1 = vld [vmem:[#allocation8 + $0xb40] sm:$0xff] }
 0x1e5   :  { %3942 = vmatpush1.bf16.msra.mxu0 %v8723_v7  ;;  %4106 = vmatpush1.bf16.msra.mxu1 %v8725_v9  ;;  %v8773_v7 = vcombine.low %v1086_v58, %v1090_v59  ;;  %v8780_v9 = vcombine.high %v1093_v1, %v1097_v2 }
 0x1e6   :  { %3943 = vmatprep.subr.bf16.mxu0 %v8732_v6  ;;  %4107 = vmatprep.subr.bf16.mxu1 %v8734_v10  ;;  %v8782_v6 = vcombine.high %v1094_v3, %v1098_v4  ;;  %v1101_v10 = vld [vmem:[#allocation8 + $0xb80] sm:$0xff] }
 0x1e9   :  { %3944 = vmatpush1.bf16.msra.mxu0 %v8731_v19  ;;  %4108 = vmatpush1.bf16.msra.mxu1 %v8733_v0  ;;  %v8779_v19 = vcombine.low %v1093_v1, %v1097_v2  ;;  %v8781_v0 = vcombine.low %v1094_v3, %v1098_v4 }
 0x1ea   :  { %3945 = vmatprep.subr.bf16.mxu0 %v8740_v22  ;;  %4109 = vmatprep.subr.bf16.mxu1 %v8742_v23  ;;  %v8788_v22 = vcombine.high %v1101_v10, %v1105_v11  ;;  %v8790_v23 = vcombine.high %v1102_v12, %v1106_v13 }
 0x1ed   :  { %3946 = vmatpush1.bf16.msra.mxu0 %v8739_v29  ;;  %4110 = vmatpush1.bf16.msra.mxu1 %v8741_v32  ;;  %v9995_v29 = vsub.s32 7, %v9930_v14  ;;  %v220_v32 = vrot.slane %v9935_v16, %v9992_v18 }
 0x1ee   :  { %3947 = vmatprep.subr.bf16.mxu0 %v8748_v34  ;;  %4111 = vmatprep.subr.bf16.mxu1 %v8750_v35  ;;  %v8787_v34 = vcombine.low %v1101_v10, %v1105_v11  ;;  %v8789_v35 = vcombine.low %v1102_v12, %v1106_v13 }
 0x1f1   :  { %3948 = vmatpush1.bf16.msra.mxu0 %v8747_v42  ;;  %4112 = vmatpush1.bf16.msra.mxu1 %v8749_v43  ;;  %v1118_v42 = vld [vmem:[#allocation8 + $0xc08] sm:$0xff] }
 0x1f2   :  { %3949 = vmatprep.subr.bf16.mxu0 %v8756_v44  ;;  %4113 = vmatprep.subr.bf16.mxu1 %v8758_v45  ;;  %v1122_v43 = vld [vmem:[#allocation8 + $0xc28] sm:$0xff]  ;;  %v232_v44 = vrot.slane %v9935_v16, %v9995_v29  ;;  %v678_v45 = vadd.f32 %v9963_v39, %v220_v32  ;;  %v8803_v16 = vcombine.low %v1117_v40, %v1121_v41  ;;  %v1157_v32 = vld [vmem:[#allocation8 + $0xd40] sm:$0xff] }
 0x1f3   :  { %v8806_v50 = vcombine.high %v1118_v42, %v1122_v43  ;;  %v8805_v39 = vcombine.low %v1118_v42, %v1122_v43  ;;  %v1165_v43 = vld [vmem:[#allocation8 + $0xd80] sm:$0xff] }
 0x1f4   :  { %v721_v56 = vadd.f32 %v9969_v30, %v232_v44  ;;  %v10003_v57 = vpack.c.bf16 %v678_v45, %v678_v45  ;;  %v1169_v44 = vld [vmem:[#allocation8 + $0xda0] sm:$0xff]  ;;  %v1166_v45 = vld [vmem:[#allocation8 + $0xd88] sm:$0xff] }
 0x1f5   :  { %3950 = vmatpush1.bf16.msra.mxu0 %v8755_v52  ;;  %4114 = vmatpush1.bf16.msra.mxu1 %v8757_v53  ;;  %v1125_v52 = vld [vmem:[#allocation8 + $0xc40] sm:$0xff] }
 0x1f6   :  { %3951 = vmatprep.subr.bf16.mxu0 %v8764_v54  ;;  %4115 = vmatprep.subr.bf16.mxu1 %v8766_v55  ;;  %v1129_v53 = vld [vmem:[#allocation8 + $0xc60] sm:$0xff]  ;;  %v1126_v54 = vld [vmem:[#allocation8 + $0xc48] sm:$0xff]  ;;  %v10005_v1 = vpack.c.bf16 %v721_v56, %v721_v56 }
 0x1f7   :  { %v1130_v55 = vld [vmem:[#allocation8 + $0xc68] sm:$0xff]  ;;  %v8812_v58 = vcombine.high %v1125_v52, %v1129_v53  ;;  %v8811_v30 = vcombine.low %v1125_v52, %v1129_v53  ;;  %v1173_v53 = vld [vmem:[#allocation8 + $0xdc0] sm:$0xff] }
 0x1f8   :  { %v8814_v59 = vcombine.high %v1126_v54, %v1130_v55  ;;  %v8813_v2 = vcombine.low %v1126_v54, %v1130_v55  ;;  %v1177_v54 = vld [vmem:[#allocation8 + $0xde0] sm:$0xff]  ;;  %v1174_v55 = vld [vmem:[#allocation8 + $0xdc8] sm:$0xff] }
 0x1f9   :  { %3952 = vmatpush1.bf16.msra.mxu0 %v8763_v60  ;;  %4116 = vmatpush1.bf16.msra.mxu1 %v8765_v61  ;;  %v1133_v60 = vld [vmem:[#allocation8 + $0xc80] sm:$0xff]  ;;  %v1178_v56 = vld [vmem:[#allocation8 + $0xde8] sm:$0xff] }
 0x1fa   :  { %3953 = vmatprep.subr.bf16.mxu0 %v8772_v62  ;;  %4117 = vmatprep.subr.bf16.mxu1 %v8774_v63  ;;  %v1137_v61 = vld [vmem:[#allocation8 + $0xca0] sm:$0xff]  ;;  %v1134_v62 = vld [vmem:[#allocation8 + $0xc88] sm:$0xff] }
 0x1fb   :  { %v1138_v63 = vld [vmem:[#allocation8 + $0xca8] sm:$0xff]  ;;  %v8820_v3 = vcombine.high %v1133_v60, %v1137_v61  ;;  %v8819_v10 = vcombine.low %v1133_v60, %v1137_v61  ;;  %v1181_v60 = vld [vmem:[#allocation8 + $0xe00] sm:$0xff] }
 0x1fc   :  { %v8822_v4 = vcombine.high %v1134_v62, %v1138_v63  ;;  %v8821_v11 = vcombine.low %v1134_v62, %v1138_v63  ;;  %v1185_v61 = vld [vmem:[#allocation8 + $0xe20] sm:$0xff]  ;;  %v1182_v62 = vld [vmem:[#allocation8 + $0xe08] sm:$0xff] }
 0x1fd   :  { %3954 = vmatpush1.bf16.msra.mxu0 %v8771_v5  ;;  %4118 = vmatpush1.bf16.msra.mxu1 %v8773_v7  ;;  %v1141_v5 = vld [vmem:[#allocation8 + $0xcc0] sm:$0xff]  ;;  %v1186_v63 = vld [vmem:[#allocation8 + $0xe28] sm:$0xff] }
 0x1fe   :  { %3955 = vmatprep.subr.bf16.mxu0 %v8780_v9  ;;  %4119 = vmatprep.subr.bf16.mxu1 %v8782_v6  ;;  %v1145_v7 = vld [vmem:[#allocation8 + $0xce0] sm:$0xff]  ;;  %v1142_v9 = vld [vmem:[#allocation8 + $0xcc8] sm:$0xff] }
 0x1ff   :  { %v1146_v6 = vld [vmem:[#allocation8 + $0xce8] sm:$0xff]  ;;  %v8828_v12 = vcombine.high %v1141_v5, %v1145_v7  ;;  %v8827_v24 = vcombine.low %v1141_v5, %v1145_v7  ;;  %v1189_v5 = vld [vmem:[#allocation8 + $0xe40] sm:$0xff] }
 0x200   :  { %v8830_v13 = vcombine.high %v1142_v9, %v1146_v6  ;;  %v8829_v25 = vcombine.low %v1142_v9, %v1146_v6  ;;  %v1193_v7 = vld [vmem:[#allocation8 + $0xe60] sm:$0xff]  ;;  %v1190_v9 = vld [vmem:[#allocation8 + $0xe48] sm:$0xff] }
 0x201   :  { %3956 = vmatpush1.bf16.msra.mxu0 %v8779_v19  ;;  %4120 = vmatpush1.bf16.msra.mxu1 %v8781_v0  ;;  %v1149_v19 = vld [vmem:[#allocation8 + $0xd00] sm:$0xff]  ;;  %v1194_v6 = vld [vmem:[#allocation8 + $0xe68] sm:$0xff] }
 0x202   :  { %3957 = vmatprep.subr.bf16.mxu0 %v8788_v22  ;;  %4121 = vmatprep.subr.bf16.mxu1 %v8790_v23  ;;  %v1153_v0 = vld [vmem:[#allocation8 + $0xd20] sm:$0xff]  ;;  %v1150_v22 = vld [vmem:[#allocation8 + $0xd08] sm:$0xff] }
 0x203   :  { %v1154_v23 = vld [vmem:[#allocation8 + $0xd28] sm:$0xff]  ;;  %v8836_v27 = vcombine.high %v1149_v19, %v1153_v0 }
 0x204   :  { %v8838_v28 = vcombine.high %v1150_v22, %v1154_v23  ;;  %v8837_v40 = vcombine.low %v1150_v22, %v1154_v23  ;;  %v1198_v22 = vld [vmem:[#allocation8 + $0xe88] sm:$0xff] }
 0x205   :  { %3958 = vmatpush1.bf16.msra.mxu0 %v8787_v34  ;;  %4122 = vmatpush1.bf16.msra.mxu1 %v8789_v35  ;;  %v1161_v34 = vld [vmem:[#allocation8 + $0xd60] sm:$0xff]  ;;  %v1158_v35 = vld [vmem:[#allocation8 + $0xd48] sm:$0xff] }
 0x206   :  { %3959 = vmatprep.subr.bf16.mxu0 %v8796_v36  ;;  %4123 = vmatprep.subr.bf16.mxu1 %v8798_v38  ;;  %v1162_v36 = vld [vmem:[#allocation8 + $0xd68] sm:$0xff]  ;;  %v8835_v38 = vcombine.low %v1149_v19, %v1153_v0  ;;  %v8844_v41 = vcombine.high %v1157_v32, %v1161_v34  ;;  %v1197_v19 = vld [vmem:[#allocation8 + $0xe80] sm:$0xff] }
 0x207   :  { %v8846_v42 = vcombine.high %v1158_v35, %v1162_v36  ;;  %v1201_v0 = vld [vmem:[#allocation8 + $0xea0] sm:$0xff]  ;;  %v1202_v23 = vld [vmem:[#allocation8 + $0xea8] sm:$0xff] }
 0x209   :  { %3960 = vmatpush1.bf16.msra.mxu0 %v8795_v46  ;;  %4124 = vmatpush1.bf16.msra.mxu1 %v8797_v47  ;;  %v1170_v46 = vld [vmem:[#allocation8 + $0xda8] sm:$0xff]  ;;  %v8843_v47 = vcombine.low %v1157_v32, %v1161_v34  ;;  %v1205_v32 = vld [vmem:[#allocation8 + $0xec0] sm:$0xff] }
 0x20a   :  { %3970 = vmatprep.subr.bf16.mxu0 %v8804_v49  ;;  %4134 = vmatprep.subr.bf16.mxu1 %v8806_v50  ;;  %v8845_v49 = vcombine.low %v1158_v35, %v1162_v36  ;;  %v8852_v50 = vcombine.high %v1165_v43, %v1169_v44  ;;  %v8854_v52 = vcombine.high %v1166_v45, %v1170_v46  ;;  %v1209_v34 = vld [vmem:[#allocation8 + $0xee0] sm:$0xff]  ;;  %v1206_v35 = vld [vmem:[#allocation8 + $0xec8] sm:$0xff] }
 0x20b   :  { %v1210_v36 = vld [vmem:[#allocation8 + $0xee8] sm:$0xff] }
 0x20c   :  { %3962 = vmatmul.mubr.bf16.vlgmr.msra.gmra.mrb[8].mxu0 %v10003_v57  ;;  %4126 = vmatmul.mubr.bf16.vlgmr.msra.gmra.mrb[8].mxu1 %v10003_v57 }
 0x20d   :  { %3971 = vmatpush1.bf16.msra.mxu0 %v8803_v16  ;;  %4135 = vmatpush1.bf16.msra.mxu1 %v8805_v39  ;;  %v8851_v16 = vcombine.low %v1165_v43, %v1169_v44  ;;  %v8853_v39 = vcombine.low %v1166_v45, %v1170_v46  ;;  %v1213_v43 = vld [vmem:[#allocation8 + $0xf00] sm:$0xff]  ;;  %v1214_v45 = vld [vmem:[#allocation8 + $0xf08] sm:$0xff] }
 0x20e   :  { %3972 = vmatprep.subr.bf16.mxu0 %v8812_v58  ;;  %4136 = vmatprep.subr.bf16.mxu1 %v8814_v59  ;;  %v8860_v58 = vcombine.high %v1173_v53, %v1177_v54  ;;  %v8862_v59 = vcombine.high %v1174_v55, %v1178_v56  ;;  %v1217_v44 = vld [vmem:[#allocation8 + $0xf20] sm:$0xff]  ;;  %v1218_v46 = vld [vmem:[#allocation8 + $0xf28] sm:$0xff] }
 0x20f   :  { %4002 = vmatprep.mubr.bf16.mxu0 %v10005_v1  ;;  %4166 = vmatprep.mubr.bf16.mxu1 %v10005_v1 }
 0x211   :  { %3973 = vmatpush1.bf16.msra.mxu0 %v8811_v30  ;;  %4137 = vmatpush1.bf16.msra.mxu1 %v8813_v2  ;;  %v8859_v30 = vcombine.low %v1173_v53, %v1177_v54  ;;  %v8861_v2 = vcombine.low %v1174_v55, %v1178_v56  ;;  %v1221_v53 = vld [vmem:[#allocation8 + $0xf40] sm:$0xff]  ;;  %v1222_v55 = vld [vmem:[#allocation8 + $0xf48] sm:$0xff] }
 0x212   :  { %3974 = vmatprep.subr.bf16.mxu0 %v8820_v3  ;;  %4138 = vmatprep.subr.bf16.mxu1 %v8822_v4  ;;  %v8868_v3 = vcombine.high %v1181_v60, %v1185_v61  ;;  %v8870_v4 = vcombine.high %v1182_v62, %v1186_v63  ;;  %v1225_v54 = vld [vmem:[#allocation8 + $0xf60] sm:$0xff]  ;;  %v1226_v56 = vld [vmem:[#allocation8 + $0xf68] sm:$0xff] }
 0x215   :  { %3975 = vmatpush1.bf16.msra.mxu0 %v8819_v10  ;;  %4139 = vmatpush1.bf16.msra.mxu1 %v8821_v11  ;;  %v8867_v10 = vcombine.low %v1181_v60, %v1185_v61  ;;  %v8869_v11 = vcombine.low %v1182_v62, %v1186_v63  ;;  %v1229_v60 = vld [vmem:[#allocation8 + $0xf80] sm:$0xff]  ;;  %v1230_v62 = vld [vmem:[#allocation8 + $0xf88] sm:$0xff] }
 0x216   :  { %3976 = vmatprep.subr.bf16.mxu0 %v8828_v12  ;;  %4140 = vmatprep.subr.bf16.mxu1 %v8830_v13  ;;  %v8876_v12 = vcombine.high %v1189_v5, %v1193_v7  ;;  %v8878_v13 = vcombine.high %v1190_v9, %v1194_v6  ;;  %v1233_v61 = vld [vmem:[#allocation8 + $0xfa0] sm:$0xff]  ;;  %v1234_v63 = vld [vmem:[#allocation8 + $0xfa8] sm:$0xff] }
 0x219   :  { %3977 = vmatpush1.bf16.msra.mxu0 %v8827_v24  ;;  %4141 = vmatpush1.bf16.msra.mxu1 %v8829_v25  ;;  %v8875_v24 = vcombine.low %v1189_v5, %v1193_v7  ;;  %v8877_v25 = vcombine.low %v1190_v9, %v1194_v6  ;;  %v8918_v5 = vcombine.high %v1230_v62, %v1234_v63  ;;  %v1237_v7 = vld [vmem:[#allocation8 + $0xfc0] sm:$0xff]  ;;  %v1238_v6 = vld [vmem:[#allocation8 + $0xfc8] sm:$0xff] }
 0x21a   :  { %3978 = vmatprep.subr.bf16.mxu0 %v8836_v27  ;;  %4142 = vmatprep.subr.bf16.mxu1 %v8838_v28  ;;  %v8884_v27 = vcombine.high %v1197_v19, %v1201_v0  ;;  %v8886_v28 = vcombine.high %v1198_v22, %v1202_v23  ;;  %v1241_v9 = vld [vmem:[#allocation8 + $0xfe0] sm:$0xff] }
 0x21d   :  { %3979 = vmatpush1.bf16.msra.mxu0 %v8835_v38  ;;  %4143 = vmatpush1.bf16.msra.mxu1 %v8837_v40  ;;  %v8883_v38 = vcombine.low %v1197_v19, %v1201_v0  ;;  %v8885_v40 = vcombine.low %v1198_v22, %v1202_v23  ;;  %v8924_v0 = vcombine.high %v1237_v7, %v1241_v9  ;;  %v735_v22 = vld [vmem:[#allocation8 + $0x10] sm:$0xff] }
 0x21e   :  { %3980 = vmatprep.subr.bf16.mxu0 %v8844_v41  ;;  %4144 = vmatprep.subr.bf16.mxu1 %v8846_v42  ;;  %v8892_v41 = vcombine.high %v1205_v32, %v1209_v34  ;;  %v8894_v42 = vcombine.high %v1206_v35, %v1210_v36  ;;  %v739_v23 = vld [vmem:[#allocation8 + $0x30] sm:$0xff] }
 0x221   :  { %3981 = vmatpush1.bf16.msra.mxu0 %v8843_v47  ;;  %4145 = vmatpush1.bf16.msra.mxu1 %v8845_v49  ;;  %v8891_v47 = vcombine.low %v1205_v32, %v1209_v34  ;;  %v8893_v49 = vcombine.low %v1206_v35, %v1210_v36  ;;  %v8424_v34 = vcombine.high %v735_v22, %v739_v23  ;;  %v743_v36 = vld [vmem:[#allocation8 + $0x50] sm:$0xff] }
 0x222   :  { %3982 = vmatprep.subr.bf16.mxu0 %v8852_v50  ;;  %4146 = vmatprep.subr.bf16.mxu1 %v8854_v52  ;;  %v8900_v50 = vcombine.high %v1213_v43, %v1217_v44  ;;  %v8902_v52 = vcombine.high %v1214_v45, %v1218_v46 }
 0x225   :  { %3983 = vmatpush1.bf16.msra.mxu0 %v8851_v16  ;;  %4147 = vmatpush1.bf16.msra.mxu1 %v8853_v39  ;;  %v8899_v16 = vcombine.low %v1213_v43, %v1217_v44  ;;  %v8901_v39 = vcombine.low %v1214_v45, %v1218_v46 }
 0x226   :  { %3984 = vmatprep.subr.bf16.mxu0 %v8860_v58  ;;  %4148 = vmatprep.subr.bf16.mxu1 %v8862_v59  ;;  %v8908_v58 = vcombine.high %v1221_v53, %v1225_v54  ;;  %v8910_v59 = vcombine.high %v1222_v55, %v1226_v56 }
 0x229   :  { %3985 = vmatpush1.bf16.msra.mxu0 %v8859_v30  ;;  %4149 = vmatpush1.bf16.msra.mxu1 %v8861_v2  ;;  %v8907_v30 = vcombine.low %v1221_v53, %v1225_v54  ;;  %v8909_v2 = vcombine.low %v1222_v55, %v1226_v56  ;;  %v759_v56 = vld [vmem:[#allocation8 + $0xd0] sm:$0xff] }
 0x22a   :  { %3986 = vmatprep.subr.bf16.mxu0 %v8868_v3  ;;  %4150 = vmatprep.subr.bf16.mxu1 %v8870_v4  ;;  %v10012_v3 = vsub.s32 6, %v9930_v14  ;;  %v8916_v4 = vcombine.high %v1229_v60, %v1233_v61 }
 0x22d   :  { %3987 = vmatpush1.bf16.msra.mxu0 %v8867_v10  ;;  %4151 = vmatpush1.bf16.msra.mxu1 %v8869_v11  ;;  %v1242_v10 = vld [vmem:[#allocation8 + $0xfe8] sm:$0xff]  ;;  %v8915_v11 = vcombine.low %v1229_v60, %v1233_v61 }
 0x22e   :  { %3988 = vmatprep.subr.bf16.mxu0 %v8876_v12  ;;  %4152 = vmatprep.subr.bf16.mxu1 %v8878_v13  ;;  %v8917_v12 = vcombine.low %v1230_v62, %v1234_v63  ;;  %v9566_v13 = vld [vmem:[#allocation7] sm:$0xff]  ;;  %v8926_v14 = vcombine.high %v1238_v6, %v1242_v10  ;;  %v767_v63 = vld [vmem:[#allocation8 + $0x110] sm:$0xff] }
 0x22f   :  { %v228_v19 = vrot.slane %v9566_v13, %v10012_v3 }
 0x231   :  { %3989 = vmatpush1.bf16.msra.mxu0 %v8875_v24  ;;  %4153 = vmatpush1.bf16.msra.mxu1 %v8877_v25  ;;  %v736_v24 = vld [vmem:[#allocation8 + $0x18] sm:$0xff]  ;;  %v719_v32 = vadd.f32 %v9967_v26, %v228_v19  ;;  %v755_v26 = vld [vmem:[#allocation8 + $0xb0] sm:$0xff] }
 0x232   :  { %3990 = vmatprep.subr.bf16.mxu0 %v8884_v27  ;;  %4154 = vmatprep.subr.bf16.mxu1 %v8886_v28  ;;  %v740_v25 = vld [vmem:[#allocation8 + $0x38] sm:$0xff]  ;;  %v8923_v27 = vcombine.low %v1237_v7, %v1241_v9  ;;  %v8925_v28 = vcombine.low %v1238_v6, %v1242_v10  ;;  %v775_v6 = vld [vmem:[#allocation8 + $0x150] sm:$0xff] }
 0x233   :  { %v8426_v35 = vcombine.high %v736_v24, %v740_v25  ;;  %v10016_v43 = vpack.c.bf16 %v719_v32, %v719_v32  ;;  %v8425_v44 = vcombine.low %v736_v24, %v740_v25  ;;  %v779_v10 = vld [vmem:[#allocation8 + $0x170] sm:$0xff]  ;;  %v784_v24 = vld [vmem:[#allocation8 + $0x198] sm:$0xff] }
 0x234   :  { %v788_v25 = vld [vmem:[#allocation8 + $0x1b8] sm:$0xff] }
 0x235   :  { %3991 = vmatpush1.bf16.msra.mxu0 %v8883_v38  ;;  %4155 = vmatpush1.bf16.msra.mxu1 %v8885_v40  ;;  %v747_v38 = vld [vmem:[#allocation8 + $0x70] sm:$0xff]  ;;  %v744_v40 = vld [vmem:[#allocation8 + $0x58] sm:$0xff] }
 0x236   :  { %3992 = vmatprep.subr.bf16.mxu0 %v8892_v41  ;;  %4156 = vmatprep.subr.bf16.mxu1 %v8894_v42  ;;  %v748_v41 = vld [vmem:[#allocation8 + $0x78] sm:$0xff]  ;;  %v8423_v42 = vcombine.low %v735_v22, %v739_v23  ;;  %v8432_v45 = vcombine.high %v743_v36, %v747_v38  ;;  %v783_v22 = vld [vmem:[#allocation8 + $0x190] sm:$0xff] }
 0x237   :  { %v8434_v46 = vcombine.high %v744_v40, %v748_v41  ;;  %v8433_v53 = vcombine.low %v744_v40, %v748_v41  ;;  %v787_v23 = vld [vmem:[#allocation8 + $0x1b0] sm:$0xff]  ;;  %v796_v40 = vld [vmem:[#allocation8 + $0x1f8] sm:$0xff] }
 0x238   :  { %v8472_v32 = vcombine.high %v783_v22, %v787_v23  ;;  %v8471_v41 = vcombine.low %v783_v22, %v787_v23  ;;  %v835_v22 = vld [vmem:[#allocation8 + $0x330] sm:$0xff]  ;;  %v832_v23 = vld [vmem:[#allocation8 + $0x318] sm:$0xff] }
 0x239   :  { %3993 = vmatpush1.bf16.msra.mxu0 %v8891_v47  ;;  %4157 = vmatpush1.bf16.msra.mxu1 %v8893_v49  ;;  %v751_v47 = vld [vmem:[#allocation8 + $0x90] sm:$0xff]  ;;  %v752_v49 = vld [vmem:[#allocation8 + $0x98] sm:$0xff] }
 0x23a   :  { %3994 = vmatprep.subr.bf16.mxu0 %v8900_v50  ;;  %4158 = vmatprep.subr.bf16.mxu1 %v8902_v52  ;;  %v756_v50 = vld [vmem:[#allocation8 + $0xb8] sm:$0xff]  ;;  %v8431_v52 = vcombine.low %v743_v36, %v747_v38  ;;  %v8440_v54 = vcombine.high %v751_v47, %v755_v26  ;;  %v795_v36 = vld [vmem:[#allocation8 + $0x1f0] sm:$0xff] }
 0x23b   :  { %v8442_v55 = vcombine.high %v752_v49, %v756_v50  ;;  %v8441_v60 = vcombine.low %v752_v49, %v756_v50  ;;  %v792_v38 = vld [vmem:[#allocation8 + $0x1d8] sm:$0xff] }
 0x23c   :  { %v804_v49 = vld [vmem:[#allocation8 + $0x238] sm:$0xff] }
 0x23d   :  { %3995 = vmatpush1.bf16.msra.mxu0 %v8899_v16  ;;  %4159 = vmatpush1.bf16.msra.mxu1 %v8901_v39  ;;  %v763_v16 = vld [vmem:[#allocation8 + $0xf0] sm:$0xff]  ;;  %v760_v39 = vld [vmem:[#allocation8 + $0xd8] sm:$0xff] }
 0x23e   :  { %3996 = vmatprep.subr.bf16.mxu0 %v8908_v58  ;;  %4160 = vmatprep.subr.bf16.mxu1 %v8910_v59  ;;  %v764_v58 = vld [vmem:[#allocation8 + $0xf8] sm:$0xff]  ;;  %v8439_v59 = vcombine.low %v751_v47, %v755_v26  ;;  %v8448_v61 = vcombine.high %v759_v56, %v763_v16  ;;  %v803_v47 = vld [vmem:[#allocation8 + $0x230] sm:$0xff] }
 0x23f   :  { %v8450_v62 = vcombine.high %v760_v39, %v764_v58  ;;  %v800_v26 = vld [vmem:[#allocation8 + $0x218] sm:$0xff] }
 0x241   :  { %3997 = vmatpush1.bf16.msra.mxu0 %v8907_v30  ;;  %4161 = vmatpush1.bf16.msra.mxu1 %v8909_v2  ;;  %v771_v30 = vld [vmem:[#allocation8 + $0x130] sm:$0xff]  ;;  %v772_v2 = vld [vmem:[#allocation8 + $0x138] sm:$0xff] }
 0x242   :  { %3998 = vmatprep.subr.bf16.mxu0 %v8916_v4  ;;  %4162 = vmatprep.subr.bf16.mxu1 %v8918_v5  ;;  %v8447_v4 = vcombine.low %v759_v56, %v763_v16  ;;  %v8449_v5 = vcombine.low %v760_v39, %v764_v58  ;;  %v8456_v7 = vcombine.high %v767_v63, %v771_v30  ;;  %v811_v56 = vld [vmem:[#allocation8 + $0x270] sm:$0xff]  ;;  %v808_v16 = vld [vmem:[#allocation8 + $0x258] sm:$0xff] }
 0x243   :  { %v8455_v13 = vcombine.low %v767_v63, %v771_v30  ;;  %v812_v39 = vld [vmem:[#allocation8 + $0x278] sm:$0xff]  ;;  %v819_v63 = vld [vmem:[#allocation8 + $0x2b0] sm:$0xff] }
 0x244   :  { %v816_v30 = vld [vmem:[#allocation8 + $0x298] sm:$0xff] }
 0x245   :  { %3999 = vmatpush1.bf16.msra.mxu0 %v8915_v11  ;;  %4163 = vmatpush1.bf16.msra.mxu1 %v8917_v12  ;;  %v776_v11 = vld [vmem:[#allocation8 + $0x158] sm:$0xff] }
 0x246   :  { %4000 = vmatprep.subr.bf16.mxu0 %v8924_v0  ;;  %4164 = vmatprep.subr.bf16.mxu1 %v8926_v14  ;;  %v780_v12 = vld [vmem:[#allocation8 + $0x178] sm:$0xff]  ;;  %v8464_v0 = vcombine.high %v775_v6, %v779_v10 }
 0x247   :  { %v8466_v14 = vcombine.high %v776_v11, %v780_v12 }
 0x249   :  { %4001 = vmatpush1.bf16.msra.mxu0 %v8923_v27  ;;  %4165 = vmatpush1.bf16.msra.mxu1 %v8925_v28  ;;  %v8463_v27 = vcombine.low %v775_v6, %v779_v10  ;;  %v8465_v28 = vcombine.low %v776_v11, %v780_v12  ;;  %v827_v6 = vld [vmem:[#allocation8 + $0x2f0] sm:$0xff]  ;;  %v824_v10 = vld [vmem:[#allocation8 + $0x2d8] sm:$0xff] }
 0x24a   :  { %4175 = vmatprep.subr.bf16.mxu0 %v8424_v34  ;;  %4339 = vmatprep.subr.bf16.mxu1 %v8426_v35  ;;  %v8474_v34 = vcombine.high %v784_v24, %v788_v25  ;;  %v791_v35 = vld [vmem:[#allocation8 + $0x1d0] sm:$0xff]  ;;  %v828_v11 = vld [vmem:[#allocation8 + $0x2f8] sm:$0xff] }
 0x24b   :  { %v8479_v50 = vcombine.low %v791_v35, %v795_v36 }
 0x24c   :  { %4003 = vmatmul.mubr.bf16.vlgmr.msra.gmra.mrb[8].mxu0 %v10016_v43  ;;  %4167 = vmatmul.mubr.bf16.vlgmr.msra.gmra.mrb[8].mxu1 %v10016_v43 }
 0x24d   :  { %4176 = vmatpush1.bf16.msra.mxu0 %v8423_v42  ;;  %4207 = vmatprep.mubr.bf16.mxu0 %v9947_v31  ;;  %v8473_v42 = vcombine.low %v784_v24, %v788_v25  ;;  %v836_v24 = vld [vmem:[#allocation8 + $0x338] sm:$0xff] }
 0x24e   :  { %4340 = vmatpush1.bf16.msra.mxu1 %v8425_v44  ;;  %4371 = vmatprep.mubr.bf16.mxu1 %v9947_v31  ;;  %v768_v31 = vld [vmem:[#allocation8 + $0x118] sm:$0xff]  ;;  %v8480_v44 = vcombine.high %v791_v35, %v795_v36  ;;  %v843_v35 = vld [vmem:[#allocation8 + $0x370] sm:$0xff] }
 0x24f   :  { %4177 = vmatprep.subr.bf16.mxu0 %v8432_v45  ;;  %4341 = vmatprep.subr.bf16.mxu1 %v8434_v46  ;;  %v8458_v9 = vcombine.high %v768_v31, %v772_v2  ;;  %v8457_v19 = vcombine.low %v768_v31, %v772_v2  ;;  %v8482_v45 = vcombine.high %v792_v38, %v796_v40  ;;  %v799_v46 = vld [vmem:[#allocation8 + $0x210] sm:$0xff]  ;;  %v820_v31 = vld [vmem:[#allocation8 + $0x2b8] sm:$0xff] }
 0x250   :  { %v8487_v58 = vcombine.low %v799_v46, %v803_v47  ;;  %v840_v36 = vld [vmem:[#allocation8 + $0x358] sm:$0xff] }
 0x251   :  { %4178 = vmatpush1.bf16.msra.mxu0 %v8431_v52  ;;  %v8481_v52 = vcombine.low %v792_v38, %v796_v40  ;;  %v844_v38 = vld [vmem:[#allocation8 + $0x378] sm:$0xff] }
 0x252   :  { %4342 = vmatpush1.bf16.msra.mxu1 %v8433_v53  ;;  %4179 = vmatprep.subr.bf16.mxu0 %v8440_v54  ;;  %v8488_v53 = vcombine.high %v799_v46, %v803_v47  ;;  %v8490_v54 = vcombine.high %v800_v26, %v804_v49  ;;  %v851_v46 = vld [vmem:[#allocation8 + $0x3b0] sm:$0xff]  ;;  %v848_v47 = vld [vmem:[#allocation8 + $0x398] sm:$0xff] }
 0x253   :  { %4343 = vmatprep.subr.bf16.mxu1 %v8442_v55  ;;  %v807_v55 = vld [vmem:[#allocation8 + $0x250] sm:$0xff] }
 0x254   :  { %v8495_v2 = vcombine.low %v807_v55, %v811_v56 }
 0x255   :  { %4180 = vmatpush1.bf16.msra.mxu0 %v8439_v59  ;;  %v8489_v59 = vcombine.low %v800_v26, %v804_v49  ;;  %v852_v26 = vld [vmem:[#allocation8 + $0x3b8] sm:$0xff] }
 0x256   :  { %4344 = vmatpush1.bf16.msra.mxu1 %v8441_v60  ;;  %4181 = vmatprep.subr.bf16.mxu0 %v8448_v61  ;;  %v8496_v60 = vcombine.high %v807_v55, %v811_v56  ;;  %v8498_v61 = vcombine.high %v808_v16, %v812_v39  ;;  %v859_v55 = vld [vmem:[#allocation8 + $0x3f0] sm:$0xff]  ;;  %v856_v56 = vld [vmem:[#allocation8 + $0x3d8] sm:$0xff] }
 0x257   :  { %4345 = vmatprep.subr.bf16.mxu1 %v8450_v62  ;;  %v815_v62 = vld [vmem:[#allocation8 + $0x290] sm:$0xff] }
 0x258   :  { %v8503_v12 = vcombine.low %v815_v62, %v819_v63 }
 0x259   :  { %4182 = vmatpush1.bf16.msra.mxu0 %v8447_v4  ;;  %v8497_v4 = vcombine.low %v808_v16, %v812_v39  ;;  %v860_v16 = vld [vmem:[#allocation8 + $0x3f8] sm:$0xff] }
 0x25a   :  { %4346 = vmatpush1.bf16.msra.mxu1 %v8449_v5  ;;  %4183 = vmatprep.subr.bf16.mxu0 %v8456_v7  ;;  %v8504_v5 = vcombine.high %v815_v62, %v819_v63  ;;  %v8506_v7 = vcombine.high %v816_v30, %v820_v31  ;;  %v867_v62 = vld [vmem:[#allocation8 + $0x430] sm:$0xff]  ;;  %v864_v63 = vld [vmem:[#allocation8 + $0x418] sm:$0xff] }
 0x25b   :  { %4347 = vmatprep.subr.bf16.mxu1 %v8458_v9  ;;  %v823_v9 = vld [vmem:[#allocation8 + $0x2d0] sm:$0xff] }
 0x25c   :  { %v8511_v25 = vcombine.low %v823_v9, %v827_v6 }
 0x25d   :  { %4184 = vmatpush1.bf16.msra.mxu0 %v8455_v13  ;;  %v8505_v13 = vcombine.low %v816_v30, %v820_v31  ;;  %v868_v30 = vld [vmem:[#allocation8 + $0x438] sm:$0xff] }
 0x25e   :  { %4348 = vmatpush1.bf16.msra.mxu1 %v8457_v19  ;;  %4185 = vmatprep.subr.bf16.mxu0 %v8464_v0  ;;  %v8512_v19 = vcombine.high %v823_v9, %v827_v6  ;;  %v8514_v0 = vcombine.high %v824_v10, %v828_v11  ;;  %v875_v9 = vld [vmem:[#allocation8 + $0x470] sm:$0xff] }
 0x25f   :  { %4349 = vmatprep.subr.bf16.mxu1 %v8466_v14  ;;  %v831_v14 = vld [vmem:[#allocation8 + $0x310] sm:$0xff] }
 0x260   :  { %v8519_v40 = vcombine.low %v831_v14, %v835_v22 }
 0x261   :  { %4186 = vmatpush1.bf16.msra.mxu0 %v8463_v27  ;;  %v8513_v27 = vcombine.low %v824_v10, %v828_v11  ;;  %v872_v10 = vld [vmem:[#allocation8 + $0x458] sm:$0xff] }
 0x262   :  { %4350 = vmatpush1.bf16.msra.mxu1 %v8465_v28  ;;  %4187 = vmatprep.subr.bf16.mxu0 %v8472_v32  ;;  %v8520_v28 = vcombine.high %v831_v14, %v835_v22  ;;  %v8522_v32 = vcombine.high %v832_v23, %v836_v24  ;;  %v876_v11 = vld [vmem:[#allocation8 + $0x478] sm:$0xff] }
 0x263   :  { %4351 = vmatprep.subr.bf16.mxu1 %v8474_v34  ;;  %v839_v34 = vld [vmem:[#allocation8 + $0x350] sm:$0xff]  ;;  %v8562_v14 = vcombine.high %v872_v10, %v876_v11  ;;  %v880_v22 = vld [vmem:[#allocation8 + $0x498] sm:$0xff] }
 0x264   :  { %v8527_v49 = vcombine.low %v839_v34, %v843_v35 }
 0x265   :  { %4188 = vmatpush1.bf16.msra.mxu0 %v8471_v41  ;;  %v8521_v41 = vcombine.low %v832_v23, %v836_v24  ;;  %v884_v23 = vld [vmem:[#allocation8 + $0x4b8] sm:$0xff] }
 0x266   :  { %4352 = vmatpush1.bf16.msra.mxu1 %v8473_v42  ;;  %4189 = vmatprep.subr.bf16.mxu0 %v8480_v44  ;;  %v8528_v42 = vcombine.high %v839_v34, %v843_v35  ;;  %v8530_v44 = vcombine.high %v840_v36, %v844_v38  ;;  %v891_v34 = vld [vmem:[#allocation8 + $0x4f0] sm:$0xff]  ;;  %v888_v35 = vld [vmem:[#allocation8 + $0x4d8] sm:$0xff] }
 0x267   :  { %4353 = vmatprep.subr.bf16.mxu1 %v8482_v45  ;;  %v847_v45 = vld [vmem:[#allocation8 + $0x390] sm:$0xff] }
 0x268   :  { %v8535_v39 = vcombine.low %v847_v45, %v851_v46 }
 0x269   :  { %4190 = vmatpush1.bf16.msra.mxu0 %v8479_v50  ;;  %v8529_v50 = vcombine.low %v840_v36, %v844_v38  ;;  %v892_v36 = vld [vmem:[#allocation8 + $0x4f8] sm:$0xff] }
 0x26a   :  { %4354 = vmatpush1.bf16.msra.mxu1 %v8481_v52  ;;  %4191 = vmatprep.subr.bf16.mxu0 %v8488_v53  ;;  %v8536_v52 = vcombine.high %v847_v45, %v851_v46  ;;  %v8538_v53 = vcombine.high %v848_v47, %v852_v26  ;;  %v896_v45 = vld [vmem:[#allocation8 + $0x518] sm:$0xff] }
 0x26b   :  { %4355 = vmatprep.subr.bf16.mxu1 %v8490_v54  ;;  %v855_v54 = vld [vmem:[#allocation8 + $0x3d0] sm:$0xff]  ;;  %v900_v46 = vld [vmem:[#allocation8 + $0x538] sm:$0xff] }
 0x26c   :  { %v8543_v31 = vcombine.low %v855_v54, %v859_v55 }
 0x26d   :  { %4192 = vmatpush1.bf16.msra.mxu0 %v8487_v58  ;;  %v8537_v58 = vcombine.low %v848_v47, %v852_v26  ;;  %v8577_v47 = vcombine.low %v888_v35, %v892_v36 }
 0x26e   :  { %4356 = vmatpush1.bf16.msra.mxu1 %v8489_v59  ;;  %4193 = vmatprep.subr.bf16.mxu0 %v8496_v60  ;;  %v8544_v59 = vcombine.high %v855_v54, %v859_v55  ;;  %v8546_v60 = vcombine.high %v856_v56, %v860_v16  ;;  %v908_v54 = vld [vmem:[#allocation8 + $0x578] sm:$0xff] }
 0x26f   :  { %4357 = vmatprep.subr.bf16.mxu1 %v8498_v61  ;;  %v863_v61 = vld [vmem:[#allocation8 + $0x410] sm:$0xff] }
 0x270   :  { %v8551_v6 = vcombine.low %v863_v61, %v867_v62 }
 0x271   :  { %4194 = vmatpush1.bf16.msra.mxu0 %v8495_v2  ;;  %v8545_v2 = vcombine.low %v856_v56, %v860_v16  ;;  %v8585_v56 = vcombine.low %v896_v45, %v900_v46 }
 0x272   :  { %4358 = vmatpush1.bf16.msra.mxu1 %v8497_v4  ;;  %4195 = vmatprep.subr.bf16.mxu0 %v8504_v5  ;;  %v8552_v4 = vcombine.high %v863_v61, %v867_v62  ;;  %v8554_v5 = vcombine.high %v864_v63, %v868_v30  ;;  %v916_v61 = vld [vmem:[#allocation8 + $0x5b8] sm:$0xff] }
 0x273   :  { %4359 = vmatprep.subr.bf16.mxu1 %v8506_v7  ;;  %v871_v7 = vld [vmem:[#allocation8 + $0x450] sm:$0xff] }
 0x274   :  { %v8559_v24 = vcombine.low %v871_v7, %v875_v9 }
 0x275   :  { %4196 = vmatpush1.bf16.msra.mxu0 %v8503_v12  ;;  %v8553_v12 = vcombine.low %v864_v63, %v868_v30 }
 0x276   :  { %4360 = vmatpush1.bf16.msra.mxu1 %v8505_v13  ;;  %4197 = vmatprep.subr.bf16.mxu0 %v8512_v19  ;;  %v8560_v13 = vcombine.high %v871_v7, %v875_v9  ;;  %v879_v19 = vld [vmem:[#allocation8 + $0x490] sm:$0xff]  ;;  %v924_v7 = vld [vmem:[#allocation8 + $0x5f8] sm:$0xff] }
 0x277   :  { %4361 = vmatprep.subr.bf16.mxu1 %v8514_v0  ;;  %v883_v0 = vld [vmem:[#allocation8 + $0x4b0] sm:$0xff] }
 0x278   :  { %v8567_v38 = vcombine.low %v879_v19, %v883_v0 }
 0x279   :  { %4198 = vmatpush1.bf16.msra.mxu0 %v8511_v25  ;;  %v8561_v25 = vcombine.low %v872_v10, %v876_v11 }
 0x27a   :  { %4362 = vmatpush1.bf16.msra.mxu1 %v8513_v27  ;;  %4199 = vmatprep.subr.bf16.mxu0 %v8520_v28  ;;  %v8568_v27 = vcombine.high %v879_v19, %v883_v0  ;;  %v8570_v28 = vcombine.high %v880_v22, %v884_v23  ;;  %v928_v19 = vld [vmem:[#allocation8 + $0x618] sm:$0xff] }
 0x27b   :  { %4363 = vmatprep.subr.bf16.mxu1 %v8522_v32  ;;  %v887_v32 = vld [vmem:[#allocation8 + $0x4d0] sm:$0xff]  ;;  %v932_v0 = vld [vmem:[#allocation8 + $0x638] sm:$0xff] }
 0x27d   :  { %4200 = vmatpush1.bf16.msra.mxu0 %v8519_v40  ;;  %v8576_v40 = vcombine.high %v887_v32, %v891_v34 }
 0x27e   :  { %4364 = vmatpush1.bf16.msra.mxu1 %v8521_v41  ;;  %4201 = vmatprep.subr.bf16.mxu0 %v8528_v42  ;;  %v8578_v41 = vcombine.high %v888_v35, %v892_v36  ;;  %v895_v42 = vld [vmem:[#allocation8 + $0x510] sm:$0xff]  ;;  %v8617_v35 = vcombine.low %v928_v19, %v932_v0 }
 0x27f   :  { %4365 = vmatprep.subr.bf16.mxu1 %v8530_v44  ;;  %v899_v44 = vld [vmem:[#allocation8 + $0x530] sm:$0xff] }
 0x280   :  { %v8584_v26 = vcombine.high %v895_v42, %v899_v44  ;;  %v8583_v55 = vcombine.low %v895_v42, %v899_v44  ;;  %v948_v42 = vld [vmem:[#allocation8 + $0x6b8] sm:$0xff] }
 0x281   :  { %4202 = vmatpush1.bf16.msra.mxu0 %v8527_v49  ;;  %v8586_v49 = vcombine.high %v896_v45, %v900_v46 }
 0x282   :  { %4366 = vmatpush1.bf16.msra.mxu1 %v8529_v50  ;;  %4203 = vmatprep.subr.bf16.mxu0 %v8536_v52  ;;  %v903_v50 = vld [vmem:[#allocation8 + $0x550] sm:$0xff] }
 0x283   :  { %4367 = vmatprep.subr.bf16.mxu1 %v8538_v53  ;;  %v907_v52 = vld [vmem:[#allocation8 + $0x570] sm:$0xff]  ;;  %v904_v53 = vld [vmem:[#allocation8 + $0x558] sm:$0xff] }
 0x284   :  { %v8592_v16 = vcombine.high %v903_v50, %v907_v52  ;;  %v8591_v62 = vcombine.low %v903_v50, %v907_v52  ;;  %v8593_v63 = vcombine.low %v904_v53, %v908_v54  ;;  %v956_v50 = vld [vmem:[#allocation8 + $0x6f8] sm:$0xff] }
 0x285   :  { %4204 = vmatpush1.bf16.msra.mxu0 %v8535_v39  ;;  %v8594_v39 = vcombine.high %v904_v53, %v908_v54 }
 0x286   :  { %4368 = vmatpush1.bf16.msra.mxu1 %v8537_v58  ;;  %4205 = vmatprep.subr.bf16.mxu0 %v8544_v59  ;;  %v911_v58 = vld [vmem:[#allocation8 + $0x590] sm:$0xff] }
 0x287   :  { %4369 = vmatprep.subr.bf16.mxu1 %v8546_v60  ;;  %v915_v59 = vld [vmem:[#allocation8 + $0x5b0] sm:$0xff]  ;;  %v912_v60 = vld [vmem:[#allocation8 + $0x598] sm:$0xff] }
 0x288   :  { %v8600_v30 = vcombine.high %v911_v58, %v915_v59  ;;  %v8599_v9 = vcombine.low %v911_v58, %v915_v59  ;;  %v964_v58 = vld [vmem:[#allocation8 + $0x738] sm:$0xff] }
 0x289   :  { %4206 = vmatpush1.bf16.msra.mxu0 %v8543_v31  ;;  %v8602_v31 = vcombine.high %v912_v60, %v916_v61 }
 0x28a   :  { %4370 = vmatpush1.bf16.msra.mxu1 %v8545_v2  ;;  %4216 = vmatprep.subr.bf16.mxu0 %v8552_v4  ;;  %v919_v2 = vld [vmem:[#allocation8 + $0x5d0] sm:$0xff] }
 0x28b   :  { %4380 = vmatprep.subr.bf16.mxu1 %v8554_v5  ;;  %v923_v4 = vld [vmem:[#allocation8 + $0x5f0] sm:$0xff]  ;;  %v920_v5 = vld [vmem:[#allocation8 + $0x5d8] sm:$0xff] }
 0x28c   :  { %4208 = vmatmul.mubr.bf16.vlgmr.msra.gmra.mrb[12].mxu0 %v9951_v33  ;;  %v8608_v10 = vcombine.high %v919_v2, %v923_v4  ;;  %v8610_v11 = vcombine.high %v920_v5, %v924_v7 }
 0x28d   :  { %4372 = vmatmul.mubr.bf16.vlgmr.msra.gmra.mrb[12].mxu1 %v9951_v33  ;;  %4217 = vmatpush1.bf16.msra.mxu0 %v8551_v6  ;;  %v8569_v33 = vcombine.low %v880_v22, %v884_v23  ;;  %v8601_v6 = vcombine.low %v912_v60, %v916_v61  ;;  %v8609_v22 = vcombine.low %v920_v5, %v924_v7 }
 0x28e   :  { %4248 = vmatprep.mubr.bf16.mxu0 %v9959_v51  ;;  %4381 = vmatpush1.bf16.msra.mxu1 %v8553_v12  ;;  %v927_v12 = vld [vmem:[#allocation8 + $0x610] sm:$0xff] }
 0x28f   :  { %4412 = vmatprep.mubr.bf16.mxu1 %v9959_v51  ;;  %4218 = vmatprep.subr.bf16.mxu0 %v8560_v13  ;;  %v8575_v51 = vcombine.low %v887_v32, %v891_v34  ;;  %v931_v13 = vld [vmem:[#allocation8 + $0x630] sm:$0xff]  ;;  %v940_v32 = vld [vmem:[#allocation8 + $0x678] sm:$0xff] }
 0x290   :  { %4382 = vmatprep.subr.bf16.mxu1 %v8562_v14  ;;  %v8607_v14 = vcombine.low %v919_v2, %v923_v4  ;;  %v8616_v23 = vcombine.high %v927_v12, %v931_v13  ;;  %v8615_v34 = vcombine.low %v927_v12, %v931_v13  ;;  %v972_v2 = vld [vmem:[#allocation8 + $0x778] sm:$0xff] }
 0x291   :  { %4219 = vmatpush1.bf16.msra.mxu0 %v8559_v24  ;;  %v8618_v24 = vcombine.high %v928_v19, %v932_v0  ;;  %v980_v12 = vld [vmem:[#allocation8 + $0x7b8] sm:$0xff] }
 0x292   :  { %4383 = vmatpush1.bf16.msra.mxu1 %v8561_v25  ;;  %4220 = vmatprep.subr.bf16.mxu0 %v8568_v27  ;;  %v935_v25 = vld [vmem:[#allocation8 + $0x650] sm:$0xff] }
 0x293   :  { %4384 = vmatprep.subr.bf16.mxu1 %v8570_v28  ;;  %v939_v27 = vld [vmem:[#allocation8 + $0x670] sm:$0xff]  ;;  %v936_v28 = vld [vmem:[#allocation8 + $0x658] sm:$0xff] }
 0x294   :  { %v8624_v36 = vcombine.high %v935_v25, %v939_v27  ;;  %v8623_v44 = vcombine.low %v935_v25, %v939_v27  ;;  %v8625_v45 = vcombine.low %v936_v28, %v940_v32  ;;  %v988_v25 = vld [vmem:[#allocation8 + $0x7f8] sm:$0xff] }
 0x295   :  { %4221 = vmatpush1.bf16.msra.mxu0 %v8567_v38  ;;  %v8626_v38 = vcombine.high %v936_v28, %v940_v32 }
 0x296   :  { %4385 = vmatpush1.bf16.msra.mxu1 %v8569_v33  ;;  %4222 = vmatprep.subr.bf16.mxu0 %v8576_v40  ;;  %v943_v33 = vld [vmem:[#allocation8 + $0x690] sm:$0xff] }
 0x297   :  { %4386 = vmatprep.subr.bf16.mxu1 %v8578_v41  ;;  %v947_v40 = vld [vmem:[#allocation8 + $0x6b0] sm:$0xff]  ;;  %v944_v41 = vld [vmem:[#allocation8 + $0x698] sm:$0xff] }
 0x298   :  { %v8632_v46 = vcombine.high %v943_v33, %v947_v40  ;;  %v8631_v52 = vcombine.low %v943_v33, %v947_v40  ;;  %v8633_v53 = vcombine.low %v944_v41, %v948_v42  ;;  %v996_v33 = vld [vmem:[#allocation8 + $0x838] sm:$0xff] }
 0x299   :  { %4223 = vmatpush1.bf16.msra.mxu0 %v8575_v51  ;;  %v8634_v51 = vcombine.high %v944_v41, %v948_v42 }
 0x29a   :  { %4387 = vmatpush1.bf16.msra.mxu1 %v8577_v47  ;;  %4224 = vmatprep.subr.bf16.mxu0 %v8584_v26  ;;  %v951_v47 = vld [vmem:[#allocation8 + $0x6d0] sm:$0xff] }
 0x29b   :  { %4388 = vmatprep.subr.bf16.mxu1 %v8586_v49  ;;  %v955_v26 = vld [vmem:[#allocation8 + $0x6f0] sm:$0xff]  ;;  %v952_v49 = vld [vmem:[#allocation8 + $0x6d8] sm:$0xff] }
 0x29c   :  { %v8640_v54 = vcombine.high %v951_v47, %v955_v26  ;;  %v8639_v59 = vcombine.low %v951_v47, %v955_v26  ;;  %v8641_v60 = vcombine.low %v952_v49, %v956_v50  ;;  %v1000_v47 = vld [vmem:[#allocation8 + $0x858] sm:$0xff] }
 0x29d   :  { %4225 = vmatpush1.bf16.msra.mxu0 %v8583_v55  ;;  %v8642_v55 = vcombine.high %v952_v49, %v956_v50  ;;  %v1004_v26 = vld [vmem:[#allocation8 + $0x878] sm:$0xff] }
 0x29e   :  { %4389 = vmatpush1.bf16.msra.mxu1 %v8585_v56  ;;  %4226 = vmatprep.subr.bf16.mxu0 %v8592_v16  ;;  %v959_v56 = vld [vmem:[#allocation8 + $0x710] sm:$0xff] }
 0x29f   :  { %4390 = vmatprep.subr.bf16.mxu1 %v8594_v39  ;;  %v963_v16 = vld [vmem:[#allocation8 + $0x730] sm:$0xff]  ;;  %v960_v39 = vld [vmem:[#allocation8 + $0x718] sm:$0xff] }
 0x2a0   :  { %v8648_v61 = vcombine.high %v959_v56, %v963_v16  ;;  %v8647_v4 = vcombine.low %v959_v56, %v963_v16  ;;  %v8649_v5 = vcombine.low %v960_v39, %v964_v58  ;;  %v1012_v56 = vld [vmem:[#allocation8 + $0x8b8] sm:$0xff] }
 0x2a1   :  { %4227 = vmatpush1.bf16.msra.mxu0 %v8591_v62  ;;  %v8650_v62 = vcombine.high %v960_v39, %v964_v58  ;;  %v8689_v39 = vcombine.low %v1000_v47, %v1004_v26 }
 0x2a2   :  { %4391 = vmatpush1.bf16.msra.mxu1 %v8593_v63  ;;  %4228 = vmatprep.subr.bf16.mxu0 %v8600_v30  ;;  %v967_v63 = vld [vmem:[#allocation8 + $0x750] sm:$0xff] }
 0x2a3   :  { %4392 = vmatprep.subr.bf16.mxu1 %v8602_v31  ;;  %v971_v30 = vld [vmem:[#allocation8 + $0x770] sm:$0xff]  ;;  %v968_v31 = vld [vmem:[#allocation8 + $0x758] sm:$0xff] }
 0x2a4   :  { %v8656_v7 = vcombine.high %v967_v63, %v971_v30  ;;  %v8655_v13 = vcombine.low %v967_v63, %v971_v30  ;;  %v8657_v19 = vcombine.low %v968_v31, %v972_v2  ;;  %v1020_v63 = vld [vmem:[#allocation8 + $0x8f8] sm:$0xff] }
 0x2a5   :  { %4229 = vmatpush1.bf16.msra.mxu0 %v8599_v9  ;;  %v8658_v9 = vcombine.high %v968_v31, %v972_v2 }
 0x2a6   :  { %4393 = vmatpush1.bf16.msra.mxu1 %v8601_v6  ;;  %4230 = vmatprep.subr.bf16.mxu0 %v8608_v10  ;;  %v975_v6 = vld [vmem:[#allocation8 + $0x790] sm:$0xff] }
 0x2a7   :  { %4394 = vmatprep.subr.bf16.mxu1 %v8610_v11  ;;  %v979_v10 = vld [vmem:[#allocation8 + $0x7b0] sm:$0xff]  ;;  %v976_v11 = vld [vmem:[#allocation8 + $0x798] sm:$0xff] }
 0x2a8   :  { %v8664_v0 = vcombine.high %v975_v6, %v979_v10  ;;  %v8663_v27 = vcombine.low %v975_v6, %v979_v10  ;;  %v8665_v28 = vcombine.low %v976_v11, %v980_v12 }
 0x2a9   :  { %4231 = vmatpush1.bf16.msra.mxu0 %v8607_v14  ;;  %v8666_v14 = vcombine.high %v976_v11, %v980_v12  ;;  %v1031_v12 = vld [vmem:[#allocation8 + $0x950] sm:$0xff] }
 0x2aa   :  { %4395 = vmatpush1.bf16.msra.mxu1 %v8609_v22  ;;  %4232 = vmatprep.subr.bf16.mxu0 %v8616_v23  ;;  %v983_v22 = vld [vmem:[#allocation8 + $0x7d0] sm:$0xff] }
 0x2ab   :  { %4396 = vmatprep.subr.bf16.mxu1 %v8618_v24  ;;  %v987_v23 = vld [vmem:[#allocation8 + $0x7f0] sm:$0xff]  ;;  %v984_v24 = vld [vmem:[#allocation8 + $0x7d8] sm:$0xff] }
 0x2ac   :  { %v8672_v32 = vcombine.high %v983_v22, %v987_v23  ;;  %v8671_v40 = vcombine.low %v983_v22, %v987_v23  ;;  %v8673_v41 = vcombine.low %v984_v24, %v988_v25 }
 0x2ad   :  { %4233 = vmatpush1.bf16.msra.mxu0 %v8615_v34  ;;  %v8674_v34 = vcombine.high %v984_v24, %v988_v25  ;;  %v1039_v25 = vld [vmem:[#allocation8 + $0x990] sm:$0xff] }
 0x2ae   :  { %4397 = vmatpush1.bf16.msra.mxu1 %v8617_v35  ;;  %4234 = vmatprep.subr.bf16.mxu0 %v8624_v36  ;;  %v991_v35 = vld [vmem:[#allocation8 + $0x810] sm:$0xff] }
 0x2af   :  { %4398 = vmatprep.subr.bf16.mxu1 %v8626_v38  ;;  %v995_v36 = vld [vmem:[#allocation8 + $0x830] sm:$0xff]  ;;  %v992_v38 = vld [vmem:[#allocation8 + $0x818] sm:$0xff] }
 0x2b0   :  { %v8680_v42 = vcombine.high %v991_v35, %v995_v36  ;;  %v8681_v49 = vcombine.low %v992_v38, %v996_v33 }
 0x2b1   :  { %4235 = vmatpush1.bf16.msra.mxu0 %v8623_v44  ;;  %v8682_v44 = vcombine.high %v992_v38, %v996_v33  ;;  %v1047_v33 = vld [vmem:[#allocation8 + $0x9d0] sm:$0xff] }
 0x2b2   :  { %4399 = vmatpush1.bf16.msra.mxu1 %v8625_v45  ;;  %4236 = vmatprep.subr.bf16.mxu0 %v8632_v46  ;;  %v999_v45 = vld [vmem:[#allocation8 + $0x850] sm:$0xff] }
 0x2b3   :  { %4400 = vmatprep.subr.bf16.mxu1 %v8634_v51  ;;  %v1003_v46 = vld [vmem:[#allocation8 + $0x870] sm:$0xff]  ;;  %v8679_v51 = vcombine.low %v991_v35, %v995_v36 }
 0x2b4   :  { %v8688_v50 = vcombine.high %v999_v45, %v1003_v46  ;;  %v8687_v16 = vcombine.low %v999_v45, %v1003_v46 }
 0x2b5   :  { %4237 = vmatpush1.bf16.msra.mxu0 %v8631_v52  ;;  %v1007_v52 = vld [vmem:[#allocation8 + $0x890] sm:$0xff] }
 0x2b6   :  { %4401 = vmatpush1.bf16.msra.mxu1 %v8633_v53  ;;  %4238 = vmatprep.subr.bf16.mxu0 %v8640_v54  ;;  %v1011_v53 = vld [vmem:[#allocation8 + $0x8b0] sm:$0xff]  ;;  %v8690_v54 = vcombine.high %v1000_v47, %v1004_v26 }
 0x2b7   :  { %4402 = vmatprep.subr.bf16.mxu1 %v8642_v55  ;;  %v1008_v55 = vld [vmem:[#allocation8 + $0x898] sm:$0xff]  ;;  %v8696_v58 = vcombine.high %v1007_v52, %v1011_v53  ;;  %v8695_v30 = vcombine.low %v1007_v52, %v1011_v53  ;;  %v1055_v47 = vld [vmem:[#allocation8 + $0xa10] sm:$0xff] }
 0x2b8   :  { %v1059_v26 = vld [vmem:[#allocation8 + $0xa30] sm:$0xff] }
 0x2b9   :  { %4239 = vmatpush1.bf16.msra.mxu0 %v8639_v59  ;;  %v8698_v59 = vcombine.high %v1008_v55, %v1012_v56 }
 0x2ba   :  { %4403 = vmatpush1.bf16.msra.mxu1 %v8641_v60  ;;  %4240 = vmatprep.subr.bf16.mxu0 %v8648_v61  ;;  %v1015_v60 = vld [vmem:[#allocation8 + $0x8d0] sm:$0xff] }
 0x2bb   :  { %4404 = vmatprep.subr.bf16.mxu1 %v8650_v62  ;;  %v1019_v61 = vld [vmem:[#allocation8 + $0x8f0] sm:$0xff]  ;;  %v1016_v62 = vld [vmem:[#allocation8 + $0x8d8] sm:$0xff] }
 0x2bc   :  { %v8704_v31 = vcombine.high %v1015_v60, %v1019_v61  ;;  %v8706_v2 = vcombine.high %v1016_v62, %v1020_v63  ;;  %v8705_v6 = vcombine.low %v1016_v62, %v1020_v63  ;;  %v1071_v63 = vld [vmem:[#allocation8 + $0xa90] sm:$0xff] }
 0x2bd   :  { %4241 = vmatpush1.bf16.msra.mxu0 %v8647_v4  ;;  %v1023_v4 = vld [vmem:[#allocation8 + $0x910] sm:$0xff] }
 0x2be   :  { %4405 = vmatpush1.bf16.msra.mxu1 %v8649_v5  ;;  %4242 = vmatprep.subr.bf16.mxu0 %v8656_v7  ;;  %v1027_v5 = vld [vmem:[#allocation8 + $0x930] sm:$0xff]  ;;  %v1024_v7 = vld [vmem:[#allocation8 + $0x918] sm:$0xff] }
 0x2bf   :  { %4406 = vmatprep.subr.bf16.mxu1 %v8658_v9  ;;  %v1028_v9 = vld [vmem:[#allocation8 + $0x938] sm:$0xff]  ;;  %v8712_v10 = vcombine.high %v1023_v4, %v1027_v5 }
 0x2c0   :  { %v8714_v11 = vcombine.high %v1024_v7, %v1028_v9  ;;  %v8713_v22 = vcombine.low %v1024_v7, %v1028_v9  ;;  %v1079_v9 = vld [vmem:[#allocation8 + $0xad0] sm:$0xff] }
 0x2c1   :  { %4243 = vmatpush1.bf16.msra.mxu0 %v8655_v13  ;;  %v1035_v13 = vld [vmem:[#allocation8 + $0x970] sm:$0xff] }
 0x2c2   :  { %4407 = vmatpush1.bf16.msra.mxu1 %v8657_v19  ;;  %4244 = vmatprep.subr.bf16.mxu0 %v8664_v0  ;;  %v1032_v19 = vld [vmem:[#allocation8 + $0x958] sm:$0xff]  ;;  %v8720_v23 = vcombine.high %v1031_v12, %v1035_v13 }
 0x2c3   :  { %4408 = vmatprep.subr.bf16.mxu1 %v8666_v14  ;;  %v1036_v0 = vld [vmem:[#allocation8 + $0x978] sm:$0xff]  ;;  %v8711_v14 = vcombine.low %v1023_v4, %v1027_v5 }
 0x2c4   :  { %v8722_v24 = vcombine.high %v1032_v19, %v1036_v0  ;;  %v8721_v35 = vcombine.low %v1032_v19, %v1036_v0  ;;  %v1087_v0 = vld [vmem:[#allocation8 + $0xb10] sm:$0xff] }
 0x2c5   :  { %4245 = vmatpush1.bf16.msra.mxu0 %v8663_v27  ;;  %v1043_v27 = vld [vmem:[#allocation8 + $0x9b0] sm:$0xff] }
 0x2c6   :  { %4409 = vmatpush1.bf16.msra.mxu1 %v8665_v28  ;;  %4246 = vmatprep.subr.bf16.mxu0 %v8672_v32  ;;  %v1040_v28 = vld [vmem:[#allocation8 + $0x998] sm:$0xff]  ;;  %v8728_v36 = vcombine.high %v1039_v25, %v1043_v27 }
 0x2c7   :  { %4410 = vmatprep.subr.bf16.mxu1 %v8674_v34  ;;  %v1044_v32 = vld [vmem:[#allocation8 + $0x9b8] sm:$0xff]  ;;  %v8719_v34 = vcombine.low %v1031_v12, %v1035_v13 }
 0x2c8   :  { %v8730_v38 = vcombine.high %v1040_v28, %v1044_v32  ;;  %v8729_v45 = vcombine.low %v1040_v28, %v1044_v32  ;;  %v1095_v32 = vld [vmem:[#allocation8 + $0xb50] sm:$0xff] }
 0x2c9   :  { %4247 = vmatpush1.bf16.msra.mxu0 %v8671_v40  ;;  %v1051_v40 = vld [vmem:[#allocation8 + $0x9f0] sm:$0xff] }
 0x2ca   :  { %4411 = vmatpush1.bf16.msra.mxu1 %v8673_v41  ;;  %4257 = vmatprep.subr.bf16.mxu0 %v8680_v42  ;;  %v1048_v41 = vld [vmem:[#allocation8 + $0x9d8] sm:$0xff]  ;;  %v8736_v46 = vcombine.high %v1047_v33, %v1051_v40  ;;  %v8735_v52 = vcombine.low %v1047_v33, %v1051_v40 }
 0x2cb   :  { %4421 = vmatprep.subr.bf16.mxu1 %v8682_v44  ;;  %v1052_v42 = vld [vmem:[#allocation8 + $0x9f8] sm:$0xff]  ;;  %v8727_v44 = vcombine.low %v1039_v25, %v1043_v27 }
 0x2cc   :  { %4249 = vmatmul.mubr.bf16.vlgmr.msra.gmra.mrb[12].mxu0 %v9983_v8  ;;  %v8737_v53 = vcombine.low %v1048_v41, %v1052_v42 }
 0x2cd   :  { %4413 = vmatmul.mubr.bf16.vlgmr.msra.gmra.mrb[12].mxu1 %v9983_v8  ;;  %4258 = vmatpush1.bf16.msra.mxu0 %v8679_v51  ;;  %v8697_v8 = vcombine.low %v1008_v55, %v1012_v56  ;;  %v8738_v51 = vcombine.high %v1048_v41, %v1052_v42  ;;  %v1063_v56 = vld [vmem:[#allocation8 + $0xa50] sm:$0xff] }
 0x2ce   :  { %4289 = vmatprep.mubr.bf16.mxu0 %v9985_v20  ;;  %4422 = vmatpush1.bf16.msra.mxu1 %v8681_v49  ;;  %v1056_v49 = vld [vmem:[#allocation8 + $0xa18] sm:$0xff]  ;;  %v1103_v42 = vld [vmem:[#allocation8 + $0xb90] sm:$0xff] }
 0x2cf   :  { %4453 = vmatprep.mubr.bf16.mxu1 %v9985_v20  ;;  %4259 = vmatprep.subr.bf16.mxu0 %v8688_v50  ;;  %v8703_v20 = vcombine.low %v1015_v60, %v1019_v61  ;;  %v1060_v50 = vld [vmem:[#allocation8 + $0xa38] sm:$0xff] }
 0x2d0   :  { %4423 = vmatprep.subr.bf16.mxu1 %v8690_v54  ;;  %v8744_v54 = vcombine.high %v1055_v47, %v1059_v26  ;;  %v8746_v55 = vcombine.high %v1056_v49, %v1060_v50  ;;  %v8745_v60 = vcombine.low %v1056_v49, %v1060_v50  ;;  %v1111_v50 = vld [vmem:[#allocation8 + $0xbd0] sm:$0xff] }
 0x2d1   :  { %4260 = vmatpush1.bf16.msra.mxu0 %v8687_v16  ;;  %v1067_v16 = vld [vmem:[#allocation8 + $0xa70] sm:$0xff] }
 0x2d2   :  { %4424 = vmatpush1.bf16.msra.mxu1 %v8689_v39  ;;  %4261 = vmatprep.subr.bf16.mxu0 %v8696_v58  ;;  %v1064_v39 = vld [vmem:[#allocation8 + $0xa58] sm:$0xff]  ;;  %v8752_v61 = vcombine.high %v1063_v56, %v1067_v16 }
 0x2d3   :  { %4425 = vmatprep.subr.bf16.mxu1 %v8698_v59  ;;  %v1068_v58 = vld [vmem:[#allocation8 + $0xa78] sm:$0xff]  ;;  %v8743_v59 = vcombine.low %v1055_v47, %v1059_v26 }
 0x2d4   :  { %v8754_v62 = vcombine.high %v1064_v39, %v1068_v58  ;;  %v8753_v4 = vcombine.low %v1064_v39, %v1068_v58  ;;  %v1119_v58 = vld [vmem:[#allocation8 + $0xc10] sm:$0xff] }
 0x2d5   :  { %4262 = vmatpush1.bf16.msra.mxu0 %v8695_v30  ;;  %v1075_v30 = vld [vmem:[#allocation8 + $0xab0] sm:$0xff] }
 0x2d6   :  { %4426 = vmatpush1.bf16.msra.mxu1 %v8697_v8  ;;  %4263 = vmatprep.subr.bf16.mxu0 %v8704_v31  ;;  %v1072_v8 = vld [vmem:[#allocation8 + $0xa98] sm:$0xff]  ;;  %v8760_v5 = vcombine.high %v1071_v63, %v1075_v30 }
 0x2d7   :  { %4427 = vmatprep.subr.bf16.mxu1 %v8706_v2  ;;  %v1076_v31 = vld [vmem:[#allocation8 + $0xab8] sm:$0xff]  ;;  %v8751_v2 = vcombine.low %v1063_v56, %v1067_v16 }
 0x2d8   :  { %v8762_v7 = vcombine.high %v1072_v8, %v1076_v31  ;;  %v8761_v12 = vcombine.low %v1072_v8, %v1076_v31  ;;  %v1127_v31 = vld [vmem:[#allocation8 + $0xc50] sm:$0xff] }
 0x2d9   :  { %4264 = vmatpush1.bf16.msra.mxu0 %v8703_v20  ;;  %v1083_v20 = vld [vmem:[#allocation8 + $0xaf0] sm:$0xff] }
 0x2da   :  { %4428 = vmatpush1.bf16.msra.mxu1 %v8705_v6  ;;  %4265 = vmatprep.subr.bf16.mxu0 %v8712_v10  ;;  %v1080_v6 = vld [vmem:[#allocation8 + $0xad8] sm:$0xff]  ;;  %v8768_v13 = vcombine.high %v1079_v9, %v1083_v20 }
 0x2db   :  { %4429 = vmatprep.subr.bf16.mxu1 %v8714_v11  ;;  %v1084_v10 = vld [vmem:[#allocation8 + $0xaf8] sm:$0xff]  ;;  %v8759_v11 = vcombine.low %v1071_v63, %v1075_v30 }
 0x2dc   :  { %v8770_v19 = vcombine.high %v1080_v6, %v1084_v10  ;;  %v8769_v25 = vcombine.low %v1080_v6, %v1084_v10  ;;  %v1135_v6 = vld [vmem:[#allocation8 + $0xc90] sm:$0xff] }
 0x2dd   :  { %4266 = vmatpush1.bf16.msra.mxu0 %v8711_v14  ;;  %v1091_v14 = vld [vmem:[#allocation8 + $0xb30] sm:$0xff] }
 0x2de   :  { %4430 = vmatpush1.bf16.msra.mxu1 %v8713_v22  ;;  %4267 = vmatprep.subr.bf16.mxu0 %v8720_v23  ;;  %v1088_v22 = vld [vmem:[#allocation8 + $0xb18] sm:$0xff]  ;;  %v8776_v27 = vcombine.high %v1087_v0, %v1091_v14  ;;  %v1139_v10 = vld [vmem:[#allocation8 + $0xcb0] sm:$0xff] }
 0x2df   :  { %4431 = vmatprep.subr.bf16.mxu1 %v8722_v24  ;;  %v1092_v23 = vld [vmem:[#allocation8 + $0xb38] sm:$0xff]  ;;  %v8767_v24 = vcombine.low %v1079_v9, %v1083_v20 }
 0x2e0   :  { %v8778_v28 = vcombine.high %v1088_v22, %v1092_v23  ;;  %v8777_v33 = vcombine.low %v1088_v22, %v1092_v23  ;;  %v1143_v23 = vld [vmem:[#allocation8 + $0xcd0] sm:$0xff] }
 0x2e1   :  { %4268 = vmatpush1.bf16.msra.mxu0 %v8719_v34  ;;  %v1099_v34 = vld [vmem:[#allocation8 + $0xb70] sm:$0xff] }
 0x2e2   :  { %4432 = vmatpush1.bf16.msra.mxu1 %v8721_v35  ;;  %4269 = vmatprep.subr.bf16.mxu0 %v8728_v36  ;;  %v1096_v35 = vld [vmem:[#allocation8 + $0xb58] sm:$0xff]  ;;  %v8784_v40 = vcombine.high %v1095_v32, %v1099_v34 }
 0x2e3   :  { %4433 = vmatprep.subr.bf16.mxu1 %v8730_v38  ;;  %v1100_v36 = vld [vmem:[#allocation8 + $0xb78] sm:$0xff]  ;;  %v8775_v38 = vcombine.low %v1087_v0, %v1091_v14  ;;  %v8824_v14 = vcombine.high %v1135_v6, %v1139_v10 }
 0x2e4   :  { %v8786_v41 = vcombine.high %v1096_v35, %v1100_v36  ;;  %v8785_v47 = vcombine.low %v1096_v35, %v1100_v36  ;;  %v1151_v35 = vld [vmem:[#allocation8 + $0xd10] sm:$0xff] }
 0x2e5   :  { %4270 = vmatpush1.bf16.msra.mxu0 %v8727_v44  ;;  %v1107_v44 = vld [vmem:[#allocation8 + $0xbb0] sm:$0xff] }
 0x2e6   :  { %4434 = vmatpush1.bf16.msra.mxu1 %v8729_v45  ;;  %4271 = vmatprep.subr.bf16.mxu0 %v8736_v46  ;;  %v1104_v45 = vld [vmem:[#allocation8 + $0xb98] sm:$0xff]  ;;  %v8792_v26 = vcombine.high %v1103_v42, %v1107_v44  ;;  %v1155_v36 = vld [vmem:[#allocation8 + $0xd30] sm:$0xff] }
 0x2e7   :  { %4435 = vmatprep.subr.bf16.mxu1 %v8738_v51  ;;  %v1108_v46 = vld [vmem:[#allocation8 + $0xbb8] sm:$0xff]  ;;  %v8783_v51 = vcombine.low %v1095_v32, %v1099_v34 }
 0x2e8   :  { %v8794_v49 = vcombine.high %v1104_v45, %v1108_v46  ;;  %v8793_v56 = vcombine.low %v1104_v45, %v1108_v46  ;;  %v1163_v45 = vld [vmem:[#allocation8 + $0xd70] sm:$0xff]  ;;  %v1160_v46 = vld [vmem:[#allocation8 + $0xd58] sm:$0xff] }
 0x2e9   :  { %4272 = vmatpush1.bf16.msra.mxu0 %v8735_v52  ;;  %v1115_v52 = vld [vmem:[#allocation8 + $0xbf0] sm:$0xff] }
 0x2ea   :  { %4436 = vmatpush1.bf16.msra.mxu1 %v8737_v53  ;;  %4273 = vmatprep.subr.bf16.mxu0 %v8744_v54  ;;  %v1112_v53 = vld [vmem:[#allocation8 + $0xbd8] sm:$0xff]  ;;  %v8800_v16 = vcombine.high %v1111_v50, %v1115_v52 }
 0x2eb   :  { %4437 = vmatprep.subr.bf16.mxu1 %v8746_v55  ;;  %v1116_v54 = vld [vmem:[#allocation8 + $0xbf8] sm:$0xff]  ;;  %v8791_v55 = vcombine.low %v1103_v42, %v1107_v44  ;;  %v1159_v44 = vld [vmem:[#allocation8 + $0xd50] sm:$0xff] }
 0x2ec   :  { %v8802_v39 = vcombine.high %v1112_v53, %v1116_v54  ;;  %v8801_v63 = vcombine.low %v1112_v53, %v1116_v54  ;;  %v1171_v53 = vld [vmem:[#allocation8 + $0xdb0] sm:$0xff]  ;;  %v1168_v54 = vld [vmem:[#allocation8 + $0xd98] sm:$0xff] }
 0x2ed   :  { %4274 = vmatpush1.bf16.msra.mxu0 %v8743_v59  ;;  %v1123_v59 = vld [vmem:[#allocation8 + $0xc30] sm:$0xff] }
 0x2ee   :  { %4438 = vmatpush1.bf16.msra.mxu1 %v8745_v60  ;;  %4275 = vmatprep.subr.bf16.mxu0 %v8752_v61  ;;  %v1120_v60 = vld [vmem:[#allocation8 + $0xc18] sm:$0xff]  ;;  %v8808_v30 = vcombine.high %v1119_v58, %v1123_v59 }
 0x2ef   :  { %4439 = vmatprep.subr.bf16.mxu1 %v8754_v62  ;;  %v1124_v61 = vld [vmem:[#allocation8 + $0xc38] sm:$0xff]  ;;  %v8799_v62 = vcombine.low %v1111_v50, %v1115_v52  ;;  %v1167_v52 = vld [vmem:[#allocation8 + $0xd90] sm:$0xff] }
 0x2f0   :  { %v8810_v8 = vcombine.high %v1120_v60, %v1124_v61  ;;  %v8809_v9 = vcombine.low %v1120_v60, %v1124_v61  ;;  %v1175_v61 = vld [vmem:[#allocation8 + $0xdd0] sm:$0xff] }
 0x2f1   :  { %4276 = vmatpush1.bf16.msra.mxu0 %v8751_v2  ;;  %v1131_v2 = vld [vmem:[#allocation8 + $0xc70] sm:$0xff] }
 0x2f2   :  { %4440 = vmatpush1.bf16.msra.mxu1 %v8753_v4  ;;  %4277 = vmatprep.subr.bf16.mxu0 %v8760_v5  ;;  %v8807_v4 = vcombine.low %v1119_v58, %v1123_v59  ;;  %v1128_v5 = vld [vmem:[#allocation8 + $0xc58] sm:$0xff]  ;;  %v8816_v20 = vcombine.high %v1127_v31, %v1131_v2 }
 0x2f3   :  { %4441 = vmatprep.subr.bf16.mxu1 %v8762_v7  ;;  %v1132_v7 = vld [vmem:[#allocation8 + $0xc78] sm:$0xff] }
 0x2f4   :  { %v8817_v0 = vcombine.low %v1128_v5, %v1132_v7 }
 0x2f5   :  { %4278 = vmatpush1.bf16.msra.mxu0 %v8759_v11  ;;  %v8818_v11 = vcombine.high %v1128_v5, %v1132_v7  ;;  %v8855_v5 = vcombine.low %v1167_v52, %v1171_v53 }
 0x2f6   :  { %4442 = vmatpush1.bf16.msra.mxu1 %v8761_v12  ;;  %4279 = vmatprep.subr.bf16.mxu0 %v8768_v13  ;;  %v1136_v12 = vld [vmem:[#allocation8 + $0xc98] sm:$0xff] }
 0x2f7   :  { %4443 = vmatprep.subr.bf16.mxu1 %v8770_v19  ;;  %v1140_v13 = vld [vmem:[#allocation8 + $0xcb8] sm:$0xff]  ;;  %v8815_v19 = vcombine.low %v1127_v31, %v1131_v2 }
 0x2f8   :  { %v8826_v22 = vcombine.high %v1136_v12, %v1140_v13  ;;  %v1180_v31 = vld [vmem:[#allocation8 + $0xdf8] sm:$0xff] }
 0x2f9   :  { %4280 = vmatpush1.bf16.msra.mxu0 %v8767_v24  ;;  %v1147_v24 = vld [vmem:[#allocation8 + $0xcf0] sm:$0xff] }
 0x2fa   :  { %4444 = vmatpush1.bf16.msra.mxu1 %v8769_v25  ;;  %4281 = vmatprep.subr.bf16.mxu0 %v8776_v27  ;;  %v1144_v25 = vld [vmem:[#allocation8 + $0xcd8] sm:$0xff]  ;;  %v8832_v32 = vcombine.high %v1143_v23, %v1147_v24 }
 0x2fb   :  { %4445 = vmatprep.subr.bf16.mxu1 %v8778_v28  ;;  %v1148_v27 = vld [vmem:[#allocation8 + $0xcf8] sm:$0xff]  ;;  %v8823_v28 = vcombine.low %v1135_v6, %v1139_v10 }
 0x2fc   :  { %v8834_v34 = vcombine.high %v1144_v25, %v1148_v27 }
 0x2fd   :  { %4282 = vmatpush1.bf16.msra.mxu0 %v8775_v38  ;;  %v1152_v38 = vld [vmem:[#allocation8 + $0xd18] sm:$0xff] }
 0x2fe   :  { %4446 = vmatpush1.bf16.msra.mxu1 %v8777_v33  ;;  %4283 = vmatprep.subr.bf16.mxu0 %v8784_v40  ;;  %v1156_v33 = vld [vmem:[#allocation8 + $0xd38] sm:$0xff]  ;;  %v8833_v40 = vcombine.low %v1144_v25, %v1148_v27  ;;  %v1195_v25 = vld [vmem:[#allocation8 + $0xe70] sm:$0xff] }
 0x2ff   :  { %4447 = vmatprep.subr.bf16.mxu1 %v8786_v41  ;;  %v8840_v41 = vcombine.high %v1151_v35, %v1155_v36  ;;  %v8842_v42 = vcombine.high %v1152_v38, %v1156_v33  ;;  %v1192_v27 = vld [vmem:[#allocation8 + $0xe58] sm:$0xff] }
 0x301   :  { %4284 = vmatpush1.bf16.msra.mxu0 %v8783_v51  ;;  %v1164_v51 = vld [vmem:[#allocation8 + $0xd78] sm:$0xff] }
 0x302   :  { %4448 = vmatpush1.bf16.msra.mxu1 %v8785_v47  ;;  %4285 = vmatprep.subr.bf16.mxu0 %v8792_v26  ;;  %v8839_v47 = vcombine.low %v1151_v35, %v1155_v36  ;;  %v8841_v26 = vcombine.low %v1152_v38, %v1156_v33  ;;  %v8850_v50 = vcombine.high %v1160_v46, %v1164_v51  ;;  %v1199_v36 = vld [vmem:[#allocation8 + $0xe90] sm:$0xff]  ;;  %v1200_v33 = vld [vmem:[#allocation8 + $0xe98] sm:$0xff] }
 0x303   :  { %4449 = vmatprep.subr.bf16.mxu1 %v8794_v49  ;;  %v8848_v49 = vcombine.high %v1159_v44, %v1163_v45  ;;  %v1203_v38 = vld [vmem:[#allocation8 + $0xeb0] sm:$0xff] }
 0x305   :  { %4286 = vmatpush1.bf16.msra.mxu0 %v8791_v55  ;;  %v1172_v55 = vld [vmem:[#allocation8 + $0xdb8] sm:$0xff] }
 0x306   :  { %4450 = vmatpush1.bf16.msra.mxu1 %v8793_v56  ;;  %4287 = vmatprep.subr.bf16.mxu0 %v8800_v16  ;;  %v8847_v56 = vcombine.low %v1159_v44, %v1163_v45  ;;  %v8849_v16 = vcombine.low %v1160_v46, %v1164_v51  ;;  %v8858_v60 = vcombine.high %v1168_v54, %v1172_v55  ;;  %v1207_v45 = vld [vmem:[#allocation8 + $0xed0] sm:$0xff]  ;;  %v1208_v51 = vld [vmem:[#allocation8 + $0xed8] sm:$0xff] }
 0x307   :  { %4451 = vmatprep.subr.bf16.mxu1 %v8802_v39  ;;  %v8856_v39 = vcombine.high %v1167_v52, %v1171_v53  ;;  %v1211_v46 = vld [vmem:[#allocation8 + $0xef0] sm:$0xff] }
 0x308   :  { %v1215_v53 = vld [vmem:[#allocation8 + $0xf10] sm:$0xff] }
 0x309   :  { %4288 = vmatpush1.bf16.msra.mxu0 %v8799_v62  ;;  %v1179_v62 = vld [vmem:[#allocation8 + $0xdf0] sm:$0xff] }
 0x30a   :  { %4452 = vmatpush1.bf16.msra.mxu1 %v8801_v63  ;;  %4298 = vmatprep.subr.bf16.mxu0 %v8808_v30  ;;  %v8864_v6 = vcombine.high %v1175_v61, %v1179_v62 }
 0x30b   :  { %4462 = vmatprep.subr.bf16.mxu1 %v8810_v8  ;;  %v1176_v8 = vld [vmem:[#allocation8 + $0xdd8] sm:$0xff] }
 0x30c   :  { %4290 = vmatmul.mubr.bf16.vlgmr.msra.gmra.mrb[12].mxu0 %v10003_v57  ;;  %v8866_v10 = vcombine.high %v1176_v8, %v1180_v31 }
 0x30d   :  { %4454 = vmatmul.mubr.bf16.vlgmr.msra.gmra.mrb[12].mxu1 %v10003_v57  ;;  %4299 = vmatpush1.bf16.msra.mxu0 %v8807_v4  ;;  %v8825_v57 = vcombine.low %v1136_v12, %v1140_v13  ;;  %v1187_v12 = vld [vmem:[#allocation8 + $0xe30] sm:$0xff]  ;;  %v1184_v13 = vld [vmem:[#allocation8 + $0xe18] sm:$0xff] }
 0x30e   :  { %4330 = vmatprep.mubr.bf16.mxu0 %v10005_v1  ;;  %4463 = vmatpush1.bf16.msra.mxu1 %v8809_v9 }
 0x30f   :  { %4494 = vmatprep.mubr.bf16.mxu1 %v10005_v1  ;;  %4300 = vmatprep.subr.bf16.mxu0 %v8816_v20  ;;  %v8831_v1 = vcombine.low %v1143_v23, %v1147_v24  ;;  %v8857_v20 = vcombine.low %v1168_v54, %v1172_v55  ;;  %v1191_v24 = vld [vmem:[#allocation8 + $0xe50] sm:$0xff]  ;;  %v1216_v55 = vld [vmem:[#allocation8 + $0xf18] sm:$0xff] }
 0x310   :  { %4464 = vmatprep.subr.bf16.mxu1 %v8818_v11  ;;  %v1183_v11 = vld [vmem:[#allocation8 + $0xe10] sm:$0xff] }
 0x311   :  { %4301 = vmatpush1.bf16.msra.mxu0 %v8815_v19  ;;  %v1188_v19 = vld [vmem:[#allocation8 + $0xe38] sm:$0xff]  ;;  %v1219_v54 = vld [vmem:[#allocation8 + $0xf30] sm:$0xff] }
 0x312   :  { %4465 = vmatpush1.bf16.msra.mxu1 %v8817_v0  ;;  %4302 = vmatprep.subr.bf16.mxu0 %v8824_v14  ;;  %v8863_v0 = vcombine.low %v1175_v61, %v1179_v62  ;;  %v8865_v14 = vcombine.low %v1176_v8, %v1180_v31  ;;  %v8874_v23 = vcombine.high %v1184_v13, %v1188_v19  ;;  %v1223_v62 = vld [vmem:[#allocation8 + $0xf50] sm:$0xff]  ;;  %v1224_v31 = vld [vmem:[#allocation8 + $0xf58] sm:$0xff] }
 0x313   :  { %4466 = vmatprep.subr.bf16.mxu1 %v8826_v22  ;;  %v8872_v22 = vcombine.high %v1183_v11, %v1187_v12  ;;  %v1227_v8 = vld [vmem:[#allocation8 + $0xf70] sm:$0xff] }
 0x315   :  { %4303 = vmatpush1.bf16.msra.mxu0 %v8823_v28  ;;  %v1196_v28 = vld [vmem:[#allocation8 + $0xe78] sm:$0xff] }
 0x316   :  { %4467 = vmatpush1.bf16.msra.mxu1 %v8825_v57  ;;  %4304 = vmatprep.subr.bf16.mxu0 %v8832_v32  ;;  %v8871_v57 = vcombine.low %v1183_v11, %v1187_v12  ;;  %v8873_v32 = vcombine.low %v1184_v13, %v1188_v19  ;;  %v8882_v35 = vcombine.high %v1192_v27, %v1196_v28  ;;  %v1236_v11 = vld [vmem:[#allocation8 + $0xfb8] sm:$0xff] }
 0x317   :  { %4468 = vmatprep.subr.bf16.mxu1 %v8834_v34  ;;  %v8880_v34 = vcombine.high %v1191_v24, %v1195_v25  ;;  %v8911_v12 = vcombine.low %v1223_v62, %v1227_v8 }
 0x319   :  { %4305 = vmatpush1.bf16.msra.mxu0 %v8831_v1  ;;  %v1204_v1 = vld [vmem:[#allocation8 + $0xeb8] sm:$0xff] }
 0x31a   :  { %4469 = vmatpush1.bf16.msra.mxu1 %v8833_v40  ;;  %4306 = vmatprep.subr.bf16.mxu0 %v8840_v41  ;;  %v8879_v40 = vcombine.low %v1191_v24, %v1195_v25  ;;  %v8881_v41 = vcombine.low %v1192_v27, %v1196_v28  ;;  %v8890_v44 = vcombine.high %v1200_v33, %v1204_v1  ;;  %v1244_v24 = vld [vmem:[#allocation8 + $0xff8] sm:$0xff]  ;;  %v10042_v25 = vld [vmem:[#allocation10] sm:$0xff] }
 0x31b   :  { %4470 = vmatprep.subr.bf16.mxu1 %v8842_v42  ;;  %v8888_v42 = vcombine.high %v1199_v36, %v1203_v38 }
 0x31d   :  { %4307 = vmatpush1.bf16.msra.mxu0 %v8839_v47  ;;  %v1212_v47 = vld [vmem:[#allocation8 + $0xef8] sm:$0xff] }
 0x31e   :  { %4471 = vmatpush1.bf16.msra.mxu1 %v8841_v26  ;;  %4308 = vmatprep.subr.bf16.mxu0 %v8848_v49  ;;  %v8887_v26 = vcombine.low %v1199_v36, %v1203_v38  ;;  %v8889_v49 = vcombine.low %v1200_v33, %v1204_v1  ;;  %v8898_v52 = vcombine.high %v1208_v51, %v1212_v47  ;;  %v4512_v38 = vld [vmem:[#allocation11 + $0x8] sm:$0xff] }
 0x31f   :  { %v10034_v58 = vpop.f32.mrb[8].mxu0  ;;  %v10036_v59 = vpop.f32.mrb[8].mxu1  ;;  %4472 = vmatprep.subr.bf16.mxu1 %v8850_v50  ;;  %v8896_v50 = vcombine.high %v1207_v45, %v1211_v46  ;;  %v1254_v36 = vrot.slane %v10042_v25, %v9938_v17  ;;  %v4516_v33 = vld [vmem:[#allocation11 + $0x28] sm:$0xff] }
 0x320   :  { %v10038_v63 = vpop.f32.mrb[9].mxu0  ;;  %v10040_v30 = vpop.f32.mrb[9].mxu1 }
 0x321   :  { %v4008_v2 = vpop.f32.mrb[10].mxu0  ;;  %v4172_v4 = vpop.f32.mrb[10].mxu1  ;;  %4309 = vmatpush1.bf16.msra.mxu0 %v8847_v56  ;;  %v1220_v56 = vld [vmem:[#allocation8 + $0xf38] sm:$0xff] }
 0x322   :  { %4473 = vmatpush1.bf16.msra.mxu1 %v8849_v16  ;;  %v4009_v7 = vpop.f32.mrb[11].mxu0  ;;  %v4173_v9 = vpop.f32.mrb[11].mxu1  ;;  %4310 = vmatprep.subr.bf16.mxu0 %v8856_v39  ;;  %v8895_v16 = vcombine.low %v1207_v45, %v1211_v46  ;;  %v8897_v39 = vcombine.low %v1208_v51, %v1212_v47  ;;  %v8906_v61 = vcombine.high %v1216_v55, %v1220_v56  ;;  %v1228_v2 = vld [vmem:[#allocation8 + $0xf78] sm:$0xff]  ;;  %v4519_v45 = vld [vmem:[#allocation11 + $0x40] sm:$0xff]  ;;  %v4520_v47 = vld [vmem:[#allocation11 + $0x48] sm:$0xff] }
 0x323   :  { %4474 = vmatprep.subr.bf16.mxu1 %v8858_v60  ;;  %v8904_v60 = vcombine.high %v1215_v53, %v1219_v54  ;;  %v8903_v4 = vcombine.low %v1215_v53, %v1219_v54  ;;  %v8912_v7 = vcombine.high %v1223_v62, %v1227_v8  ;;  %v8914_v9 = vcombine.high %v1224_v31, %v1228_v2  ;;  %v4523_v46 = vld [vmem:[#allocation11 + $0x60] sm:$0xff] }
 0x324   :  { %v8913_v13 = vcombine.low %v1224_v31, %v1228_v2  ;;  %v4531_v53 = vld [vmem:[#allocation11 + $0xa0] sm:$0xff]  ;;  %v4536_v31 = vld [vmem:[#allocation11 + $0xc8] sm:$0xff] }
 0x325   :  { %4311 = vmatpush1.bf16.msra.mxu0 %v8855_v5  ;;  %v8905_v5 = vcombine.low %v1216_v55, %v1220_v56  ;;  %v4528_v56 = vld [vmem:[#allocation11 + $0x88] sm:$0xff]  ;;  %v4535_v62 = vld [vmem:[#allocation11 + $0xc0] sm:$0xff] }
 0x326   :  { %4475 = vmatpush1.bf16.msra.mxu1 %v8857_v20  ;;  %4312 = vmatprep.subr.bf16.mxu0 %v8864_v6  ;;  %v1231_v20 = vld [vmem:[#allocation8 + $0xf90] sm:$0xff]  ;;  %v4539_v8 = vld [vmem:[#allocation11 + $0xe0] sm:$0xff] }
 0x327   :  { %4476 = vmatprep.subr.bf16.mxu1 %v8866_v10  ;;  %v1235_v6 = vld [vmem:[#allocation8 + $0xfb0] sm:$0xff]  ;;  %v1232_v10 = vld [vmem:[#allocation8 + $0xf98] sm:$0xff] }
 0x328   :  { %v8920_v19 = vcombine.high %v1231_v20, %v1235_v6  ;;  %v8919_v27 = vcombine.low %v1231_v20, %v1235_v6  ;;  %v8921_v28 = vcombine.low %v1232_v10, %v1236_v11  ;;  %v4540_v2 = vld [vmem:[#allocation11 + $0xe8] sm:$0xff]  ;;  %v4547_v20 = vld [vmem:[#allocation11 + $0x120] sm:$0xff] }
 0x329   :  { %4313 = vmatpush1.bf16.msra.mxu0 %v8863_v0  ;;  %v8922_v0 = vcombine.high %v1232_v10, %v1236_v11  ;;  %v4544_v6 = vld [vmem:[#allocation11 + $0x108] sm:$0xff]  ;;  %v8955_v11 = vcombine.low %v4535_v62, %v4539_v8 }
 0x32a   :  { %4477 = vmatpush1.bf16.msra.mxu1 %v8865_v14  ;;  %4314 = vmatprep.subr.bf16.mxu0 %v8872_v22  ;;  %v1239_v14 = vld [vmem:[#allocation8 + $0xfd0] sm:$0xff] }
 0x32b   :  { %4478 = vmatprep.subr.bf16.mxu1 %v8874_v23  ;;  %v1243_v22 = vld [vmem:[#allocation8 + $0xff0] sm:$0xff]  ;;  %v1240_v23 = vld [vmem:[#allocation8 + $0xfd8] sm:$0xff] }
 0x32c   :  { %v8927_v1 = vcombine.low %v1239_v14, %v1243_v22  ;;  %v4548_v10 = vld [vmem:[#allocation11 + $0x128] sm:$0xff] }
 0x32d   :  { %4315 = vmatpush1.bf16.msra.mxu0 %v8871_v57  ;;  %v8928_v57 = vcombine.high %v1239_v14, %v1243_v22  ;;  %v4555_v14 = vld [vmem:[#allocation11 + $0x160] sm:$0xff]  ;;  %v4552_v22 = vld [vmem:[#allocation11 + $0x148] sm:$0xff] }
 0x32e   :  { %4479 = vmatpush1.bf16.msra.mxu1 %v8873_v32  ;;  %4316 = vmatprep.subr.bf16.mxu0 %v8880_v34  ;;  %v8930_v32 = vcombine.high %v1240_v23, %v1244_v24  ;;  %v4511_v34 = vld [vmem:[#allocation11] sm:$0xff] }
 0x32f   :  { %4480 = vmatprep.subr.bf16.mxu1 %v8882_v35  ;;  %v4515_v35 = vld [vmem:[#allocation11 + $0x20] sm:$0xff] }
 0x330   :  { %v8931_v51 = vcombine.low %v4511_v34, %v4515_v35 }
 0x331   :  { %4317 = vmatpush1.bf16.msra.mxu0 %v8879_v40  ;;  %v8929_v40 = vcombine.low %v1240_v23, %v1244_v24  ;;  %v4556_v23 = vld [vmem:[#allocation11 + $0x168] sm:$0xff] }
 0x332   :  { %4481 = vmatpush1.bf16.msra.mxu1 %v8881_v41  ;;  %4318 = vmatprep.subr.bf16.mxu0 %v8888_v42  ;;  %v8932_v41 = vcombine.high %v4511_v34, %v4515_v35  ;;  %v8934_v42 = vcombine.high %v4512_v38, %v4516_v33  ;;  %v4563_v34 = vld [vmem:[#allocation11 + $0x1a0] sm:$0xff]  ;;  %v4560_v35 = vld [vmem:[#allocation11 + $0x188] sm:$0xff] }
 0x333   :  { %4482 = vmatprep.subr.bf16.mxu1 %v8890_v44  ;;  %v9444_v44 = vadd.f32 %v10038_v63, %v1254_v36  ;;  %v4532_v63 = vld [vmem:[#allocation11 + $0xa8] sm:$0xff] }
 0x334   :  { %v4564_v36 = vld [vmem:[#allocation11 + $0x1a8] sm:$0xff] }
 0x335   :  { %4319 = vmatpush1.bf16.msra.mxu0 %v8887_v26  ;;  %v4524_v26 = vld [vmem:[#allocation11 + $0x68] sm:$0xff]  ;;  %v10047_v54 = vpack.c.bf16 %v9444_v44, %v9444_v44 }
 0x336   :  { %4483 = vmatpush1.bf16.msra.mxu1 %v8889_v49  ;;  %4320 = vmatprep.subr.bf16.mxu0 %v8896_v50  ;;  %v8933_v49 = vcombine.low %v4512_v38, %v4516_v33  ;;  %v8940_v50 = vcombine.high %v4519_v45, %v4523_v46  ;;  %v8942_v55 = vcombine.high %v4520_v47, %v4524_v26  ;;  %v4568_v44 = vld [vmem:[#allocation11 + $0x1c8] sm:$0xff] }
 0x337   :  { %4484 = vmatprep.subr.bf16.mxu1 %v8898_v52  ;;  %v4527_v52 = vld [vmem:[#allocation11 + $0x80] sm:$0xff]  ;;  %v8973_v33 = vcombine.low %v4552_v22, %v4556_v23 }
 0x339   :  { %4321 = vmatpush1.bf16.msra.mxu0 %v8895_v16  ;;  %v8939_v16 = vcombine.low %v4519_v45, %v4523_v46  ;;  %v4572_v45 = vld [vmem:[#allocation11 + $0x1e8] sm:$0xff] }
 0x33a   :  { %4485 = vmatpush1.bf16.msra.mxu1 %v8897_v39  ;;  %4322 = vmatprep.subr.bf16.mxu0 %v8904_v60  ;;  %v8941_v39 = vcombine.low %v4520_v47, %v4524_v26  ;;  %v8948_v60 = vcombine.high %v4527_v52, %v4531_v53  ;;  %v8990_v26 = vcombine.high %v4568_v44, %v4572_v45 }
 0x33b   :  { %4486 = vmatprep.subr.bf16.mxu1 %v8906_v61  ;;  %v8950_v61 = vcombine.high %v4528_v56, %v4532_v63 }
 0x33d   :  { %4323 = vmatpush1.bf16.msra.mxu0 %v8903_v4  ;;  %v8947_v4 = vcombine.low %v4527_v52, %v4531_v53  ;;  %v4576_v52 = vld [vmem:[#allocation11 + $0x208] sm:$0xff] }
 0x33e   :  { %4487 = vmatpush1.bf16.msra.mxu1 %v8905_v5  ;;  %4324 = vmatprep.subr.bf16.mxu0 %v8912_v7  ;;  %v8956_v5 = vcombine.high %v4535_v62, %v4539_v8  ;;  %v8958_v7 = vcombine.high %v4536_v31, %v4540_v2  ;;  %v4580_v53 = vld [vmem:[#allocation11 + $0x228] sm:$0xff] }
 0x33f   :  { %4488 = vmatprep.subr.bf16.mxu1 %v8914_v9  ;;  %v4543_v9 = vld [vmem:[#allocation11 + $0x100] sm:$0xff]  ;;  %v4588_v62 = vld [vmem:[#allocation11 + $0x268] sm:$0xff] }
 0x340   :  { %v8963_v24 = vcombine.low %v4543_v9, %v4547_v20 }
 0x341   :  { %4325 = vmatpush1.bf16.msra.mxu0 %v8911_v12  ;;  %v8957_v12 = vcombine.low %v4536_v31, %v4540_v2  ;;  %v8997_v31 = vcombine.low %v4576_v52, %v4580_v53 }
 0x342   :  { %4489 = vmatpush1.bf16.msra.mxu1 %v8913_v13  ;;  %4326 = vmatprep.subr.bf16.mxu0 %v8920_v19  ;;  %v8964_v13 = vcombine.high %v4543_v9, %v4547_v20  ;;  %v8966_v19 = vcombine.high %v4544_v6, %v4548_v10  ;;  %v4596_v9 = vld [vmem:[#allocation11 + $0x2a8] sm:$0xff] }
 0x343   :  { %4490 = vmatprep.subr.bf16.mxu1 %v8922_v0  ;;  %v4551_v0 = vld [vmem:[#allocation11 + $0x140] sm:$0xff] }
 0x344   :  { %v8971_v38 = vcombine.low %v4551_v0, %v4555_v14 }
 0x345   :  { %4327 = vmatpush1.bf16.msra.mxu0 %v8919_v27  ;;  %v8965_v27 = vcombine.low %v4544_v6, %v4548_v10 }
 0x346   :  { %4491 = vmatpush1.bf16.msra.mxu1 %v8921_v28  ;;  %4328 = vmatprep.subr.bf16.mxu0 %v8928_v57  ;;  %v8972_v28 = vcombine.high %v4551_v0, %v4555_v14  ;;  %v8974_v57 = vcombine.high %v4552_v22, %v4556_v23  ;;  %v4604_v0 = vld [vmem:[#allocation11 + $0x2e8] sm:$0xff] }
 0x347   :  { %4492 = vmatprep.subr.bf16.mxu1 %v8930_v32  ;;  %v4559_v32 = vld [vmem:[#allocation11 + $0x180] sm:$0xff] }
 0x348   :  { %v8979_v46 = vcombine.low %v4559_v32, %v4563_v34 }
 0x349   :  { %4329 = vmatpush1.bf16.msra.mxu0 %v8927_v1  ;;  %v8980_v1 = vcombine.high %v4559_v32, %v4563_v34  ;;  %v4612_v32 = vld [vmem:[#allocation11 + $0x328] sm:$0xff] }
 0x34a   :  { %4493 = vmatpush1.bf16.msra.mxu1 %v8929_v40  ;;  %7625 = vmatprep.subr.bf16.mxu0 %v8932_v41  ;;  %v8982_v40 = vcombine.high %v4560_v35, %v4564_v36  ;;  %v4567_v41 = vld [vmem:[#allocation11 + $0x1c0] sm:$0xff] }
 0x34b   :  { %7789 = vmatprep.subr.bf16.mxu1 %v8934_v42  ;;  %v4571_v42 = vld [vmem:[#allocation11 + $0x1e0] sm:$0xff] }
 0x34c   :  { %4331 = vmatmul.mubr.bf16.vlgmr.msra.gmra.mrb[12].mxu0 %v10016_v43  ;;  %v8988_v47 = vcombine.high %v4567_v41, %v4571_v42 }
 0x34d   :  { %4495 = vmatmul.mubr.bf16.vlgmr.msra.gmra.mrb[12].mxu1 %v10016_v43  ;;  %7626 = vmatpush1.bf16.msra.mxu0 %v8931_v51  ;;  %v8949_v43 = vcombine.low %v4528_v56, %v4532_v63  ;;  %v8981_v51 = vcombine.low %v4560_v35, %v4564_v36  ;;  %v8989_v56 = vcombine.low %v4568_v44, %v4572_v45 }
 0x34e   :  { %7657 = vmatprep.mubr.bf16.mxu0 %v10047_v54  ;;  %7790 = vmatpush1.bf16.msra.mxu1 %v8933_v49  ;;  %v4575_v49 = vld [vmem:[#allocation11 + $0x200] sm:$0xff] }
 0x34f   :  { %7821 = vmatprep.mubr.bf16.mxu1 %v10047_v54  ;;  %7627 = vmatprep.subr.bf16.mxu0 %v8940_v50  ;;  %v4579_v50 = vld [vmem:[#allocation11 + $0x220] sm:$0xff] }
 0x350   :  { %7791 = vmatprep.subr.bf16.mxu1 %v8942_v55  ;;  %v8987_v55 = vcombine.low %v4567_v41, %v4571_v42  ;;  %v8996_v63 = vcombine.high %v4575_v49, %v4579_v50  ;;  %v8995_v8 = vcombine.low %v4575_v49, %v4579_v50  ;;  %v4620_v41 = vld [vmem:[#allocation11 + $0x368] sm:$0xff] }
 0x351   :  { %7628 = vmatpush1.bf16.msra.mxu0 %v8939_v16  ;;  %v8998_v16 = vcombine.high %v4576_v52, %v4580_v53  ;;  %v4628_v49 = vld [vmem:[#allocation11 + $0x3a8] sm:$0xff] }
 0x352   :  { %7792 = vmatpush1.bf16.msra.mxu1 %v8941_v39  ;;  %7629 = vmatprep.subr.bf16.mxu0 %v8948_v60  ;;  %v4583_v39 = vld [vmem:[#allocation11 + $0x240] sm:$0xff] }
 0x353   :  { %7793 = vmatprep.subr.bf16.mxu1 %v8950_v61  ;;  %v4587_v60 = vld [vmem:[#allocation11 + $0x260] sm:$0xff]  ;;  %v4584_v61 = vld [vmem:[#allocation11 + $0x248] sm:$0xff] }
 0x354   :  { %v9004_v2 = vcombine.high %v4583_v39, %v4587_v60  ;;  %v9003_v20 = vcombine.low %v4583_v39, %v4587_v60  ;;  %v9005_v6 = vcombine.low %v4584_v61, %v4588_v62  ;;  %v4636_v39 = vld [vmem:[#allocation11 + $0x3e8] sm:$0xff] }
 0x355   :  { %7630 = vmatpush1.bf16.msra.mxu0 %v8947_v4  ;;  %v9006_v4 = vcombine.high %v4584_v61, %v4588_v62  ;;  %v1250_v61 = vrot.slane %v10042_v25, %v9933_v15 }
 0x356   :  { %7794 = vmatpush1.bf16.msra.mxu1 %v8949_v43  ;;  %7631 = vmatprep.subr.bf16.mxu0 %v8956_v5  ;;  %v4591_v43 = vld [vmem:[#allocation11 + $0x280] sm:$0xff] }
 0x357   :  { %7795 = vmatprep.subr.bf16.mxu1 %v8958_v7  ;;  %v4595_v5 = vld [vmem:[#allocation11 + $0x2a0] sm:$0xff]  ;;  %v4592_v7 = vld [vmem:[#allocation11 + $0x288] sm:$0xff] }
 0x358   :  { %v9012_v10 = vcombine.high %v4591_v43, %v4595_v5  ;;  %v9011_v14 = vcombine.low %v4591_v43, %v4595_v5  ;;  %v9013_v22 = vcombine.low %v4592_v7, %v4596_v9  ;;  %v1262_v43 = vrot.slane %v10042_v25, %v9945_v21  ;;  %v4640_v5 = vld [vmem:[#allocation11 + $0x408] sm:$0xff] }
 0x359   :  { %7632 = vmatpush1.bf16.msra.mxu0 %v8955_v11  ;;  %v9014_v11 = vcombine.high %v4592_v7, %v4596_v9  ;;  %v4644_v7 = vld [vmem:[#allocation11 + $0x428] sm:$0xff] }
 0x35a   :  { %7796 = vmatpush1.bf16.msra.mxu1 %v8957_v12  ;;  %7633 = vmatprep.subr.bf16.mxu0 %v8964_v13  ;;  %v4599_v12 = vld [vmem:[#allocation11 + $0x2c0] sm:$0xff] }
 0x35b   :  { %7797 = vmatprep.subr.bf16.mxu1 %v8966_v19  ;;  %v4603_v13 = vld [vmem:[#allocation11 + $0x2e0] sm:$0xff]  ;;  %v4600_v19 = vld [vmem:[#allocation11 + $0x2c8] sm:$0xff] }
 0x35c   :  { %v9020_v23 = vcombine.high %v4599_v12, %v4603_v13  ;;  %v9019_v34 = vcombine.low %v4599_v12, %v4603_v13  ;;  %v9021_v35 = vcombine.low %v4600_v19, %v4604_v0  ;;  %v9446_v12 = vadd.f32 %v10040_v30, %v1262_v43  ;;  %v4647_v13 = vld [vmem:[#allocation11 + $0x440] sm:$0xff]  ;;  %v4688_v43 = vld [vmem:[#allocation11 + $0x588] sm:$0xff] }
 0x35d   :  { %7634 = vmatpush1.bf16.msra.mxu0 %v8963_v24  ;;  %v9022_v24 = vcombine.high %v4600_v19, %v4604_v0  ;;  %v4651_v19 = vld [vmem:[#allocation11 + $0x460] sm:$0xff] }
 0x35e   :  { %7798 = vmatpush1.bf16.msra.mxu1 %v8965_v27  ;;  %7635 = vmatprep.subr.bf16.mxu0 %v8972_v28  ;;  %v4607_v27 = vld [vmem:[#allocation11 + $0x300] sm:$0xff] }
 0x35f   :  { %7799 = vmatprep.subr.bf16.mxu1 %v8974_v57  ;;  %v4611_v28 = vld [vmem:[#allocation11 + $0x320] sm:$0xff]  ;;  %v4608_v57 = vld [vmem:[#allocation11 + $0x308] sm:$0xff] }
 0x360   :  { %v9028_v36 = vcombine.high %v4607_v27, %v4611_v28  ;;  %v9027_v42 = vcombine.low %v4607_v27, %v4611_v28  ;;  %v9029_v44 = vcombine.low %v4608_v57, %v4612_v32  ;;  %v4655_v27 = vld [vmem:[#allocation11 + $0x480] sm:$0xff] }
 0x361   :  { %7636 = vmatpush1.bf16.msra.mxu0 %v8971_v38  ;;  %v9030_v38 = vcombine.high %v4608_v57, %v4612_v32  ;;  %v4659_v28 = vld [vmem:[#allocation11 + $0x4a0] sm:$0xff]  ;;  %v10061_v57 = vpack.c.bf16 %v9446_v12, %v9446_v12  ;;  %v4656_v32 = vld [vmem:[#allocation11 + $0x488] sm:$0xff] }
 0x362   :  { %7800 = vmatpush1.bf16.msra.mxu1 %v8973_v33  ;;  %7637 = vmatprep.subr.bf16.mxu0 %v8980_v1  ;;  %v4615_v33 = vld [vmem:[#allocation11 + $0x340] sm:$0xff]  ;;  %v4696_v12 = vld [vmem:[#allocation11 + $0x5c8] sm:$0xff] }
 0x363   :  { %7801 = vmatprep.subr.bf16.mxu1 %v8982_v40  ;;  %v4619_v1 = vld [vmem:[#allocation11 + $0x360] sm:$0xff]  ;;  %v4616_v40 = vld [vmem:[#allocation11 + $0x348] sm:$0xff] }
 0x364   :  { %v9036_v45 = vcombine.high %v4615_v33, %v4619_v1  ;;  %v9035_v50 = vcombine.low %v4615_v33, %v4619_v1  ;;  %v9037_v52 = vcombine.low %v4616_v40, %v4620_v41  ;;  %v4663_v1 = vld [vmem:[#allocation11 + $0x4c0] sm:$0xff] }
 0x365   :  { %7638 = vmatpush1.bf16.msra.mxu0 %v8979_v46  ;;  %v9038_v46 = vcombine.high %v4616_v40, %v4620_v41  ;;  %v4667_v40 = vld [vmem:[#allocation11 + $0x4e0] sm:$0xff]  ;;  %v4664_v41 = vld [vmem:[#allocation11 + $0x4c8] sm:$0xff] }
 0x366   :  { %7802 = vmatpush1.bf16.msra.mxu1 %v8981_v51  ;;  %7639 = vmatprep.subr.bf16.mxu0 %v8988_v47  ;;  %v4623_v51 = vld [vmem:[#allocation11 + $0x380] sm:$0xff] }
 0x367   :  { %7803 = vmatprep.subr.bf16.mxu1 %v8990_v26  ;;  %v4627_v47 = vld [vmem:[#allocation11 + $0x3a0] sm:$0xff]  ;;  %v4624_v26 = vld [vmem:[#allocation11 + $0x388] sm:$0xff] }
 0x368   :  { %v9044_v53 = vcombine.high %v4623_v51, %v4627_v47  ;;  %v9043_v60 = vcombine.low %v4623_v51, %v4627_v47  ;;  %v9045_v62 = vcombine.low %v4624_v26, %v4628_v49  ;;  %v4671_v47 = vld [vmem:[#allocation11 + $0x500] sm:$0xff] }
 0x369   :  { %7640 = vmatpush1.bf16.msra.mxu0 %v8987_v55  ;;  %v9046_v55 = vcombine.high %v4624_v26, %v4628_v49  ;;  %v4675_v26 = vld [vmem:[#allocation11 + $0x520] sm:$0xff]  ;;  %v4672_v49 = vld [vmem:[#allocation11 + $0x508] sm:$0xff] }
 0x36a   :  { %7804 = vmatpush1.bf16.msra.mxu1 %v8989_v56  ;;  %7641 = vmatprep.subr.bf16.mxu0 %v8996_v63  ;;  %v4631_v56 = vld [vmem:[#allocation11 + $0x3c0] sm:$0xff] }
 0x36b   :  { %7805 = vmatprep.subr.bf16.mxu1 %v8998_v16  ;;  %v4635_v63 = vld [vmem:[#allocation11 + $0x3e0] sm:$0xff]  ;;  %v4632_v16 = vld [vmem:[#allocation11 + $0x3c8] sm:$0xff] }
 0x36c   :  { %v9051_v9 = vcombine.low %v4631_v56, %v4635_v63 }
 0x36d   :  { %7642 = vmatpush1.bf16.msra.mxu0 %v8995_v8  ;;  %v9052_v8 = vcombine.high %v4631_v56, %v4635_v63  ;;  %v4679_v63 = vld [vmem:[#allocation11 + $0x540] sm:$0xff] }
 0x36e   :  { %7806 = vmatpush1.bf16.msra.mxu1 %v8997_v31  ;;  %7643 = vmatprep.subr.bf16.mxu0 %v9004_v2  ;;  %v9054_v31 = vcombine.high %v4632_v16, %v4636_v39  ;;  %v4639_v2 = vld [vmem:[#allocation11 + $0x400] sm:$0xff] }
 0x36f   :  { %7807 = vmatprep.subr.bf16.mxu1 %v9006_v4  ;;  %v4643_v4 = vld [vmem:[#allocation11 + $0x420] sm:$0xff] }
 0x370   :  { %v9059_v0 = vcombine.low %v4639_v2, %v4643_v4 }
 0x371   :  { %7644 = vmatpush1.bf16.msra.mxu0 %v9003_v20  ;;  %v9443_v20 = vadd.f32 %v10034_v58, %v1250_v61  ;;  %v9068_v58 = vcombine.high %v4647_v13, %v4651_v19  ;;  %v9091_v61 = vcombine.low %v4671_v47, %v4675_v26 }
 0x372   :  { %7808 = vmatpush1.bf16.msra.mxu1 %v9005_v6  ;;  %7645 = vmatprep.subr.bf16.mxu0 %v9012_v10  ;;  %v9053_v6 = vcombine.low %v4632_v16, %v4636_v39  ;;  %v9060_v10 = vcombine.high %v4639_v2, %v4643_v4  ;;  %v4683_v16 = vld [vmem:[#allocation11 + $0x560] sm:$0xff]  ;;  %v4680_v39 = vld [vmem:[#allocation11 + $0x548] sm:$0xff] }
 0x373   :  { %7809 = vmatprep.subr.bf16.mxu1 %v9014_v11  ;;  %v9062_v11 = vcombine.high %v4640_v5, %v4644_v7  ;;  %v4687_v2 = vld [vmem:[#allocation11 + $0x580] sm:$0xff] }
 0x374   :  { %v4691_v4 = vld [vmem:[#allocation11 + $0x5a0] sm:$0xff] }
 0x375   :  { %7646 = vmatpush1.bf16.msra.mxu0 %v9011_v14  ;;  %v4648_v14 = vld [vmem:[#allocation11 + $0x448] sm:$0xff] }
 0x376   :  { %7810 = vmatpush1.bf16.msra.mxu1 %v9013_v22  ;;  %7647 = vmatprep.subr.bf16.mxu0 %v9020_v23  ;;  %v4652_v22 = vld [vmem:[#allocation11 + $0x468] sm:$0xff]  ;;  %v10059_v23 = vpack.c.bf16 %v9443_v20, %v9443_v20  ;;  %v9108_v20 = vcombine.high %v4687_v2, %v4691_v4 }
 0x377   :  { %7811 = vmatprep.subr.bf16.mxu1 %v9022_v24  ;;  %v9061_v24 = vcombine.low %v4640_v5, %v4644_v7  ;;  %v9070_v30 = vcombine.high %v4648_v14, %v4652_v22  ;;  %v4692_v5 = vld [vmem:[#allocation11 + $0x5a8] sm:$0xff]  ;;  %v9099_v7 = vcombine.low %v4679_v63, %v4683_v16 }
 0x379   :  { %7648 = vmatpush1.bf16.msra.mxu0 %v9019_v34  ;;  %v4660_v34 = vld [vmem:[#allocation11 + $0x4a8] sm:$0xff] }
 0x37a   :  { %7812 = vmatpush1.bf16.msra.mxu1 %v9021_v35  ;;  %7649 = vmatprep.subr.bf16.mxu0 %v9028_v36  ;;  %v9067_v35 = vcombine.low %v4647_v13, %v4651_v19  ;;  %v9069_v36 = vcombine.low %v4648_v14, %v4652_v22  ;;  %v9078_v33 = vcombine.high %v4656_v32, %v4660_v34  ;;  %v4700_v13 = vld [vmem:[#allocation11 + $0x5e8] sm:$0xff] }
 0x37b   :  { %7813 = vmatprep.subr.bf16.mxu1 %v9030_v38  ;;  %v9076_v38 = vcombine.high %v4655_v27, %v4659_v28  ;;  %v9107_v19 = vcombine.low %v4687_v2, %v4691_v4  ;;  %v9118_v22 = vcombine.high %v4696_v12, %v4700_v13  ;;  %v4740_v2 = vld [vmem:[#allocation11 + $0x728] sm:$0xff] }
 0x37d   :  { %7650 = vmatpush1.bf16.msra.mxu0 %v9027_v42  ;;  %v4668_v42 = vld [vmem:[#allocation11 + $0x4e8] sm:$0xff] }
 0x37e   :  { %7814 = vmatpush1.bf16.msra.mxu1 %v9029_v44  ;;  %7651 = vmatprep.subr.bf16.mxu0 %v9036_v45  ;;  %v9075_v44 = vcombine.low %v4655_v27, %v4659_v28  ;;  %v9077_v45 = vcombine.low %v4656_v32, %v4660_v34  ;;  %v9086_v51 = vcombine.high %v4664_v41, %v4668_v42  ;;  %v4704_v27 = vld [vmem:[#allocation11 + $0x608] sm:$0xff] }
 0x37f   :  { %7815 = vmatprep.subr.bf16.mxu1 %v9038_v46  ;;  %v9084_v46 = vcombine.high %v4663_v1, %v4667_v40  ;;  %v4708_v28 = vld [vmem:[#allocation11 + $0x628] sm:$0xff]  ;;  %v9117_v32 = vcombine.low %v4696_v12, %v4700_v13 }
 0x381   :  { %7652 = vmatpush1.bf16.msra.mxu0 %v9035_v50  ;;  %v4676_v50 = vld [vmem:[#allocation11 + $0x528] sm:$0xff] }
 0x382   :  { %7816 = vmatpush1.bf16.msra.mxu1 %v9037_v52  ;;  %7653 = vmatprep.subr.bf16.mxu0 %v9044_v53  ;;  %v9083_v52 = vcombine.low %v4663_v1, %v4667_v40  ;;  %v9085_v53 = vcombine.low %v4664_v41, %v4668_v42  ;;  %v9094_v56 = vcombine.high %v4672_v49, %v4676_v50  ;;  %v4716_v1 = vld [vmem:[#allocation11 + $0x668] sm:$0xff] }
 0x383   :  { %7817 = vmatprep.subr.bf16.mxu1 %v9046_v55  ;;  %v9092_v55 = vcombine.high %v4671_v47, %v4675_v26  ;;  %v9125_v41 = vcombine.low %v4704_v27, %v4708_v28  ;;  %v4724_v47 = vld [vmem:[#allocation11 + $0x6a8] sm:$0xff] }
 0x385   :  { %7654 = vmatpush1.bf16.msra.mxu0 %v9043_v60  ;;  %v4684_v60 = vld [vmem:[#allocation11 + $0x568] sm:$0xff] }
 0x386   :  { %7818 = vmatpush1.bf16.msra.mxu1 %v9045_v62  ;;  %7655 = vmatprep.subr.bf16.mxu0 %v9052_v8  ;;  %v9093_v62 = vcombine.low %v4672_v49, %v4676_v50  ;;  %v9100_v8 = vcombine.high %v4679_v63, %v4683_v16  ;;  %v4732_v63 = vld [vmem:[#allocation11 + $0x6e8] sm:$0xff] }
 0x387   :  { %7819 = vmatprep.subr.bf16.mxu1 %v9054_v31  ;;  %v9102_v31 = vcombine.high %v4680_v39, %v4684_v60 }
 0x389   :  { %7656 = vmatpush1.bf16.msra.mxu0 %v9051_v9  ;;  %v9101_v9 = vcombine.low %v4680_v39, %v4684_v60 }
 0x38a   :  { %7820 = vmatpush1.bf16.msra.mxu1 %v9053_v6  ;;  %7666 = vmatprep.subr.bf16.mxu0 %v9060_v10  ;;  %v9110_v6 = vcombine.high %v4688_v43, %v4692_v5  ;;  %v4695_v10 = vld [vmem:[#allocation11 + $0x5c0] sm:$0xff] }
 0x38b   :  { %7830 = vmatprep.subr.bf16.mxu1 %v9062_v11  ;;  %v4699_v11 = vld [vmem:[#allocation11 + $0x5e0] sm:$0xff] }
 0x38c   :  { %7658 = vmatmul.mubr.bf16.vlgmr.msra.gmra.mrb[16].mxu0 %v10059_v23  ;;  %v9116_v14 = vcombine.high %v4695_v10, %v4699_v11 }
 0x38d   :  { %7822 = vmatmul.mubr.bf16.vlgmr.msra.gmra.mrb[16].mxu1 %v10059_v23  ;;  %7667 = vmatpush1.bf16.msra.mxu0 %v9059_v0  ;;  %v9109_v0 = vcombine.low %v4688_v43, %v4692_v5 }
 0x38e   :  { %7698 = vmatprep.mubr.bf16.mxu0 %v10061_v57  ;;  %7831 = vmatpush1.bf16.msra.mxu1 %v9061_v24  ;;  %v4703_v24 = vld [vmem:[#allocation11 + $0x600] sm:$0xff] }
 0x38f   :  { %7862 = vmatprep.mubr.bf16.mxu1 %v10061_v57  ;;  %7668 = vmatprep.subr.bf16.mxu0 %v9068_v58  ;;  %v4707_v58 = vld [vmem:[#allocation11 + $0x620] sm:$0xff] }
 0x390   :  { %7832 = vmatprep.subr.bf16.mxu1 %v9070_v30  ;;  %v9115_v30 = vcombine.low %v4695_v10, %v4699_v11  ;;  %v9124_v34 = vcombine.high %v4703_v24, %v4707_v58  ;;  %v9123_v40 = vcombine.low %v4703_v24, %v4707_v58  ;;  %v4748_v10 = vld [vmem:[#allocation11 + $0x768] sm:$0xff] }
 0x391   :  { %7669 = vmatpush1.bf16.msra.mxu0 %v9067_v35  ;;  %v9126_v35 = vcombine.high %v4704_v27, %v4708_v28  ;;  %v4756_v24 = vld [vmem:[#allocation11 + $0x7a8] sm:$0xff] }
 0x392   :  { %7833 = vmatpush1.bf16.msra.mxu1 %v9069_v36  ;;  %7670 = vmatprep.subr.bf16.mxu0 %v9076_v38  ;;  %v4711_v36 = vld [vmem:[#allocation11 + $0x640] sm:$0xff] }
 0x393   :  { %7834 = vmatprep.subr.bf16.mxu1 %v9078_v33  ;;  %v4715_v38 = vld [vmem:[#allocation11 + $0x660] sm:$0xff]  ;;  %v4712_v33 = vld [vmem:[#allocation11 + $0x648] sm:$0xff] }
 0x394   :  { %v9132_v42 = vcombine.high %v4711_v36, %v4715_v38  ;;  %v9131_v26 = vcombine.low %v4711_v36, %v4715_v38  ;;  %v9133_v49 = vcombine.low %v4712_v33, %v4716_v1  ;;  %v4764_v36 = vld [vmem:[#allocation11 + $0x7e8] sm:$0xff] }
 0x395   :  { %7671 = vmatpush1.bf16.msra.mxu0 %v9075_v44  ;;  %v9134_v44 = vcombine.high %v4712_v33, %v4716_v1  ;;  %v1258_v33 = vrot.slane %v10042_v25, %v9972_v37 }
 0x396   :  { %7835 = vmatpush1.bf16.msra.mxu1 %v9077_v45  ;;  %7672 = vmatprep.subr.bf16.mxu0 %v9084_v46  ;;  %v4719_v45 = vld [vmem:[#allocation11 + $0x680] sm:$0xff] }
 0x397   :  { %7836 = vmatprep.subr.bf16.mxu1 %v9086_v51  ;;  %v4723_v46 = vld [vmem:[#allocation11 + $0x6a0] sm:$0xff]  ;;  %v4720_v51 = vld [vmem:[#allocation11 + $0x688] sm:$0xff] }
 0x398   :  { %v9140_v50 = vcombine.high %v4719_v45, %v4723_v46  ;;  %v9139_v16 = vcombine.low %v4719_v45, %v4723_v46  ;;  %v9141_v39 = vcombine.low %v4720_v51, %v4724_v47  ;;  %v4768_v45 = vld [vmem:[#allocation11 + $0x808] sm:$0xff] }
 0x399   :  { %7673 = vmatpush1.bf16.msra.mxu0 %v9083_v52  ;;  %v9142_v52 = vcombine.high %v4720_v51, %v4724_v47  ;;  %v4772_v46 = vld [vmem:[#allocation11 + $0x828] sm:$0xff]  ;;  %v9445_v47 = vadd.f32 %v10036_v59, %v1258_v33 }
 0x39a   :  { %7837 = vmatpush1.bf16.msra.mxu1 %v9085_v53  ;;  %7674 = vmatprep.subr.bf16.mxu0 %v9092_v55  ;;  %v4727_v53 = vld [vmem:[#allocation11 + $0x6c0] sm:$0xff]  ;;  %v9190_v25 = vcombine.high %v4768_v45, %v4772_v46 }
 0x39b   :  { %7838 = vmatprep.subr.bf16.mxu1 %v9094_v56  ;;  %v4731_v55 = vld [vmem:[#allocation11 + $0x6e0] sm:$0xff]  ;;  %v4728_v56 = vld [vmem:[#allocation11 + $0x6c8] sm:$0xff] }
 0x39c   :  { %v9148_v60 = vcombine.high %v4727_v53, %v4731_v55  ;;  %v9147_v4 = vcombine.low %v4727_v53, %v4731_v55  ;;  %v9149_v43 = vcombine.low %v4728_v56, %v4732_v63  ;;  %v4776_v53 = vld [vmem:[#allocation11 + $0x848] sm:$0xff] }
 0x39d   :  { %7675 = vmatpush1.bf16.msra.mxu0 %v9091_v61  ;;  %v9150_v61 = vcombine.high %v4728_v56, %v4732_v63  ;;  %v4780_v55 = vld [vmem:[#allocation11 + $0x868] sm:$0xff]  ;;  %v10070_v63 = vpack.c.bf16 %v9445_v47, %v9445_v47  ;;  %v4823_v47 = vld [vmem:[#allocation11 + $0x9c0] sm:$0xff] }
 0x39e   :  { %7839 = vmatpush1.bf16.msra.mxu1 %v9093_v62  ;;  %7676 = vmatprep.subr.bf16.mxu0 %v9100_v8  ;;  %v4735_v62 = vld [vmem:[#allocation11 + $0x700] sm:$0xff]  ;;  %v9198_v59 = vcombine.high %v4776_v53, %v4780_v55 }
 0x39f   :  { %7840 = vmatprep.subr.bf16.mxu1 %v9102_v31  ;;  %v4739_v8 = vld [vmem:[#allocation11 + $0x720] sm:$0xff]  ;;  %v4736_v31 = vld [vmem:[#allocation11 + $0x708] sm:$0xff] }
 0x3a0   :  { %v9156_v5 = vcombine.high %v4735_v62, %v4739_v8  ;;  %v9155_v11 = vcombine.low %v4735_v62, %v4739_v8  ;;  %v9157_v12 = vcombine.low %v4736_v31, %v4740_v2  ;;  %v4784_v62 = vld [vmem:[#allocation11 + $0x888] sm:$0xff] }
 0x3a1   :  { %7677 = vmatpush1.bf16.msra.mxu0 %v9099_v7  ;;  %v9158_v7 = vcombine.high %v4736_v31, %v4740_v2  ;;  %v4788_v8 = vld [vmem:[#allocation11 + $0x8a8] sm:$0xff]  ;;  %v9197_v2 = vcombine.low %v4776_v53, %v4780_v55 }
 0x3a2   :  { %7841 = vmatpush1.bf16.msra.mxu1 %v9101_v9  ;;  %7678 = vmatprep.subr.bf16.mxu0 %v9108_v20  ;;  %v4743_v9 = vld [vmem:[#allocation11 + $0x740] sm:$0xff] }
 0x3a3   :  { %7842 = vmatprep.subr.bf16.mxu1 %v9110_v6  ;;  %v4747_v20 = vld [vmem:[#allocation11 + $0x760] sm:$0xff]  ;;  %v4744_v6 = vld [vmem:[#allocation11 + $0x748] sm:$0xff] }
 0x3a4   :  { %v9164_v13 = vcombine.high %v4743_v9, %v4747_v20  ;;  %v9163_v58 = vcombine.low %v4743_v9, %v4747_v20  ;;  %v9165_v27 = vcombine.low %v4744_v6, %v4748_v10  ;;  %v4792_v9 = vld [vmem:[#allocation11 + $0x8c8] sm:$0xff] }
 0x3a5   :  { %7679 = vmatpush1.bf16.msra.mxu0 %v9107_v19  ;;  %v9166_v19 = vcombine.high %v4744_v6, %v4748_v10  ;;  %v4796_v20 = vld [vmem:[#allocation11 + $0x8e8] sm:$0xff]  ;;  %v9205_v10 = vcombine.low %v4784_v62, %v4788_v8 }
 0x3a6   :  { %7843 = vmatpush1.bf16.msra.mxu1 %v9109_v0  ;;  %7680 = vmatprep.subr.bf16.mxu0 %v9116_v14  ;;  %v4751_v0 = vld [vmem:[#allocation11 + $0x780] sm:$0xff] }
 0x3a7   :  { %7844 = vmatprep.subr.bf16.mxu1 %v9118_v22  ;;  %v4755_v14 = vld [vmem:[#allocation11 + $0x7a0] sm:$0xff]  ;;  %v4752_v22 = vld [vmem:[#allocation11 + $0x788] sm:$0xff] }
 0x3a8   :  { %v9172_v28 = vcombine.high %v4751_v0, %v4755_v14  ;;  %v9171_v38 = vcombine.low %v4751_v0, %v4755_v14  ;;  %v9173_v1 = vcombine.low %v4752_v22, %v4756_v24  ;;  %v4800_v0 = vld [vmem:[#allocation11 + $0x908] sm:$0xff] }
 0x3a9   :  { %7681 = vmatpush1.bf16.msra.mxu0 %v9115_v30  ;;  %v9174_v30 = vcombine.high %v4752_v22, %v4756_v24  ;;  %v4804_v14 = vld [vmem:[#allocation11 + $0x928] sm:$0xff]  ;;  %v9213_v24 = vcombine.low %v4792_v9, %v4796_v20 }
 0x3aa   :  { %7845 = vmatpush1.bf16.msra.mxu1 %v9117_v32  ;;  %7682 = vmatprep.subr.bf16.mxu0 %v9124_v34  ;;  %v4759_v32 = vld [vmem:[#allocation11 + $0x7c0] sm:$0xff] }
 0x3ab   :  { %7846 = vmatprep.subr.bf16.mxu1 %v9126_v35  ;;  %v4763_v34 = vld [vmem:[#allocation11 + $0x7e0] sm:$0xff]  ;;  %v4760_v35 = vld [vmem:[#allocation11 + $0x7c8] sm:$0xff] }
 0x3ac   :  { %v9179_v51 = vcombine.low %v4759_v32, %v4763_v34 }
 0x3ad   :  { %7683 = vmatpush1.bf16.msra.mxu0 %v9123_v40  ;;  %v9180_v40 = vcombine.high %v4759_v32, %v4763_v34  ;;  %v4808_v32 = vld [vmem:[#allocation11 + $0x948] sm:$0xff] }
 0x3ae   :  { %7847 = vmatpush1.bf16.msra.mxu1 %v9125_v41  ;;  %7684 = vmatprep.subr.bf16.mxu0 %v9132_v42  ;;  %v9182_v41 = vcombine.high %v4760_v35, %v4764_v36  ;;  %v4767_v42 = vld [vmem:[#allocation11 + $0x800] sm:$0xff]  ;;  %v4812_v34 = vld [vmem:[#allocation11 + $0x968] sm:$0xff] }
 0x3af   :  { %7848 = vmatprep.subr.bf16.mxu1 %v9134_v44  ;;  %v4771_v44 = vld [vmem:[#allocation11 + $0x820] sm:$0xff]  ;;  %v9230_v33 = vcombine.high %v4808_v32, %v4812_v34 }
 0x3b0   :  { %v9187_v56 = vcombine.low %v4767_v42, %v4771_v44 }
 0x3b1   :  { %7685 = vmatpush1.bf16.msra.mxu0 %v9131_v26  ;;  %v9181_v26 = vcombine.low %v4760_v35, %v4764_v36  ;;  %v9221_v36 = vcombine.low %v4800_v0, %v4804_v14 }
 0x3b2   :  { %7849 = vmatpush1.bf16.msra.mxu1 %v9133_v49  ;;  %7686 = vmatprep.subr.bf16.mxu0 %v9140_v50  ;;  %v9188_v49 = vcombine.high %v4767_v42, %v4771_v44  ;;  %v4775_v50 = vld [vmem:[#allocation11 + $0x840] sm:$0xff]  ;;  %v4820_v42 = vld [vmem:[#allocation11 + $0x9a8] sm:$0xff] }
 0x3b3   :  { %7850 = vmatprep.subr.bf16.mxu1 %v9142_v52  ;;  %v4779_v52 = vld [vmem:[#allocation11 + $0x860] sm:$0xff] }
 0x3b4   :  { %v9195_v31 = vcombine.low %v4775_v50, %v4779_v52 }
 0x3b5   :  { %7687 = vmatpush1.bf16.msra.mxu0 %v9139_v16  ;;  %v9189_v16 = vcombine.low %v4768_v45, %v4772_v46  ;;  %v9229_v45 = vcombine.low %v4808_v32, %v4812_v34 }
 0x3b6   :  { %7851 = vmatpush1.bf16.msra.mxu1 %v9141_v39  ;;  %7688 = vmatprep.subr.bf16.mxu0 %v9148_v60  ;;  %v9196_v39 = vcombine.high %v4775_v50, %v4779_v52  ;;  %v4783_v60 = vld [vmem:[#allocation11 + $0x880] sm:$0xff] }
 0x3b7   :  { %7852 = vmatprep.subr.bf16.mxu1 %v9150_v61  ;;  %v4787_v61 = vld [vmem:[#allocation11 + $0x8a0] sm:$0xff] }
 0x3b8   :  { %v9203_v6 = vcombine.low %v4783_v60, %v4787_v61 }
 0x3b9   :  { %7689 = vmatpush1.bf16.msra.mxu0 %v9147_v4  ;;  %v9204_v4 = vcombine.high %v4783_v60, %v4787_v61 }
 0x3ba   :  { %7853 = vmatpush1.bf16.msra.mxu1 %v9149_v43  ;;  %7690 = vmatprep.subr.bf16.mxu0 %v9156_v5  ;;  %v9206_v43 = vcombine.high %v4784_v62, %v4788_v8  ;;  %v4791_v5 = vld [vmem:[#allocation11 + $0x8c0] sm:$0xff] }
 0x3bb   :  { %7854 = vmatprep.subr.bf16.mxu1 %v9158_v7  ;;  %v4795_v7 = vld [vmem:[#allocation11 + $0x8e0] sm:$0xff] }
 0x3bc   :  { %v9211_v22 = vcombine.low %v4791_v5, %v4795_v7 }
 0x3bd   :  { %7691 = vmatpush1.bf16.msra.mxu0 %v9155_v11  ;;  %v9212_v11 = vcombine.high %v4791_v5, %v4795_v7 }
 0x3be   :  { %7855 = vmatpush1.bf16.msra.mxu1 %v9157_v12  ;;  %7692 = vmatprep.subr.bf16.mxu0 %v9164_v13  ;;  %v9214_v12 = vcombine.high %v4792_v9, %v4796_v20  ;;  %v4799_v13 = vld [vmem:[#allocation11 + $0x900] sm:$0xff] }
 0x3bf   :  { %7856 = vmatprep.subr.bf16.mxu1 %v9166_v19  ;;  %v4803_v19 = vld [vmem:[#allocation11 + $0x920] sm:$0xff] }
 0x3c0   :  { %v9219_v35 = vcombine.low %v4799_v13, %v4803_v19 }
 0x3c1   :  { %7693 = vmatpush1.bf16.msra.mxu0 %v9163_v58  ;;  %v9220_v58 = vcombine.high %v4799_v13, %v4803_v19 }
 0x3c2   :  { %7857 = vmatpush1.bf16.msra.mxu1 %v9165_v27  ;;  %7694 = vmatprep.subr.bf16.mxu0 %v9172_v28  ;;  %v9222_v27 = vcombine.high %v4800_v0, %v4804_v14  ;;  %v4807_v28 = vld [vmem:[#allocation11 + $0x940] sm:$0xff] }
 0x3c3   :  { %7858 = vmatprep.subr.bf16.mxu1 %v9174_v30  ;;  %v4811_v30 = vld [vmem:[#allocation11 + $0x960] sm:$0xff] }
 0x3c4   :  { %v9227_v44 = vcombine.low %v4807_v28, %v4811_v30 }
 0x3c5   :  { %7695 = vmatpush1.bf16.msra.mxu0 %v9171_v38  ;;  %v9228_v38 = vcombine.high %v4807_v28, %v4811_v30 }
 0x3c6   :  { %7859 = vmatpush1.bf16.msra.mxu1 %v9173_v1  ;;  %7696 = vmatprep.subr.bf16.mxu0 %v9180_v40  ;;  %v4815_v1 = vld [vmem:[#allocation11 + $0x980] sm:$0xff] }
 0x3c7   :  { %7860 = vmatprep.subr.bf16.mxu1 %v9182_v41  ;;  %v4819_v40 = vld [vmem:[#allocation11 + $0x9a0] sm:$0xff]  ;;  %v4816_v41 = vld [vmem:[#allocation11 + $0x988] sm:$0xff] }
 0x3c8   :  { %v9236_v46 = vcombine.high %v4815_v1, %v4819_v40  ;;  %v9235_v50 = vcombine.low %v4815_v1, %v4819_v40  ;;  %v9237_v52 = vcombine.low %v4816_v41, %v4820_v42 }
 0x3c9   :  { %7697 = vmatpush1.bf16.msra.mxu0 %v9179_v51  ;;  %v9238_v51 = vcombine.high %v4816_v41, %v4820_v42 }
 0x3ca   :  { %7861 = vmatpush1.bf16.msra.mxu1 %v9181_v26  ;;  %7707 = vmatprep.subr.bf16.mxu0 %v9188_v49  ;;  %v4827_v26 = vld [vmem:[#allocation11 + $0x9e0] sm:$0xff]  ;;  %v4824_v49 = vld [vmem:[#allocation11 + $0x9c8] sm:$0xff] }
 0x3cb   :  { %7871 = vmatprep.subr.bf16.mxu1 %v9190_v25  ;;  %v4828_v25 = vld [vmem:[#allocation11 + $0x9e8] sm:$0xff]  ;;  %v9244_v53 = vcombine.high %v4823_v47, %v4827_v26  ;;  %v9243_v60 = vcombine.low %v4823_v47, %v4827_v26 }
 0x3cc   :  { %7699 = vmatmul.mubr.bf16.vlgmr.msra.gmra.mrb[16].mxu0 %v10070_v63  ;;  %v9246_v55 = vcombine.high %v4824_v49, %v4828_v25  ;;  %v9245_v61 = vcombine.low %v4824_v49, %v4828_v25 }
 0x3cd   :  { %7863 = vmatmul.mubr.bf16.vlgmr.msra.gmra.mrb[16].mxu1 %v10070_v63  ;;  %7708 = vmatpush1.bf16.msra.mxu0 %v9187_v56  ;;  %v4831_v56 = vld [vmem:[#allocation11 + $0xa00] sm:$0xff] }
 0x3ce   :  { %7872 = vmatpush1.bf16.msra.mxu1 %v9189_v16  ;;  %7709 = vmatprep.subr.bf16.mxu0 %v9196_v39  ;;  %v4835_v16 = vld [vmem:[#allocation11 + $0xa20] sm:$0xff]  ;;  %v4832_v39 = vld [vmem:[#allocation11 + $0xa08] sm:$0xff] }
 0x3cf   :  { %7873 = vmatprep.subr.bf16.mxu1 %v9198_v59  ;;  %v4836_v59 = vld [vmem:[#allocation11 + $0xa28] sm:$0xff]  ;;  %v9252_v62 = vcombine.high %v4831_v56, %v4835_v16  ;;  %v9251_v5 = vcombine.low %v4831_v56, %v4835_v16 }
 0x3d0   :  { %v9254_v8 = vcombine.high %v4832_v39, %v4836_v59  ;;  %v9253_v7 = vcombine.low %v4832_v39, %v4836_v59 }
 0x3d1   :  { %7710 = vmatpush1.bf16.msra.mxu0 %v9195_v31  ;;  %v4839_v31 = vld [vmem:[#allocation11 + $0xa40] sm:$0xff] }
 0x3d2   :  { %7874 = vmatpush1.bf16.msra.mxu1 %v9197_v2  ;;  %7711 = vmatprep.subr.bf16.mxu0 %v9204_v4  ;;  %v4843_v2 = vld [vmem:[#allocation11 + $0xa60] sm:$0xff]  ;;  %v4840_v4 = vld [vmem:[#allocation11 + $0xa48] sm:$0xff] }
 0x3d3   :  { %7875 = vmatprep.subr.bf16.mxu1 %v9206_v43  ;;  %v4844_v43 = vld [vmem:[#allocation11 + $0xa68] sm:$0xff]  ;;  %v9260_v9 = vcombine.high %v4839_v31, %v4843_v2  ;;  %v9259_v13 = vcombine.low %v4839_v31, %v4843_v2 }
 0x3d4   :  { %v9262_v20 = vcombine.high %v4840_v4, %v4844_v43  ;;  %v9261_v19 = vcombine.low %v4840_v4, %v4844_v43 }
 0x3d5   :  { %7712 = vmatpush1.bf16.msra.mxu0 %v9203_v6  ;;  %v4847_v6 = vld [vmem:[#allocation11 + $0xa80] sm:$0xff] }
 0x3d6   :  { %7876 = vmatpush1.bf16.msra.mxu1 %v9205_v10  ;;  %7713 = vmatprep.subr.bf16.mxu0 %v9212_v11  ;;  %v4851_v10 = vld [vmem:[#allocation11 + $0xaa0] sm:$0xff]  ;;  %v4848_v11 = vld [vmem:[#allocation11 + $0xa88] sm:$0xff] }
 0x3d7   :  { %7877 = vmatprep.subr.bf16.mxu1 %v9214_v12  ;;  %v4852_v12 = vld [vmem:[#allocation11 + $0xaa8] sm:$0xff]  ;;  %v9268_v0 = vcombine.high %v4847_v6, %v4851_v10  ;;  %v9267_v28 = vcombine.low %v4847_v6, %v4851_v10 }
 0x3d8   :  { %v9270_v14 = vcombine.high %v4848_v11, %v4852_v12  ;;  %v9269_v30 = vcombine.low %v4848_v11, %v4852_v12 }
 0x3d9   :  { %7714 = vmatpush1.bf16.msra.mxu0 %v9211_v22  ;;  %v4855_v22 = vld [vmem:[#allocation11 + $0xac0] sm:$0xff] }
 0x3da   :  { %7878 = vmatpush1.bf16.msra.mxu1 %v9213_v24  ;;  %7715 = vmatprep.subr.bf16.mxu0 %v9220_v58  ;;  %v4859_v24 = vld [vmem:[#allocation11 + $0xae0] sm:$0xff]  ;;  %v4856_v58 = vld [vmem:[#allocation11 + $0xac8] sm:$0xff] }
 0x3db   :  { %7879 = vmatprep.subr.bf16.mxu1 %v9222_v27  ;;  %v4860_v27 = vld [vmem:[#allocation11 + $0xae8] sm:$0xff]  ;;  %v9276_v32 = vcombine.high %v4855_v22, %v4859_v24  ;;  %v9275_v1 = vcombine.low %v4855_v22, %v4859_v24 }
 0x3dc   :  { %v9278_v34 = vcombine.high %v4856_v58, %v4860_v27  ;;  %v9277_v40 = vcombine.low %v4856_v58, %v4860_v27 }
 0x3dd   :  { %7716 = vmatpush1.bf16.msra.mxu0 %v9219_v35  ;;  %v4863_v35 = vld [vmem:[#allocation11 + $0xb00] sm:$0xff] }
 0x3de   :  { %7880 = vmatpush1.bf16.msra.mxu1 %v9221_v36  ;;  %7717 = vmatprep.subr.bf16.mxu0 %v9228_v38  ;;  %v4867_v36 = vld [vmem:[#allocation11 + $0xb20] sm:$0xff]  ;;  %v4864_v38 = vld [vmem:[#allocation11 + $0xb08] sm:$0xff] }
 0x3df   :  { %7881 = vmatprep.subr.bf16.mxu1 %v9230_v33  ;;  %v4868_v33 = vld [vmem:[#allocation11 + $0xb28] sm:$0xff]  ;;  %v9284_v41 = vcombine.high %v4863_v35, %v4867_v36  ;;  %v9283_v47 = vcombine.low %v4863_v35, %v4867_v36 }
 0x3e0   :  { %v9286_v42 = vcombine.high %v4864_v38, %v4868_v33  ;;  %v9285_v26 = vcombine.low %v4864_v38, %v4868_v33  ;;  %v4907_v33 = vld [vmem:[#allocation11 + $0xc60] sm:$0xff] }
 0x3e1   :  { %7718 = vmatpush1.bf16.msra.mxu0 %v9227_v44  ;;  %v4871_v44 = vld [vmem:[#allocation11 + $0xb40] sm:$0xff] }
 0x3e2   :  { %7882 = vmatpush1.bf16.msra.mxu1 %v9229_v45  ;;  %7719 = vmatprep.subr.bf16.mxu0 %v9236_v46  ;;  %v4875_v45 = vld [vmem:[#allocation11 + $0xb60] sm:$0xff]  ;;  %v4872_v46 = vld [vmem:[#allocation11 + $0xb48] sm:$0xff] }
 0x3e3   :  { %7883 = vmatprep.subr.bf16.mxu1 %v9238_v51  ;;  %v4876_v51 = vld [vmem:[#allocation11 + $0xb68] sm:$0xff]  ;;  %v9292_v49 = vcombine.high %v4871_v44, %v4875_v45  ;;  %v9291_v56 = vcombine.low %v4871_v44, %v4875_v45 }
 0x3e4   :  { %v9294_v25 = vcombine.high %v4872_v46, %v4876_v51  ;;  %v9293_v16 = vcombine.low %v4872_v46, %v4876_v51  ;;  %v4911_v51 = vld [vmem:[#allocation11 + $0xc80] sm:$0xff] }
 0x3e5   :  { %7720 = vmatpush1.bf16.msra.mxu0 %v9235_v50  ;;  %v4879_v50 = vld [vmem:[#allocation11 + $0xb80] sm:$0xff] }
 0x3e6   :  { %7884 = vmatpush1.bf16.msra.mxu1 %v9237_v52  ;;  %7721 = vmatprep.subr.bf16.mxu0 %v9244_v53  ;;  %v4883_v52 = vld [vmem:[#allocation11 + $0xba0] sm:$0xff]  ;;  %v4880_v53 = vld [vmem:[#allocation11 + $0xb88] sm:$0xff] }
 0x3e7   :  { %7885 = vmatprep.subr.bf16.mxu1 %v9246_v55  ;;  %v4884_v55 = vld [vmem:[#allocation11 + $0xba8] sm:$0xff]  ;;  %v9300_v39 = vcombine.high %v4879_v50, %v4883_v52  ;;  %v9299_v31 = vcombine.low %v4879_v50, %v4883_v52 }
 0x3e8   :  { %v9302_v59 = vcombine.high %v4880_v53, %v4884_v55  ;;  %v9301_v2 = vcombine.low %v4880_v53, %v4884_v55  ;;  %v4916_v50 = vld [vmem:[#allocation11 + $0xca8] sm:$0xff] }
 0x3e9   :  { %7722 = vmatpush1.bf16.msra.mxu0 %v9243_v60  ;;  %v4887_v60 = vld [vmem:[#allocation11 + $0xbc0] sm:$0xff] }
 0x3ea   :  { %7886 = vmatpush1.bf16.msra.mxu1 %v9245_v61  ;;  %7723 = vmatprep.subr.bf16.mxu0 %v9252_v62  ;;  %v4891_v61 = vld [vmem:[#allocation11 + $0xbe0] sm:$0xff]  ;;  %v4888_v62 = vld [vmem:[#allocation11 + $0xbc8] sm:$0xff] }
 0x3eb   :  { %7887 = vmatprep.subr.bf16.mxu1 %v9254_v8  ;;  %v4892_v8 = vld [vmem:[#allocation11 + $0xbe8] sm:$0xff]  ;;  %v9308_v4 = vcombine.high %v4887_v60, %v4891_v61  ;;  %v9307_v6 = vcombine.low %v4887_v60, %v4891_v61 }
 0x3ec   :  { %v9310_v43 = vcombine.high %v4888_v62, %v4892_v8  ;;  %v9309_v10 = vcombine.low %v4888_v62, %v4892_v8  ;;  %v4920_v60 = vld [vmem:[#allocation11 + $0xcc8] sm:$0xff] }
 0x3ed   :  { %7724 = vmatpush1.bf16.msra.mxu0 %v9251_v5  ;;  %v4895_v5 = vld [vmem:[#allocation11 + $0xc00] sm:$0xff]  ;;  %v4924_v61 = vld [vmem:[#allocation11 + $0xce8] sm:$0xff] }
 0x3ee   :  { %7888 = vmatpush1.bf16.msra.mxu1 %v9253_v7  ;;  %7725 = vmatprep.subr.bf16.mxu0 %v9260_v9  ;;  %v4899_v7 = vld [vmem:[#allocation11 + $0xc20] sm:$0xff]  ;;  %v4896_v9 = vld [vmem:[#allocation11 + $0xc08] sm:$0xff] }
 0x3ef   :  { %7889 = vmatprep.subr.bf16.mxu1 %v9262_v20  ;;  %v4900_v20 = vld [vmem:[#allocation11 + $0xc28] sm:$0xff]  ;;  %v9316_v11 = vcombine.high %v4895_v5, %v4899_v7  ;;  %v9315_v44 = vcombine.low %v4895_v5, %v4899_v7 }
 0x3f0   :  { %v9318_v12 = vcombine.high %v4896_v9, %v4900_v20  ;;  %v9317_v45 = vcombine.low %v4896_v9, %v4900_v20  ;;  %v4928_v5 = vld [vmem:[#allocation11 + $0xd08] sm:$0xff]  ;;  %v9341_v20 = vcombine.low %v4920_v60, %v4924_v61 }
 0x3f1   :  { %7726 = vmatpush1.bf16.msra.mxu0 %v9259_v13  ;;  %v10074_v13 = vld [vmem:[#allocation10] sm:$0xff]  ;;  %v4932_v7 = vld [vmem:[#allocation11 + $0xd28] sm:$0xff] }
 0x3f2   :  { %7890 = vmatpush1.bf16.msra.mxu1 %v9261_v19  ;;  %7727 = vmatprep.subr.bf16.mxu0 %v9268_v0  ;;  %v1266_v19 = vrot.slane %v10074_v13, %v9992_v18  ;;  %v1270_v0 = vrot.slane %v10074_v13, %v9975_v48 }
 0x3f3   :  { %7891 = vmatprep.subr.bf16.mxu1 %v9270_v14  ;;  %v1278_v14 = vrot.slane %v10074_v13, %v9995_v29 }
 0x3f5   :  { %7728 = vmatpush1.bf16.msra.mxu0 %v9267_v28 }
 0x3f6   :  { %7892 = vmatpush1.bf16.msra.mxu1 %v9269_v30  ;;  %7729 = vmatprep.subr.bf16.mxu0 %v9276_v32 }
 0x3f7   :  { %7893 = vmatprep.subr.bf16.mxu1 %v9278_v34  ;;  %v4903_v34 = vld [vmem:[#allocation11 + $0xc40] sm:$0xff] }
 0x3f8   :  { %v9323_v53 = vcombine.low %v4903_v34, %v4907_v33 }
 0x3f9   :  { %7730 = vmatpush1.bf16.msra.mxu0 %v9275_v1  ;;  %v4904_v1 = vld [vmem:[#allocation11 + $0xc48] sm:$0xff] }
 0x3fa   :  { %7894 = vmatpush1.bf16.msra.mxu1 %v9277_v40  ;;  %7731 = vmatprep.subr.bf16.mxu0 %v9284_v41  ;;  %v4908_v40 = vld [vmem:[#allocation11 + $0xc68] sm:$0xff] }
 0x3fb   :  { %7895 = vmatprep.subr.bf16.mxu1 %v9286_v42  ;;  %v9325_v55 = vcombine.low %v4904_v1, %v4908_v40 }
 0x3fd   :  { %7732 = vmatpush1.bf16.msra.mxu0 %v9283_v47  ;;  %v9324_v47 = vcombine.high %v4903_v34, %v4907_v33  ;;  %v4948_v34 = vld [vmem:[#allocation11 + $0xda8] sm:$0xff] }
 0x3fe   :  { %7896 = vmatpush1.bf16.msra.mxu1 %v9285_v26  ;;  %7733 = vmatprep.subr.bf16.mxu0 %v9292_v49  ;;  %v9326_v26 = vcombine.high %v4904_v1, %v4908_v40  ;;  %v4915_v49 = vld [vmem:[#allocation11 + $0xca0] sm:$0xff] }
 0x3ff   :  { %7897 = vmatprep.subr.bf16.mxu1 %v9294_v25  ;;  %v4912_v25 = vld [vmem:[#allocation11 + $0xc88] sm:$0xff]  ;;  %v9331_v62 = vcombine.low %v4911_v51, %v4915_v49  ;;  %v4951_v1 = vld [vmem:[#allocation11 + $0xdc0] sm:$0xff] }
 0x400   :  { %v9333_v8 = vcombine.low %v4912_v25, %v4916_v50  ;;  %v4955_v40 = vld [vmem:[#allocation11 + $0xde0] sm:$0xff] }
 0x401   :  { %7734 = vmatpush1.bf16.msra.mxu0 %v9291_v56  ;;  %v9332_v56 = vcombine.high %v4911_v51, %v4915_v49  ;;  %v4959_v49 = vld [vmem:[#allocation11 + $0xe00] sm:$0xff] }
 0x402   :  { %7898 = vmatpush1.bf16.msra.mxu1 %v9293_v16  ;;  %7735 = vmatprep.subr.bf16.mxu0 %v9300_v39  ;;  %v9334_v16 = vcombine.high %v4912_v25, %v4916_v50  ;;  %v4919_v39 = vld [vmem:[#allocation11 + $0xcc0] sm:$0xff]  ;;  %v4960_v50 = vld [vmem:[#allocation11 + $0xe08] sm:$0xff] }
 0x403   :  { %7899 = vmatprep.subr.bf16.mxu1 %v9302_v59  ;;  %v4923_v59 = vld [vmem:[#allocation11 + $0xce0] sm:$0xff] }
 0x404   :  { %v9339_v9 = vcombine.low %v4919_v39, %v4923_v59  ;;  %v4963_v25 = vld [vmem:[#allocation11 + $0xe20] sm:$0xff] }
 0x405   :  { %7736 = vmatpush1.bf16.msra.mxu0 %v9299_v31  ;;  %v9340_v31 = vcombine.high %v4919_v39, %v4923_v59  ;;  %v4967_v59 = vld [vmem:[#allocation11 + $0xe40] sm:$0xff] }
 0x406   :  { %7900 = vmatpush1.bf16.msra.mxu1 %v9301_v2  ;;  %7737 = vmatprep.subr.bf16.mxu0 %v9308_v4  ;;  %v9342_v2 = vcombine.high %v4920_v60, %v4924_v61  ;;  %v4927_v4 = vld [vmem:[#allocation11 + $0xd00] sm:$0xff]  ;;  %v4968_v61 = vld [vmem:[#allocation11 + $0xe48] sm:$0xff] }
 0x407   :  { %7901 = vmatprep.subr.bf16.mxu1 %v9310_v43  ;;  %v4931_v43 = vld [vmem:[#allocation11 + $0xd20] sm:$0xff] }
 0x408   :  { %v4971_v60 = vld [vmem:[#allocation11 + $0xe60] sm:$0xff] }
 0x409   :  { %7738 = vmatpush1.bf16.msra.mxu0 %v9307_v6  ;;  %v9348_v6 = vcombine.high %v4927_v4, %v4931_v43 }
 0x40a   :  { %7902 = vmatpush1.bf16.msra.mxu1 %v9309_v10  ;;  %7748 = vmatprep.subr.bf16.mxu0 %v9316_v11  ;;  %v9350_v10 = vcombine.high %v4928_v5, %v4932_v7  ;;  %v4935_v11 = vld [vmem:[#allocation11 + $0xd40] sm:$0xff] }
 0x40b   :  { %7912 = vmatprep.subr.bf16.mxu1 %v9318_v12  ;;  %v4939_v12 = vld [vmem:[#allocation11 + $0xd60] sm:$0xff] }
 0x41f   :  { %v4332_v22 = vpop.f32.mrb[12].mxu0 }
 0x420   :  { %v9447_v24 = vadd.f32 %v4332_v22, %v1266_v19  ;;  %v10082_v58 = vpop.f32.mrb[12].mxu1  ;;  %v4334_v27 = vpop.f32.mrb[13].mxu0  ;;  %v4936_v19 = vld [vmem:[#allocation11 + $0xd48] sm:$0xff]  ;;  %v9349_v22 = vcombine.low %v4928_v5, %v4932_v7  ;;  %v4979_v5 = vld [vmem:[#allocation11 + $0xea0] sm:$0xff] }
 0x421   :  { %v9448_v28 = vadd.f32 %v4334_v27, %v1270_v0  ;;  %v4498_v30 = vpop.f32.mrb[13].mxu1  ;;  %v4336_v32 = vpop.f32.mrb[14].mxu0  ;;  %v4940_v0 = vld [vmem:[#allocation11 + $0xd68] sm:$0xff] }
 0x422   :  { %v9450_v35 = vadd.f32 %v4498_v30, %v1278_v14  ;;  %v4500_v36 = vpop.f32.mrb[14].mxu1  ;;  %v4337_v38 = vpop.f32.mrb[15].mxu0  ;;  %v10086_v46 = vpack.c.bf16 %v9447_v24, %v9447_v24  ;;  %v9347_v14 = vcombine.low %v4927_v4, %v4931_v43  ;;  %v9356_v24 = vcombine.high %v4935_v11, %v4939_v12  ;;  %v4947_v30 = vld [vmem:[#allocation11 + $0xda0] sm:$0xff]  ;;  %v4944_v32 = vld [vmem:[#allocation11 + $0xd88] sm:$0xff] }
 0x423   :  { %v10084_v41 = vpack.c.bf16 %v9448_v28, %v9448_v28  ;;  %v4501_v42 = vpop.f32.mrb[15].mxu1  ;;  %v9358_v27 = vcombine.high %v4936_v19, %v4940_v0  ;;  %v4943_v28 = vld [vmem:[#allocation11 + $0xd80] sm:$0xff]  ;;  %v9357_v36 = vcombine.low %v4936_v19, %v4940_v0  ;;  %v9366_v33 = vcombine.high %v4944_v32, %v4948_v34  ;;  %v4976_v7 = vld [vmem:[#allocation11 + $0xe88] sm:$0xff] }
 0x424   :  { %v10090_v52 = vpack.c.bf16 %v9450_v35, %v9450_v35  ;;  %v9355_v35 = vcombine.low %v4935_v11, %v4939_v12  ;;  %v9364_v38 = vcombine.high %v4943_v28, %v4947_v30  ;;  %v4952_v42 = vld [vmem:[#allocation11 + $0xdc8] sm:$0xff]  ;;  %v9365_v51 = vcombine.low %v4944_v32, %v4948_v34  ;;  %v4975_v43 = vld [vmem:[#allocation11 + $0xe80] sm:$0xff] }
 0x425   :  { %7739 = vmatprep.mubr.bf16.mxu0 %v10084_v41  ;;  %7903 = vmatprep.mubr.bf16.mxu1 %v10084_v41  ;;  %v4983_v12 = vld [vmem:[#allocation11 + $0xec0] sm:$0xff]  ;;  %v4984_v0 = vld [vmem:[#allocation11 + $0xec8] sm:$0xff] }
 0x426   :  { %7740 = vmatmul.mubr.bf16.vlgmr.msra.gmra.mrb[16].mxu0 %v10086_v46  ;;  %7904 = vmatmul.mubr.bf16.vlgmr.msra.gmra.mrb[16].mxu1 %v10086_v46  ;;  %v4987_v19 = vld [vmem:[#allocation11 + $0xee0] sm:$0xff]  ;;  %v4992_v34 = vld [vmem:[#allocation11 + $0xf08] sm:$0xff] }
 0x427   :  { %7749 = vmatpush1.bf16.msra.mxu0 %v9315_v44  ;;  %7913 = vmatpush1.bf16.msra.mxu1 %v9317_v45  ;;  %v4956_v44 = vld [vmem:[#allocation11 + $0xde8] sm:$0xff]  ;;  %v9363_v45 = vcombine.low %v4943_v28, %v4947_v30  ;;  %v4991_v30 = vld [vmem:[#allocation11 + $0xf00] sm:$0xff] }
 0x428   :  { %7780 = vmatprep.mubr.bf16.mxu0 %v10090_v52  ;;  %7944 = vmatprep.mubr.bf16.mxu1 %v10090_v52  ;;  %v4995_v32 = vld [vmem:[#allocation11 + $0xf20] sm:$0xff] }
 0x429   :  { %7750 = vmatprep.subr.bf16.mxu0 %v9324_v47  ;;  %7914 = vmatprep.subr.bf16.mxu1 %v9326_v26  ;;  %v9372_v47 = vcombine.high %v4951_v1, %v4955_v40  ;;  %v9374_v26 = vcombine.high %v4952_v42, %v4956_v44 }
 0x42b   :  { %7751 = vmatpush1.bf16.msra.mxu0 %v9323_v53  ;;  %7915 = vmatpush1.bf16.msra.mxu1 %v9325_v55  ;;  %v4964_v53 = vld [vmem:[#allocation11 + $0xe28] sm:$0xff]  ;;  %v9371_v55 = vcombine.low %v4951_v1, %v4955_v40  ;;  %v4999_v40 = vld [vmem:[#allocation11 + $0xf40] sm:$0xff] }
 0x42c   :  { %7752 = vmatprep.subr.bf16.mxu0 %v9332_v56  ;;  %7916 = vmatprep.subr.bf16.mxu1 %v9334_v16  ;;  %v9373_v56 = vcombine.low %v4952_v42, %v4956_v44  ;;  %v9380_v16 = vcombine.high %v4959_v49, %v4963_v25  ;;  %v9382_v39 = vcombine.high %v4960_v50, %v4964_v53  ;;  %v5003_v42 = vld [vmem:[#allocation11 + $0xf60] sm:$0xff]  ;;  %v5000_v44 = vld [vmem:[#allocation11 + $0xf48] sm:$0xff] }
 0x42f   :  { %7753 = vmatpush1.bf16.msra.mxu0 %v9331_v62  ;;  %7917 = vmatpush1.bf16.msra.mxu1 %v9333_v8  ;;  %v4972_v62 = vld [vmem:[#allocation11 + $0xe68] sm:$0xff]  ;;  %v9379_v8 = vcombine.low %v4959_v49, %v4963_v25  ;;  %v5007_v25 = vld [vmem:[#allocation11 + $0xf80] sm:$0xff] }
 0x430   :  { %7754 = vmatprep.subr.bf16.mxu0 %v9340_v31  ;;  %7918 = vmatprep.subr.bf16.mxu1 %v9342_v2  ;;  %v9381_v31 = vcombine.low %v4960_v50, %v4964_v53  ;;  %v9388_v2 = vcombine.high %v4967_v59, %v4971_v60  ;;  %v9390_v4 = vcombine.high %v4968_v61, %v4972_v62  ;;  %v5011_v50 = vld [vmem:[#allocation11 + $0xfa0] sm:$0xff]  ;;  %v5008_v53 = vld [vmem:[#allocation11 + $0xf88] sm:$0xff] }
 0x433   :  { %7755 = vmatpush1.bf16.msra.mxu0 %v9339_v9  ;;  %7919 = vmatpush1.bf16.msra.mxu1 %v9341_v20  ;;  %v4980_v9 = vld [vmem:[#allocation11 + $0xea8] sm:$0xff]  ;;  %v9387_v20 = vcombine.low %v4967_v59, %v4971_v60  ;;  %v5015_v60 = vld [vmem:[#allocation11 + $0xfc0] sm:$0xff] }
 0x434   :  { %7756 = vmatprep.subr.bf16.mxu0 %v9348_v6  ;;  %7920 = vmatprep.subr.bf16.mxu1 %v9350_v10  ;;  %v9389_v6 = vcombine.low %v4968_v61, %v4972_v62  ;;  %v9396_v10 = vcombine.high %v4975_v43, %v4979_v5  ;;  %v9398_v11 = vcombine.high %v4976_v7, %v4980_v9  ;;  %v5019_v61 = vld [vmem:[#allocation11 + $0xfe0] sm:$0xff]  ;;  %v5016_v62 = vld [vmem:[#allocation11 + $0xfc8] sm:$0xff] }
 0x437   :  { %7757 = vmatpush1.bf16.msra.mxu0 %v9347_v14  ;;  %7921 = vmatpush1.bf16.msra.mxu1 %v9349_v22  ;;  %v4988_v14 = vld [vmem:[#allocation11 + $0xee8] sm:$0xff]  ;;  %v9395_v22 = vcombine.low %v4975_v43, %v4979_v5  ;;  %v9436_v43 = vcombine.high %v5015_v60, %v5019_v61 }
 0x438   :  { %7758 = vmatprep.subr.bf16.mxu0 %v9356_v24  ;;  %7922 = vmatprep.subr.bf16.mxu1 %v9358_v27  ;;  %v9397_v24 = vcombine.low %v4976_v7, %v4980_v9  ;;  %v9404_v27 = vcombine.high %v4983_v12, %v4987_v19  ;;  %v9406_v28 = vcombine.high %v4984_v0, %v4988_v14  ;;  %v4513_v7 = vld [vmem:[#allocation11 + $0x10] sm:$0xff] }
 0x439   :  { %v4517_v9 = vld [vmem:[#allocation11 + $0x30] sm:$0xff] }
 0x43b   :  { %7759 = vmatpush1.bf16.msra.mxu0 %v9355_v35  ;;  %7923 = vmatpush1.bf16.msra.mxu1 %v9357_v36  ;;  %v4996_v35 = vld [vmem:[#allocation11 + $0xf28] sm:$0xff]  ;;  %v9403_v36 = vcombine.low %v4983_v12, %v4987_v19  ;;  %v8936_v19 = vcombine.high %v4513_v7, %v4517_v9 }
 0x43c   :  { %7760 = vmatprep.subr.bf16.mxu0 %v9364_v38  ;;  %7924 = vmatprep.subr.bf16.mxu1 %v9366_v33  ;;  %v9405_v38 = vcombine.low %v4984_v0, %v4988_v14  ;;  %v9412_v33 = vcombine.high %v4991_v30, %v4995_v32  ;;  %v9414_v1 = vcombine.high %v4992_v34, %v4996_v35  ;;  %v4521_v14 = vld [vmem:[#allocation11 + $0x50] sm:$0xff] }
 0x43f   :  { %7761 = vmatpush1.bf16.msra.mxu0 %v9363_v45  ;;  %7925 = vmatpush1.bf16.msra.mxu1 %v9365_v51  ;;  %v5004_v45 = vld [vmem:[#allocation11 + $0xf68] sm:$0xff]  ;;  %v9411_v51 = vcombine.low %v4991_v30, %v4995_v32 }
 0x440   :  { %7762 = vmatprep.subr.bf16.mxu0 %v9372_v47  ;;  %7926 = vmatprep.subr.bf16.mxu1 %v9374_v26  ;;  %v9413_v47 = vcombine.low %v4992_v34, %v4996_v35  ;;  %v9420_v26 = vcombine.high %v4999_v40, %v5003_v42  ;;  %v9422_v49 = vcombine.high %v5000_v44, %v5004_v45  ;;  %v4529_v35 = vld [vmem:[#allocation11 + $0x90] sm:$0xff] }
 0x443   :  { %7763 = vmatpush1.bf16.msra.mxu0 %v9371_v55  ;;  %7927 = vmatpush1.bf16.msra.mxu1 %v9373_v56  ;;  %v5012_v55 = vld [vmem:[#allocation11 + $0xfa8] sm:$0xff]  ;;  %v9419_v56 = vcombine.low %v4999_v40, %v5003_v42 }
 0x444   :  { %7764 = vmatprep.subr.bf16.mxu0 %v9380_v16  ;;  %7928 = vmatprep.subr.bf16.mxu1 %v9382_v39  ;;  %v9421_v16 = vcombine.low %v5000_v44, %v5004_v45  ;;  %v9428_v39 = vcombine.high %v5007_v25, %v5011_v50  ;;  %v9430_v59 = vcombine.high %v5008_v53, %v5012_v55  ;;  %v4537_v44 = vld [vmem:[#allocation11 + $0xd0] sm:$0xff] }
 0x445   :  { %v4541_v45 = vld [vmem:[#allocation11 + $0xf0] sm:$0xff] }
 0x447   :  { %7765 = vmatpush1.bf16.msra.mxu0 %v9379_v8  ;;  %7929 = vmatpush1.bf16.msra.mxu1 %v9381_v31  ;;  %v5020_v8 = vld [vmem:[#allocation11 + $0xfe8] sm:$0xff]  ;;  %v9427_v31 = vcombine.low %v5007_v25, %v5011_v50  ;;  %v8960_v25 = vcombine.high %v4537_v44, %v4541_v45 }
 0x448   :  { %7766 = vmatprep.subr.bf16.mxu0 %v9388_v2  ;;  %7930 = vmatprep.subr.bf16.mxu1 %v9390_v4  ;;  %v9429_v2 = vcombine.low %v5008_v53, %v5012_v55  ;;  %v1274_v4 = vrot.slane %v10074_v13, %v10012_v3  ;;  %v9438_v5 = vcombine.high %v5016_v62, %v5020_v8  ;;  %v4525_v13 = vld [vmem:[#allocation11 + $0x70] sm:$0xff] }
 0x449   :  { %v8944_v32 = vcombine.high %v4521_v14, %v4525_v13  ;;  %v4545_v53 = vld [vmem:[#allocation11 + $0x110] sm:$0xff] }
 0x44a   :  { %v9449_v12 = vadd.f32 %v10082_v58, %v1274_v4  ;;  %v4533_v58 = vld [vmem:[#allocation11 + $0xb0] sm:$0xff] }
 0x44b   :  { %7767 = vmatpush1.bf16.msra.mxu0 %v9387_v20  ;;  %7931 = vmatpush1.bf16.msra.mxu1 %v9389_v6  ;;  %v4514_v20 = vld [vmem:[#allocation11 + $0x18] sm:$0xff]  ;;  %v8952_v40 = vcombine.high %v4529_v35, %v4533_v58  ;;  %v4549_v55 = vld [vmem:[#allocation11 + $0x130] sm:$0xff] }
 0x44c   :  { %7768 = vmatprep.subr.bf16.mxu0 %v9396_v10  ;;  %7932 = vmatprep.subr.bf16.mxu1 %v9398_v11  ;;  %v4518_v6 = vld [vmem:[#allocation11 + $0x38] sm:$0xff]  ;;  %v9435_v10 = vcombine.low %v5015_v60, %v5019_v61  ;;  %v9437_v11 = vcombine.low %v5016_v62, %v5020_v8  ;;  %v4553_v61 = vld [vmem:[#allocation11 + $0x150] sm:$0xff] }
 0x44d   :  { %v8938_v0 = vcombine.high %v4514_v20, %v4518_v6  ;;  %v8937_v30 = vcombine.low %v4514_v20, %v4518_v6  ;;  %v4557_v62 = vld [vmem:[#allocation11 + $0x170] sm:$0xff]  ;;  %v4554_v8 = vld [vmem:[#allocation11 + $0x158] sm:$0xff] }
 0x44e   :  { %v4562_v20 = vld [vmem:[#allocation11 + $0x198] sm:$0xff] }
 0x44f   :  { %7769 = vmatpush1.bf16.msra.mxu0 %v9395_v22  ;;  %7933 = vmatpush1.bf16.msra.mxu1 %v9397_v24  ;;  %v4522_v22 = vld [vmem:[#allocation11 + $0x58] sm:$0xff] }
 0x450   :  { %7770 = vmatprep.subr.bf16.mxu0 %v9404_v27  ;;  %7934 = vmatprep.subr.bf16.mxu1 %v9406_v28  ;;  %v4526_v24 = vld [vmem:[#allocation11 + $0x78] sm:$0xff]  ;;  %v8935_v27 = vcombine.low %v4513_v7, %v4517_v9  ;;  %v10099_v28 = vpack.c.bf16 %v9449_v12, %v9449_v12  ;;  %v4561_v7 = vld [vmem:[#allocation11 + $0x190] sm:$0xff] }
 0x451   :  { %v8946_v34 = vcombine.high %v4522_v22, %v4526_v24  ;;  %v4565_v9 = vld [vmem:[#allocation11 + $0x1b0] sm:$0xff]  ;;  %v4566_v6 = vld [vmem:[#allocation11 + $0x1b8] sm:$0xff] }
 0x452   :  { %v8984_v12 = vcombine.high %v4561_v7, %v4565_v9 }
 0x453   :  { %7771 = vmatpush1.bf16.msra.mxu0 %v9403_v36  ;;  %7935 = vmatpush1.bf16.msra.mxu1 %v9405_v38  ;;  %v4530_v36 = vld [vmem:[#allocation11 + $0x98] sm:$0xff] }
 0x454   :  { %7772 = vmatprep.subr.bf16.mxu0 %v9412_v33  ;;  %7936 = vmatprep.subr.bf16.mxu1 %v9414_v1  ;;  %v4534_v38 = vld [vmem:[#allocation11 + $0xb8] sm:$0xff]  ;;  %v8943_v33 = vcombine.low %v4521_v14, %v4525_v13  ;;  %v8945_v1 = vcombine.low %v4522_v22, %v4526_v24  ;;  %v4573_v14 = vld [vmem:[#allocation11 + $0x1f0] sm:$0xff]  ;;  %v8983_v24 = vcombine.low %v4561_v7, %v4565_v9 }
 0x455   :  { %v8954_v42 = vcombine.high %v4530_v36, %v4534_v38  ;;  %v4570_v13 = vld [vmem:[#allocation11 + $0x1d8] sm:$0xff]  ;;  %v4613_v7 = vld [vmem:[#allocation11 + $0x330] sm:$0xff] }
 0x456   :  { %v4574_v22 = vld [vmem:[#allocation11 + $0x1f8] sm:$0xff] }
 0x457   :  { %7773 = vmatpush1.bf16.msra.mxu0 %v9411_v51  ;;  %7937 = vmatpush1.bf16.msra.mxu1 %v9413_v47  ;;  %v4538_v51 = vld [vmem:[#allocation11 + $0xd8] sm:$0xff] }
 0x458   :  { %7774 = vmatprep.subr.bf16.mxu0 %v9420_v26  ;;  %7938 = vmatprep.subr.bf16.mxu1 %v9422_v49  ;;  %v4542_v47 = vld [vmem:[#allocation11 + $0xf8] sm:$0xff]  ;;  %v8951_v26 = vcombine.low %v4529_v35, %v4533_v58  ;;  %v8953_v49 = vcombine.low %v4530_v36, %v4534_v38  ;;  %v4581_v35 = vld [vmem:[#allocation11 + $0x230] sm:$0xff] }
 0x459   :  { %v8962_v50 = vcombine.high %v4538_v51, %v4542_v47  ;;  %v4578_v58 = vld [vmem:[#allocation11 + $0x218] sm:$0xff] }
 0x45a   :  { %v4582_v36 = vld [vmem:[#allocation11 + $0x238] sm:$0xff] }
 0x45b   :  { %7775 = vmatpush1.bf16.msra.mxu0 %v9419_v56  ;;  %7939 = vmatpush1.bf16.msra.mxu1 %v9421_v16  ;;  %v4550_v56 = vld [vmem:[#allocation11 + $0x138] sm:$0xff]  ;;  %v8959_v16 = vcombine.low %v4537_v44, %v4541_v45  ;;  %v4589_v44 = vld [vmem:[#allocation11 + $0x270] sm:$0xff] }
 0x45c   :  { %7776 = vmatprep.subr.bf16.mxu0 %v9428_v39  ;;  %7940 = vmatprep.subr.bf16.mxu1 %v9430_v59  ;;  %v8961_v39 = vcombine.low %v4538_v51, %v4542_v47  ;;  %v8968_v59 = vcombine.high %v4545_v53, %v4549_v55  ;;  %v4586_v45 = vld [vmem:[#allocation11 + $0x258] sm:$0xff] }
 0x45d   :  { %v4590_v51 = vld [vmem:[#allocation11 + $0x278] sm:$0xff] }
 0x45e   :  { %v4610_v9 = vld [vmem:[#allocation11 + $0x318] sm:$0xff] }
 0x45f   :  { %7777 = vmatpush1.bf16.msra.mxu0 %v9427_v31  ;;  %7941 = vmatpush1.bf16.msra.mxu1 %v9429_v2  ;;  %v4558_v31 = vld [vmem:[#allocation11 + $0x178] sm:$0xff]  ;;  %v8967_v2 = vcombine.low %v4545_v53, %v4549_v55  ;;  %v4597_v53 = vld [vmem:[#allocation11 + $0x2b0] sm:$0xff] }
 0x460   :  { %7778 = vmatprep.subr.bf16.mxu0 %v9436_v43  ;;  %7942 = vmatprep.subr.bf16.mxu1 %v9438_v5  ;;  %v8976_v43 = vcombine.high %v4553_v61, %v4557_v62  ;;  %v8978_v5 = vcombine.high %v4554_v8, %v4558_v31  ;;  %v4594_v55 = vld [vmem:[#allocation11 + $0x298] sm:$0xff] }
 0x463   :  { %7779 = vmatpush1.bf16.msra.mxu0 %v9435_v10  ;;  %7943 = vmatpush1.bf16.msra.mxu1 %v9437_v11  ;;  %v8975_v10 = vcombine.low %v4553_v61, %v4557_v62  ;;  %v8977_v11 = vcombine.low %v4554_v8, %v4558_v31  ;;  %v4605_v61 = vld [vmem:[#allocation11 + $0x2f0] sm:$0xff]  ;;  %v4602_v62 = vld [vmem:[#allocation11 + $0x2d8] sm:$0xff] }
 0x464   :  { %7953 = vmatprep.subr.bf16.mxu0 %v8936_v19  ;;  %8117 = vmatprep.subr.bf16.mxu1 %v8938_v0  ;;  %v8986_v19 = vcombine.high %v4562_v20, %v4566_v6  ;;  %v4569_v0 = vld [vmem:[#allocation11 + $0x1d0] sm:$0xff]  ;;  %v4606_v8 = vld [vmem:[#allocation11 + $0x2f8] sm:$0xff] }
 0x465   :  { %v8991_v38 = vcombine.low %v4569_v0, %v4573_v14 }
 0x466   :  { %7781 = vmatmul.mubr.bf16.vlgmr.msra.gmra.mrb[16].mxu0 %v10099_v28  ;;  %7945 = vmatmul.mubr.bf16.vlgmr.msra.gmra.mrb[16].mxu1 %v10099_v28 }
 0x467   :  { %7954 = vmatpush1.bf16.msra.mxu0 %v8935_v27  ;;  %7985 = vmatprep.mubr.bf16.mxu0 %v10047_v54  ;;  %v8985_v27 = vcombine.low %v4562_v20, %v4566_v6  ;;  %v4614_v20 = vld [vmem:[#allocation11 + $0x338] sm:$0xff] }
 0x468   :  { %8118 = vmatpush1.bf16.msra.mxu1 %v8937_v30  ;;  %8149 = vmatprep.mubr.bf16.mxu1 %v10047_v54  ;;  %v4546_v54 = vld [vmem:[#allocation11 + $0x118] sm:$0xff]  ;;  %v8992_v30 = vcombine.high %v4569_v0, %v4573_v14  ;;  %v4621_v0 = vld [vmem:[#allocation11 + $0x370] sm:$0xff] }
 0x469   :  { %7955 = vmatprep.subr.bf16.mxu0 %v8944_v32  ;;  %8119 = vmatprep.subr.bf16.mxu1 %v8946_v34  ;;  %v8970_v60 = vcombine.high %v4546_v54, %v4550_v56  ;;  %v8969_v4 = vcombine.low %v4546_v54, %v4550_v56  ;;  %v8994_v32 = vcombine.high %v4570_v13, %v4574_v22  ;;  %v4577_v34 = vld [vmem:[#allocation11 + $0x210] sm:$0xff]  ;;  %v4598_v54 = vld [vmem:[#allocation11 + $0x2b8] sm:$0xff] }
 0x46a   :  { %v8999_v47 = vcombine.low %v4577_v34, %v4581_v35  ;;  %v4618_v14 = vld [vmem:[#allocation11 + $0x358] sm:$0xff] }
 0x46b   :  { %7956 = vmatpush1.bf16.msra.mxu0 %v8943_v33  ;;  %v8993_v33 = vcombine.low %v4570_v13, %v4574_v22  ;;  %v4622_v13 = vld [vmem:[#allocation11 + $0x378] sm:$0xff] }
 0x46c   :  { %8120 = vmatpush1.bf16.msra.mxu1 %v8945_v1  ;;  %7957 = vmatprep.subr.bf16.mxu0 %v8952_v40  ;;  %v9000_v1 = vcombine.high %v4577_v34, %v4581_v35  ;;  %v9002_v40 = vcombine.high %v4578_v58, %v4582_v36  ;;  %v4629_v34 = vld [vmem:[#allocation11 + $0x3b0] sm:$0xff]  ;;  %v4626_v35 = vld [vmem:[#allocation11 + $0x398] sm:$0xff] }
 0x46d   :  { %8121 = vmatprep.subr.bf16.mxu1 %v8954_v42  ;;  %v4585_v42 = vld [vmem:[#allocation11 + $0x250] sm:$0xff] }
 0x46e   :  { %v9007_v56 = vcombine.low %v4585_v42, %v4589_v44 }
 0x46f   :  { %7958 = vmatpush1.bf16.msra.mxu0 %v8951_v26  ;;  %v9001_v26 = vcombine.low %v4578_v58, %v4582_v36  ;;  %v4630_v58 = vld [vmem:[#allocation11 + $0x3b8] sm:$0xff] }
 0x470   :  { %8122 = vmatpush1.bf16.msra.mxu1 %v8953_v49  ;;  %7959 = vmatprep.subr.bf16.mxu0 %v8960_v25  ;;  %v9008_v49 = vcombine.high %v4585_v42, %v4589_v44  ;;  %v9010_v25 = vcombine.high %v4586_v45, %v4590_v51  ;;  %v4637_v42 = vld [vmem:[#allocation11 + $0x3f0] sm:$0xff]  ;;  %v4634_v44 = vld [vmem:[#allocation11 + $0x3d8] sm:$0xff] }
 0x471   :  { %8123 = vmatprep.subr.bf16.mxu1 %v8962_v50  ;;  %v4593_v50 = vld [vmem:[#allocation11 + $0x290] sm:$0xff] }
 0x472   :  { %v9015_v31 = vcombine.low %v4593_v50, %v4597_v53 }
 0x473   :  { %7960 = vmatpush1.bf16.msra.mxu0 %v8959_v16  ;;  %v9009_v16 = vcombine.low %v4586_v45, %v4590_v51  ;;  %v4638_v45 = vld [vmem:[#allocation11 + $0x3f8] sm:$0xff] }
 0x474   :  { %8124 = vmatpush1.bf16.msra.mxu1 %v8961_v39  ;;  %7961 = vmatprep.subr.bf16.mxu0 %v8968_v59  ;;  %v9016_v39 = vcombine.high %v4593_v50, %v4597_v53  ;;  %v9018_v59 = vcombine.high %v4594_v55, %v4598_v54  ;;  %v4645_v50 = vld [vmem:[#allocation11 + $0x430] sm:$0xff]  ;;  %v4642_v53 = vld [vmem:[#allocation11 + $0x418] sm:$0xff] }
 0x475   :  { %8125 = vmatprep.subr.bf16.mxu1 %v8970_v60  ;;  %v4601_v60 = vld [vmem:[#allocation11 + $0x2d0] sm:$0xff] }
 0x476   :  { %v9023_v6 = vcombine.low %v4601_v60, %v4605_v61 }
 0x477   :  { %7962 = vmatpush1.bf16.msra.mxu0 %v8967_v2  ;;  %v9017_v2 = vcombine.low %v4594_v55, %v4598_v54  ;;  %v4646_v55 = vld [vmem:[#allocation11 + $0x438] sm:$0xff] }
 0x478   :  { %8126 = vmatpush1.bf16.msra.mxu1 %v8969_v4  ;;  %7963 = vmatprep.subr.bf16.mxu0 %v8976_v43  ;;  %v9024_v4 = vcombine.high %v4601_v60, %v4605_v61  ;;  %v9026_v43 = vcombine.high %v4602_v62, %v4606_v8  ;;  %v4653_v60 = vld [vmem:[#allocation11 + $0x470] sm:$0xff] }
 0x479   :  { %8127 = vmatprep.subr.bf16.mxu1 %v8978_v5  ;;  %v4609_v5 = vld [vmem:[#allocation11 + $0x310] sm:$0xff] }
 0x47a   :  { %v9031_v22 = vcombine.low %v4609_v5, %v4613_v7 }
 0x47b   :  { %7964 = vmatpush1.bf16.msra.mxu0 %v8975_v10  ;;  %v9025_v10 = vcombine.low %v4602_v62, %v4606_v8  ;;  %v4650_v62 = vld [vmem:[#allocation11 + $0x458] sm:$0xff] }
 0x47c   :  { %8128 = vmatpush1.bf16.msra.mxu1 %v8977_v11  ;;  %7965 = vmatprep.subr.bf16.mxu0 %v8984_v12  ;;  %v9032_v11 = vcombine.high %v4609_v5, %v4613_v7  ;;  %v9034_v12 = vcombine.high %v4610_v9, %v4614_v20  ;;  %v4654_v8 = vld [vmem:[#allocation11 + $0x478] sm:$0xff] }
 0x47d   :  { %8129 = vmatprep.subr.bf16.mxu1 %v8986_v19  ;;  %v4617_v19 = vld [vmem:[#allocation11 + $0x350] sm:$0xff]  ;;  %v9074_v5 = vcombine.high %v4650_v62, %v4654_v8  ;;  %v4658_v7 = vld [vmem:[#allocation11 + $0x498] sm:$0xff] }
 0x47e   :  { %v9039_v36 = vcombine.low %v4617_v19, %v4621_v0 }
 0x47f   :  { %7966 = vmatpush1.bf16.msra.mxu0 %v8983_v24  ;;  %v9033_v24 = vcombine.low %v4610_v9, %v4614_v20  ;;  %v4662_v9 = vld [vmem:[#allocation11 + $0x4b8] sm:$0xff] }
 0x480   :  { %8130 = vmatpush1.bf16.msra.mxu1 %v8985_v27  ;;  %7967 = vmatprep.subr.bf16.mxu0 %v8992_v30  ;;  %v9040_v27 = vcombine.high %v4617_v19, %v4621_v0  ;;  %v9042_v30 = vcombine.high %v4618_v14, %v4622_v13  ;;  %v4669_v19 = vld [vmem:[#allocation11 + $0x4f0] sm:$0xff]  ;;  %v4666_v0 = vld [vmem:[#allocation11 + $0x4d8] sm:$0xff] }
 0x481   :  { %8131 = vmatprep.subr.bf16.mxu1 %v8994_v32  ;;  %v4625_v32 = vld [vmem:[#allocation11 + $0x390] sm:$0xff] }
 0x482   :  { %v9047_v51 = vcombine.low %v4625_v32, %v4629_v34 }
 0x483   :  { %7968 = vmatpush1.bf16.msra.mxu0 %v8991_v38  ;;  %v9041_v38 = vcombine.low %v4618_v14, %v4622_v13  ;;  %v4670_v14 = vld [vmem:[#allocation11 + $0x4f8] sm:$0xff] }
 0x484   :  { %8132 = vmatpush1.bf16.msra.mxu1 %v8993_v33  ;;  %7969 = vmatprep.subr.bf16.mxu0 %v9000_v1  ;;  %v9048_v33 = vcombine.high %v4625_v32, %v4629_v34  ;;  %v9050_v1 = vcombine.high %v4626_v35, %v4630_v58  ;;  %v4674_v32 = vld [vmem:[#allocation11 + $0x518] sm:$0xff] }
 0x485   :  { %8133 = vmatprep.subr.bf16.mxu1 %v9002_v40  ;;  %v4633_v40 = vld [vmem:[#allocation11 + $0x3d0] sm:$0xff]  ;;  %v4678_v34 = vld [vmem:[#allocation11 + $0x538] sm:$0xff] }
 0x486   :  { %v9055_v54 = vcombine.low %v4633_v40, %v4637_v42 }
 0x487   :  { %7970 = vmatpush1.bf16.msra.mxu0 %v8999_v47  ;;  %v9049_v47 = vcombine.low %v4626_v35, %v4630_v58  ;;  %v9089_v35 = vcombine.low %v4666_v0, %v4670_v14 }
 0x488   :  { %8134 = vmatpush1.bf16.msra.mxu1 %v9001_v26  ;;  %7971 = vmatprep.subr.bf16.mxu0 %v9008_v49  ;;  %v9056_v26 = vcombine.high %v4633_v40, %v4637_v42  ;;  %v9058_v49 = vcombine.high %v4634_v44, %v4638_v45  ;;  %v4686_v40 = vld [vmem:[#allocation11 + $0x578] sm:$0xff] }
 0x489   :  { %8135 = vmatprep.subr.bf16.mxu1 %v9010_v25  ;;  %v4641_v25 = vld [vmem:[#allocation11 + $0x410] sm:$0xff] }
 0x48a   :  { %v9063_v61 = vcombine.low %v4641_v25, %v4645_v50 }
 0x48b   :  { %7972 = vmatpush1.bf16.msra.mxu0 %v9007_v56  ;;  %v9057_v56 = vcombine.low %v4634_v44, %v4638_v45  ;;  %v9097_v44 = vcombine.low %v4674_v32, %v4678_v34 }
 0x48c   :  { %8136 = vmatpush1.bf16.msra.mxu1 %v9009_v16  ;;  %7973 = vmatprep.subr.bf16.mxu0 %v9016_v39  ;;  %v9064_v16 = vcombine.high %v4641_v25, %v4645_v50  ;;  %v9066_v39 = vcombine.high %v4642_v53, %v4646_v55  ;;  %v4694_v25 = vld [vmem:[#allocation11 + $0x5b8] sm:$0xff] }
 0x48d   :  { %8137 = vmatprep.subr.bf16.mxu1 %v9018_v59  ;;  %v4649_v59 = vld [vmem:[#allocation11 + $0x450] sm:$0xff] }
 0x48e   :  { %v9071_v20 = vcombine.low %v4649_v59, %v4653_v60 }
 0x48f   :  { %7974 = vmatpush1.bf16.msra.mxu0 %v9015_v31  ;;  %v9065_v31 = vcombine.low %v4642_v53, %v4646_v55 }
 0x490   :  { %8138 = vmatpush1.bf16.msra.mxu1 %v9017_v2  ;;  %7975 = vmatprep.subr.bf16.mxu0 %v9024_v4  ;;  %v9072_v2 = vcombine.high %v4649_v59, %v4653_v60  ;;  %v4657_v4 = vld [vmem:[#allocation11 + $0x490] sm:$0xff]  ;;  %v4702_v59 = vld [vmem:[#allocation11 + $0x5f8] sm:$0xff] }
 0x491   :  { %8139 = vmatprep.subr.bf16.mxu1 %v9026_v43  ;;  %v4661_v43 = vld [vmem:[#allocation11 + $0x4b0] sm:$0xff] }
 0x492   :  { %v9079_v13 = vcombine.low %v4657_v4, %v4661_v43 }
 0x493   :  { %7976 = vmatpush1.bf16.msra.mxu0 %v9023_v6  ;;  %v9073_v6 = vcombine.low %v4650_v62, %v4654_v8 }
 0x494   :  { %8140 = vmatpush1.bf16.msra.mxu1 %v9025_v10  ;;  %7977 = vmatprep.subr.bf16.mxu0 %v9032_v11  ;;  %v9080_v10 = vcombine.high %v4657_v4, %v4661_v43  ;;  %v9082_v11 = vcombine.high %v4658_v7, %v4662_v9  ;;  %v4706_v4 = vld [vmem:[#allocation11 + $0x618] sm:$0xff] }
 0x495   :  { %8141 = vmatprep.subr.bf16.mxu1 %v9034_v12  ;;  %v4665_v12 = vld [vmem:[#allocation11 + $0x4d0] sm:$0xff]  ;;  %v4710_v43 = vld [vmem:[#allocation11 + $0x638] sm:$0xff] }
 0x497   :  { %7978 = vmatpush1.bf16.msra.mxu0 %v9031_v22  ;;  %v9088_v22 = vcombine.high %v4665_v12, %v4669_v19 }
 0x498   :  { %8142 = vmatpush1.bf16.msra.mxu1 %v9033_v24  ;;  %7979 = vmatprep.subr.bf16.mxu0 %v9040_v27  ;;  %v9090_v24 = vcombine.high %v4666_v0, %v4670_v14  ;;  %v4673_v27 = vld [vmem:[#allocation11 + $0x510] sm:$0xff]  ;;  %v9129_v0 = vcombine.low %v4706_v4, %v4710_v43 }
 0x499   :  { %8143 = vmatprep.subr.bf16.mxu1 %v9042_v30  ;;  %v4677_v30 = vld [vmem:[#allocation11 + $0x530] sm:$0xff] }
 0x49a   :  { %v9096_v58 = vcombine.high %v4673_v27, %v4677_v30  ;;  %v9095_v42 = vcombine.low %v4673_v27, %v4677_v30  ;;  %v4726_v27 = vld [vmem:[#allocation11 + $0x6b8] sm:$0xff] }
 0x49b   :  { %7980 = vmatpush1.bf16.msra.mxu0 %v9039_v36  ;;  %v9098_v36 = vcombine.high %v4674_v32, %v4678_v34 }
 0x49c   :  { %8144 = vmatpush1.bf16.msra.mxu1 %v9041_v38  ;;  %7981 = vmatprep.subr.bf16.mxu0 %v9048_v33  ;;  %v4681_v38 = vld [vmem:[#allocation11 + $0x550] sm:$0xff] }
 0x49d   :  { %8145 = vmatprep.subr.bf16.mxu1 %v9050_v1  ;;  %v4685_v33 = vld [vmem:[#allocation11 + $0x570] sm:$0xff]  ;;  %v4682_v1 = vld [vmem:[#allocation11 + $0x558] sm:$0xff] }
 0x49e   :  { %v9104_v45 = vcombine.high %v4681_v38, %v4685_v33  ;;  %v9103_v50 = vcombine.low %v4681_v38, %v4685_v33  ;;  %v9105_v53 = vcombine.low %v4682_v1, %v4686_v40  ;;  %v4734_v38 = vld [vmem:[#allocation11 + $0x6f8] sm:$0xff] }
 0x49f   :  { %7982 = vmatpush1.bf16.msra.mxu0 %v9047_v51  ;;  %v9106_v51 = vcombine.high %v4682_v1, %v4686_v40 }
 0x4a0   :  { %8146 = vmatpush1.bf16.msra.mxu1 %v9049_v47  ;;  %7983 = vmatprep.subr.bf16.mxu0 %v9056_v26  ;;  %v4689_v47 = vld [vmem:[#allocation11 + $0x590] sm:$0xff] }
 0x4a1   :  { %8147 = vmatprep.subr.bf16.mxu1 %v9058_v49  ;;  %v4693_v26 = vld [vmem:[#allocation11 + $0x5b0] sm:$0xff]  ;;  %v4690_v49 = vld [vmem:[#allocation11 + $0x598] sm:$0xff] }
 0x4a2   :  { %v9112_v55 = vcombine.high %v4689_v47, %v4693_v26  ;;  %v9111_v60 = vcombine.low %v4689_v47, %v4693_v26  ;;  %v4742_v47 = vld [vmem:[#allocation11 + $0x738] sm:$0xff] }
 0x4a3   :  { %7984 = vmatpush1.bf16.msra.mxu0 %v9055_v54  ;;  %v9114_v54 = vcombine.high %v4690_v49, %v4694_v25 }
 0x4a4   :  { %8148 = vmatpush1.bf16.msra.mxu1 %v9057_v56  ;;  %7994 = vmatprep.subr.bf16.mxu0 %v9064_v16  ;;  %v4697_v56 = vld [vmem:[#allocation11 + $0x5d0] sm:$0xff] }
 0x4a5   :  { %8158 = vmatprep.subr.bf16.mxu1 %v9066_v39  ;;  %v4701_v16 = vld [vmem:[#allocation11 + $0x5f0] sm:$0xff]  ;;  %v4698_v39 = vld [vmem:[#allocation11 + $0x5d8] sm:$0xff] }
 0x4a6   :  { %7986 = vmatmul.mubr.bf16.vlgmr.msra.gmra.mrb[20].mxu0 %v10059_v23  ;;  %v9120_v62 = vcombine.high %v4697_v56, %v4701_v16  ;;  %v9122_v8 = vcombine.high %v4698_v39, %v4702_v59 }
 0x4a7   :  { %8150 = vmatmul.mubr.bf16.vlgmr.msra.gmra.mrb[20].mxu1 %v10059_v23  ;;  %7995 = vmatpush1.bf16.msra.mxu0 %v9063_v61  ;;  %v9081_v23 = vcombine.low %v4658_v7, %v4662_v9  ;;  %v9113_v61 = vcombine.low %v4690_v49, %v4694_v25  ;;  %v9121_v7 = vcombine.low %v4698_v39, %v4702_v59 }
 0x4a8   :  { %8026 = vmatprep.mubr.bf16.mxu0 %v10061_v57  ;;  %8159 = vmatpush1.bf16.msra.mxu1 %v9065_v31  ;;  %v4705_v31 = vld [vmem:[#allocation11 + $0x610] sm:$0xff] }
 0x4a9   :  { %8190 = vmatprep.mubr.bf16.mxu1 %v10061_v57  ;;  %7996 = vmatprep.subr.bf16.mxu0 %v9072_v2  ;;  %v9087_v57 = vcombine.low %v4665_v12, %v4669_v19  ;;  %v4709_v2 = vld [vmem:[#allocation11 + $0x630] sm:$0xff]  ;;  %v4718_v12 = vld [vmem:[#allocation11 + $0x678] sm:$0xff] }
 0x4aa   :  { %8160 = vmatprep.subr.bf16.mxu1 %v9074_v5  ;;  %v9119_v5 = vcombine.low %v4697_v56, %v4701_v16  ;;  %v9128_v9 = vcombine.high %v4705_v31, %v4709_v2  ;;  %v9127_v19 = vcombine.low %v4705_v31, %v4709_v2  ;;  %v4750_v56 = vld [vmem:[#allocation11 + $0x778] sm:$0xff] }
 0x4ab   :  { %7997 = vmatpush1.bf16.msra.mxu0 %v9071_v20  ;;  %v9130_v20 = vcombine.high %v4706_v4, %v4710_v43  ;;  %v4758_v31 = vld [vmem:[#allocation11 + $0x7b8] sm:$0xff] }
 0x4ac   :  { %8161 = vmatpush1.bf16.msra.mxu1 %v9073_v6  ;;  %7998 = vmatprep.subr.bf16.mxu0 %v9080_v10  ;;  %v4713_v6 = vld [vmem:[#allocation11 + $0x650] sm:$0xff] }
 0x4ad   :  { %8162 = vmatprep.subr.bf16.mxu1 %v9082_v11  ;;  %v4717_v10 = vld [vmem:[#allocation11 + $0x670] sm:$0xff]  ;;  %v4714_v11 = vld [vmem:[#allocation11 + $0x658] sm:$0xff] }
 0x4ae   :  { %v9136_v14 = vcombine.high %v4713_v6, %v4717_v10  ;;  %v9135_v30 = vcombine.low %v4713_v6, %v4717_v10  ;;  %v9137_v32 = vcombine.low %v4714_v11, %v4718_v12  ;;  %v4766_v6 = vld [vmem:[#allocation11 + $0x7f8] sm:$0xff] }
 0x4af   :  { %7999 = vmatpush1.bf16.msra.mxu0 %v9079_v13  ;;  %v9138_v13 = vcombine.high %v4714_v11, %v4718_v12 }
 0x4b0   :  { %8163 = vmatpush1.bf16.msra.mxu1 %v9081_v23  ;;  %8000 = vmatprep.subr.bf16.mxu0 %v9088_v22  ;;  %v4721_v23 = vld [vmem:[#allocation11 + $0x690] sm:$0xff] }
 0x4b1   :  { %8164 = vmatprep.subr.bf16.mxu1 %v9090_v24  ;;  %v4725_v22 = vld [vmem:[#allocation11 + $0x6b0] sm:$0xff]  ;;  %v4722_v24 = vld [vmem:[#allocation11 + $0x698] sm:$0xff] }
 0x4b2   :  { %v9144_v34 = vcombine.high %v4721_v23, %v4725_v22  ;;  %v9143_v33 = vcombine.low %v4721_v23, %v4725_v22  ;;  %v9145_v1 = vcombine.low %v4722_v24, %v4726_v27  ;;  %v4774_v23 = vld [vmem:[#allocation11 + $0x838] sm:$0xff] }
 0x4b3   :  { %8001 = vmatpush1.bf16.msra.mxu0 %v9087_v57  ;;  %v9146_v57 = vcombine.high %v4722_v24, %v4726_v27 }
 0x4b4   :  { %8165 = vmatpush1.bf16.msra.mxu1 %v9089_v35  ;;  %8002 = vmatprep.subr.bf16.mxu0 %v9096_v58  ;;  %v4729_v35 = vld [vmem:[#allocation11 + $0x6d0] sm:$0xff] }
 0x4b5   :  { %8166 = vmatprep.subr.bf16.mxu1 %v9098_v36  ;;  %v4733_v58 = vld [vmem:[#allocation11 + $0x6f0] sm:$0xff]  ;;  %v4730_v36 = vld [vmem:[#allocation11 + $0x6d8] sm:$0xff] }
 0x4b6   :  { %v9152_v40 = vcombine.high %v4729_v35, %v4733_v58  ;;  %v9151_v26 = vcombine.low %v4729_v35, %v4733_v58  ;;  %v9153_v49 = vcombine.low %v4730_v36, %v4734_v38  ;;  %v4778_v35 = vld [vmem:[#allocation11 + $0x858] sm:$0xff] }
 0x4b7   :  { %8003 = vmatpush1.bf16.msra.mxu0 %v9095_v42  ;;  %v9154_v42 = vcombine.high %v4730_v36, %v4734_v38  ;;  %v4782_v58 = vld [vmem:[#allocation11 + $0x878] sm:$0xff] }
 0x4b8   :  { %8167 = vmatpush1.bf16.msra.mxu1 %v9097_v44  ;;  %8004 = vmatprep.subr.bf16.mxu0 %v9104_v45  ;;  %v4737_v44 = vld [vmem:[#allocation11 + $0x710] sm:$0xff] }
 0x4b9   :  { %8168 = vmatprep.subr.bf16.mxu1 %v9106_v51  ;;  %v4741_v45 = vld [vmem:[#allocation11 + $0x730] sm:$0xff]  ;;  %v4738_v51 = vld [vmem:[#allocation11 + $0x718] sm:$0xff] }
 0x4ba   :  { %v9160_v25 = vcombine.high %v4737_v44, %v4741_v45  ;;  %v9159_v16 = vcombine.low %v4737_v44, %v4741_v45  ;;  %v9161_v39 = vcombine.low %v4738_v51, %v4742_v47  ;;  %v4790_v44 = vld [vmem:[#allocation11 + $0x8b8] sm:$0xff] }
 0x4bb   :  { %8005 = vmatpush1.bf16.msra.mxu0 %v9103_v50  ;;  %v9162_v50 = vcombine.high %v4738_v51, %v4742_v47  ;;  %v9201_v51 = vcombine.low %v4778_v35, %v4782_v58 }
 0x4bc   :  { %8169 = vmatpush1.bf16.msra.mxu1 %v9105_v53  ;;  %8006 = vmatprep.subr.bf16.mxu0 %v9112_v55  ;;  %v4745_v53 = vld [vmem:[#allocation11 + $0x750] sm:$0xff] }
 0x4bd   :  { %8170 = vmatprep.subr.bf16.mxu1 %v9114_v54  ;;  %v4749_v55 = vld [vmem:[#allocation11 + $0x770] sm:$0xff]  ;;  %v4746_v54 = vld [vmem:[#allocation11 + $0x758] sm:$0xff] }
 0x4be   :  { %v9168_v59 = vcombine.high %v4745_v53, %v4749_v55  ;;  %v9167_v2 = vcombine.low %v4745_v53, %v4749_v55  ;;  %v9169_v4 = vcombine.low %v4746_v54, %v4750_v56  ;;  %v4798_v53 = vld [vmem:[#allocation11 + $0x8f8] sm:$0xff] }
 0x4bf   :  { %8007 = vmatpush1.bf16.msra.mxu0 %v9111_v60  ;;  %v9170_v60 = vcombine.high %v4746_v54, %v4750_v56 }
 0x4c0   :  { %8171 = vmatpush1.bf16.msra.mxu1 %v9113_v61  ;;  %8008 = vmatprep.subr.bf16.mxu0 %v9120_v62  ;;  %v4753_v61 = vld [vmem:[#allocation11 + $0x790] sm:$0xff] }
 0x4c1   :  { %8172 = vmatprep.subr.bf16.mxu1 %v9122_v8  ;;  %v4757_v62 = vld [vmem:[#allocation11 + $0x7b0] sm:$0xff]  ;;  %v4754_v8 = vld [vmem:[#allocation11 + $0x798] sm:$0xff] }
 0x4c2   :  { %v9176_v43 = vcombine.high %v4753_v61, %v4757_v62  ;;  %v9175_v10 = vcombine.low %v4753_v61, %v4757_v62  ;;  %v9177_v11 = vcombine.low %v4754_v8, %v4758_v31 }
 0x4c3   :  { %8009 = vmatpush1.bf16.msra.mxu0 %v9119_v5  ;;  %v9178_v5 = vcombine.high %v4754_v8, %v4758_v31  ;;  %v4809_v31 = vld [vmem:[#allocation11 + $0x950] sm:$0xff] }
 0x4c4   :  { %8173 = vmatpush1.bf16.msra.mxu1 %v9121_v7  ;;  %8010 = vmatprep.subr.bf16.mxu0 %v9128_v9  ;;  %v4761_v7 = vld [vmem:[#allocation11 + $0x7d0] sm:$0xff] }
 0x4c5   :  { %8174 = vmatprep.subr.bf16.mxu1 %v9130_v20  ;;  %v4765_v9 = vld [vmem:[#allocation11 + $0x7f0] sm:$0xff]  ;;  %v4762_v20 = vld [vmem:[#allocation11 + $0x7d8] sm:$0xff] }
 0x4c6   :  { %v9184_v12 = vcombine.high %v4761_v7, %v4765_v9  ;;  %v9183_v22 = vcombine.low %v4761_v7, %v4765_v9  ;;  %v9185_v24 = vcombine.low %v4762_v20, %v4766_v6 }
 0x4c7   :  { %8011 = vmatpush1.bf16.msra.mxu0 %v9127_v19  ;;  %v9186_v19 = vcombine.high %v4762_v20, %v4766_v6  ;;  %v4817_v6 = vld [vmem:[#allocation11 + $0x990] sm:$0xff] }
 0x4c8   :  { %8175 = vmatpush1.bf16.msra.mxu1 %v9129_v0  ;;  %8012 = vmatprep.subr.bf16.mxu0 %v9136_v14  ;;  %v4769_v0 = vld [vmem:[#allocation11 + $0x810] sm:$0xff] }
 0x4c9   :  { %8176 = vmatprep.subr.bf16.mxu1 %v9138_v13  ;;  %v4773_v14 = vld [vmem:[#allocation11 + $0x830] sm:$0xff]  ;;  %v4770_v13 = vld [vmem:[#allocation11 + $0x818] sm:$0xff] }
 0x4ca   :  { %v9192_v27 = vcombine.high %v4769_v0, %v4773_v14  ;;  %v9193_v36 = vcombine.low %v4770_v13, %v4774_v23 }
 0x4cb   :  { %8013 = vmatpush1.bf16.msra.mxu0 %v9135_v30  ;;  %v9194_v30 = vcombine.high %v4770_v13, %v4774_v23  ;;  %v4825_v23 = vld [vmem:[#allocation11 + $0x9d0] sm:$0xff] }
 0x4cc   :  { %8177 = vmatpush1.bf16.msra.mxu1 %v9137_v32  ;;  %8014 = vmatprep.subr.bf16.mxu0 %v9144_v34  ;;  %v4777_v32 = vld [vmem:[#allocation11 + $0x850] sm:$0xff] }
 0x4cd   :  { %8178 = vmatprep.subr.bf16.mxu1 %v9146_v57  ;;  %v4781_v34 = vld [vmem:[#allocation11 + $0x870] sm:$0xff]  ;;  %v9191_v57 = vcombine.low %v4769_v0, %v4773_v14 }
 0x4ce   :  { %v9200_v38 = vcombine.high %v4777_v32, %v4781_v34  ;;  %v9199_v45 = vcombine.low %v4777_v32, %v4781_v34 }
 0x4cf   :  { %8015 = vmatpush1.bf16.msra.mxu0 %v9143_v33  ;;  %v4785_v33 = vld [vmem:[#allocation11 + $0x890] sm:$0xff] }
 0x4d0   :  { %8179 = vmatpush1.bf16.msra.mxu1 %v9145_v1  ;;  %8016 = vmatprep.subr.bf16.mxu0 %v9152_v40  ;;  %v4789_v1 = vld [vmem:[#allocation11 + $0x8b0] sm:$0xff]  ;;  %v9202_v40 = vcombine.high %v4778_v35, %v4782_v58 }
 0x4d1   :  { %8180 = vmatprep.subr.bf16.mxu1 %v9154_v42  ;;  %v4786_v42 = vld [vmem:[#allocation11 + $0x898] sm:$0xff]  ;;  %v9208_v47 = vcombine.high %v4785_v33, %v4789_v1  ;;  %v9207_v55 = vcombine.low %v4785_v33, %v4789_v1  ;;  %v4833_v35 = vld [vmem:[#allocation11 + $0xa10] sm:$0xff] }
 0x4d2   :  { %v4837_v58 = vld [vmem:[#allocation11 + $0xa30] sm:$0xff] }
 0x4d3   :  { %8017 = vmatpush1.bf16.msra.mxu0 %v9151_v26  ;;  %v9210_v26 = vcombine.high %v4786_v42, %v4790_v44 }
 0x4d4   :  { %8181 = vmatpush1.bf16.msra.mxu1 %v9153_v49  ;;  %8018 = vmatprep.subr.bf16.mxu0 %v9160_v25  ;;  %v4793_v49 = vld [vmem:[#allocation11 + $0x8d0] sm:$0xff] }
 0x4d5   :  { %8182 = vmatprep.subr.bf16.mxu1 %v9162_v50  ;;  %v4797_v25 = vld [vmem:[#allocation11 + $0x8f0] sm:$0xff]  ;;  %v4794_v50 = vld [vmem:[#allocation11 + $0x8d8] sm:$0xff] }
 0x4d6   :  { %v9216_v54 = vcombine.high %v4793_v49, %v4797_v25  ;;  %v9218_v56 = vcombine.high %v4794_v50, %v4798_v53  ;;  %v9217_v61 = vcombine.low %v4794_v50, %v4798_v53  ;;  %v4849_v53 = vld [vmem:[#allocation11 + $0xa90] sm:$0xff] }
 0x4d7   :  { %8019 = vmatpush1.bf16.msra.mxu0 %v9159_v16  ;;  %v4801_v16 = vld [vmem:[#allocation11 + $0x910] sm:$0xff] }
 0x4d8   :  { %8183 = vmatpush1.bf16.msra.mxu1 %v9161_v39  ;;  %8020 = vmatprep.subr.bf16.mxu0 %v9168_v59  ;;  %v4805_v39 = vld [vmem:[#allocation11 + $0x930] sm:$0xff]  ;;  %v4802_v59 = vld [vmem:[#allocation11 + $0x918] sm:$0xff] }
 0x4d9   :  { %8184 = vmatprep.subr.bf16.mxu1 %v9170_v60  ;;  %v4806_v60 = vld [vmem:[#allocation11 + $0x938] sm:$0xff]  ;;  %v9224_v62 = vcombine.high %v4801_v16, %v4805_v39 }
 0x4da   :  { %v9226_v8 = vcombine.high %v4802_v59, %v4806_v60  ;;  %v9225_v7 = vcombine.low %v4802_v59, %v4806_v60  ;;  %v4857_v60 = vld [vmem:[#allocation11 + $0xad0] sm:$0xff] }
 0x4db   :  { %8021 = vmatpush1.bf16.msra.mxu0 %v9167_v2  ;;  %v4813_v2 = vld [vmem:[#allocation11 + $0x970] sm:$0xff] }
 0x4dc   :  { %8185 = vmatpush1.bf16.msra.mxu1 %v9169_v4  ;;  %8022 = vmatprep.subr.bf16.mxu0 %v9176_v43  ;;  %v4810_v4 = vld [vmem:[#allocation11 + $0x958] sm:$0xff]  ;;  %v9232_v9 = vcombine.high %v4809_v31, %v4813_v2 }
 0x4dd   :  { %8186 = vmatprep.subr.bf16.mxu1 %v9178_v5  ;;  %v4814_v43 = vld [vmem:[#allocation11 + $0x978] sm:$0xff]  ;;  %v9223_v5 = vcombine.low %v4801_v16, %v4805_v39 }
 0x4de   :  { %v9234_v20 = vcombine.high %v4810_v4, %v4814_v43  ;;  %v9233_v0 = vcombine.low %v4810_v4, %v4814_v43  ;;  %v4865_v43 = vld [vmem:[#allocation11 + $0xb10] sm:$0xff] }
 0x4df   :  { %8023 = vmatpush1.bf16.msra.mxu0 %v9175_v10  ;;  %v4821_v10 = vld [vmem:[#allocation11 + $0x9b0] sm:$0xff] }
 0x4e0   :  { %8187 = vmatpush1.bf16.msra.mxu1 %v9177_v11  ;;  %8024 = vmatprep.subr.bf16.mxu0 %v9184_v12  ;;  %v4818_v11 = vld [vmem:[#allocation11 + $0x998] sm:$0xff]  ;;  %v9240_v14 = vcombine.high %v4817_v6, %v4821_v10 }
 0x4e1   :  { %8188 = vmatprep.subr.bf16.mxu1 %v9186_v19  ;;  %v4822_v12 = vld [vmem:[#allocation11 + $0x9b8] sm:$0xff]  ;;  %v9231_v19 = vcombine.low %v4809_v31, %v4813_v2 }
 0x4e2   :  { %v9242_v13 = vcombine.high %v4818_v11, %v4822_v12  ;;  %v9241_v32 = vcombine.low %v4818_v11, %v4822_v12  ;;  %v4873_v12 = vld [vmem:[#allocation11 + $0xb50] sm:$0xff] }
 0x4e3   :  { %8025 = vmatpush1.bf16.msra.mxu0 %v9183_v22  ;;  %v4829_v22 = vld [vmem:[#allocation11 + $0x9f0] sm:$0xff] }
 0x4e4   :  { %8189 = vmatpush1.bf16.msra.mxu1 %v9185_v24  ;;  %8035 = vmatprep.subr.bf16.mxu0 %v9192_v27  ;;  %v4826_v24 = vld [vmem:[#allocation11 + $0x9d8] sm:$0xff]  ;;  %v9248_v34 = vcombine.high %v4825_v23, %v4829_v22  ;;  %v9247_v33 = vcombine.low %v4825_v23, %v4829_v22 }
 0x4e5   :  { %8199 = vmatprep.subr.bf16.mxu1 %v9194_v30  ;;  %v4830_v27 = vld [vmem:[#allocation11 + $0x9f8] sm:$0xff]  ;;  %v9239_v30 = vcombine.low %v4817_v6, %v4821_v10 }
 0x4e6   :  { %8027 = vmatmul.mubr.bf16.vlgmr.msra.gmra.mrb[20].mxu0 %v10070_v63  ;;  %v9249_v1 = vcombine.low %v4826_v24, %v4830_v27 }
 0x4e7   :  { %8191 = vmatmul.mubr.bf16.vlgmr.msra.gmra.mrb[20].mxu1 %v10070_v63  ;;  %8036 = vmatpush1.bf16.msra.mxu0 %v9191_v57  ;;  %v9209_v63 = vcombine.low %v4786_v42, %v4790_v44  ;;  %v9250_v57 = vcombine.high %v4826_v24, %v4830_v27  ;;  %v4841_v44 = vld [vmem:[#allocation11 + $0xa50] sm:$0xff] }
 0x4e8   :  { %8067 = vmatprep.mubr.bf16.mxu0 %v10084_v41  ;;  %8200 = vmatpush1.bf16.msra.mxu1 %v9193_v36  ;;  %v4834_v36 = vld [vmem:[#allocation11 + $0xa18] sm:$0xff]  ;;  %v4881_v27 = vld [vmem:[#allocation11 + $0xb90] sm:$0xff] }
 0x4e9   :  { %8231 = vmatprep.mubr.bf16.mxu1 %v10084_v41  ;;  %8037 = vmatprep.subr.bf16.mxu0 %v9200_v38  ;;  %v9215_v41 = vcombine.low %v4793_v49, %v4797_v25  ;;  %v4838_v38 = vld [vmem:[#allocation11 + $0xa38] sm:$0xff] }
 0x4ea   :  { %8201 = vmatprep.subr.bf16.mxu1 %v9202_v40  ;;  %v9256_v40 = vcombine.high %v4833_v35, %v4837_v58  ;;  %v9258_v42 = vcombine.high %v4834_v36, %v4838_v38  ;;  %v9257_v49 = vcombine.low %v4834_v36, %v4838_v38  ;;  %v4889_v38 = vld [vmem:[#allocation11 + $0xbd0] sm:$0xff] }
 0x4eb   :  { %8038 = vmatpush1.bf16.msra.mxu0 %v9199_v45  ;;  %v4845_v45 = vld [vmem:[#allocation11 + $0xa70] sm:$0xff] }
 0x4ec   :  { %8202 = vmatpush1.bf16.msra.mxu1 %v9201_v51  ;;  %8039 = vmatprep.subr.bf16.mxu0 %v9208_v47  ;;  %v4842_v51 = vld [vmem:[#allocation11 + $0xa58] sm:$0xff]  ;;  %v9264_v25 = vcombine.high %v4841_v44, %v4845_v45 }
 0x4ed   :  { %8203 = vmatprep.subr.bf16.mxu1 %v9210_v26  ;;  %v4846_v47 = vld [vmem:[#allocation11 + $0xa78] sm:$0xff]  ;;  %v9255_v26 = vcombine.low %v4833_v35, %v4837_v58 }
 0x4ee   :  { %v9266_v50 = vcombine.high %v4842_v51, %v4846_v47  ;;  %v9265_v16 = vcombine.low %v4842_v51, %v4846_v47  ;;  %v4897_v47 = vld [vmem:[#allocation11 + $0xc10] sm:$0xff] }
 0x4ef   :  { %8040 = vmatpush1.bf16.msra.mxu0 %v9207_v55  ;;  %v4853_v55 = vld [vmem:[#allocation11 + $0xab0] sm:$0xff] }
 0x4f0   :  { %8204 = vmatpush1.bf16.msra.mxu1 %v9209_v63  ;;  %8041 = vmatprep.subr.bf16.mxu0 %v9216_v54  ;;  %v4850_v63 = vld [vmem:[#allocation11 + $0xa98] sm:$0xff]  ;;  %v9272_v39 = vcombine.high %v4849_v53, %v4853_v55 }
 0x4f1   :  { %8205 = vmatprep.subr.bf16.mxu1 %v9218_v56  ;;  %v4854_v54 = vld [vmem:[#allocation11 + $0xab8] sm:$0xff]  ;;  %v9263_v56 = vcombine.low %v4841_v44, %v4845_v45 }
 0x4f2   :  { %v9274_v59 = vcombine.high %v4850_v63, %v4854_v54  ;;  %v9273_v31 = vcombine.low %v4850_v63, %v4854_v54  ;;  %v4905_v54 = vld [vmem:[#allocation11 + $0xc50] sm:$0xff] }
 0x4f3   :  { %8042 = vmatpush1.bf16.msra.mxu0 %v9215_v41  ;;  %v4861_v41 = vld [vmem:[#allocation11 + $0xaf0] sm:$0xff] }
 0x4f4   :  { %8206 = vmatpush1.bf16.msra.mxu1 %v9217_v61  ;;  %8043 = vmatprep.subr.bf16.mxu0 %v9224_v62  ;;  %v4858_v61 = vld [vmem:[#allocation11 + $0xad8] sm:$0xff]  ;;  %v9280_v2 = vcombine.high %v4857_v60, %v4861_v41 }
 0x4f5   :  { %8207 = vmatprep.subr.bf16.mxu1 %v9226_v8  ;;  %v4862_v62 = vld [vmem:[#allocation11 + $0xaf8] sm:$0xff]  ;;  %v9271_v8 = vcombine.low %v4849_v53, %v4853_v55 }
 0x4f6   :  { %v9282_v4 = vcombine.high %v4858_v61, %v4862_v62  ;;  %v9281_v6 = vcombine.low %v4858_v61, %v4862_v62  ;;  %v4913_v61 = vld [vmem:[#allocation11 + $0xc90] sm:$0xff] }
 0x4f7   :  { %8044 = vmatpush1.bf16.msra.mxu0 %v9223_v5  ;;  %v4869_v5 = vld [vmem:[#allocation11 + $0xb30] sm:$0xff] }
 0x4f8   :  { %8208 = vmatpush1.bf16.msra.mxu1 %v9225_v7  ;;  %8045 = vmatprep.subr.bf16.mxu0 %v9232_v9  ;;  %v4866_v7 = vld [vmem:[#allocation11 + $0xb18] sm:$0xff]  ;;  %v9288_v10 = vcombine.high %v4865_v43, %v4869_v5  ;;  %v4917_v62 = vld [vmem:[#allocation11 + $0xcb0] sm:$0xff] }
 0x4f9   :  { %8209 = vmatprep.subr.bf16.mxu1 %v9234_v20  ;;  %v4870_v9 = vld [vmem:[#allocation11 + $0xb38] sm:$0xff]  ;;  %v9279_v20 = vcombine.low %v4857_v60, %v4861_v41 }
 0x4fa   :  { %v9290_v11 = vcombine.high %v4866_v7, %v4870_v9  ;;  %v9289_v23 = vcombine.low %v4866_v7, %v4870_v9  ;;  %v4921_v9 = vld [vmem:[#allocation11 + $0xcd0] sm:$0xff] }
 0x4fb   :  { %8046 = vmatpush1.bf16.msra.mxu0 %v9231_v19  ;;  %v4877_v19 = vld [vmem:[#allocation11 + $0xb70] sm:$0xff] }
 0x4fc   :  { %8210 = vmatpush1.bf16.msra.mxu1 %v9233_v0  ;;  %8047 = vmatprep.subr.bf16.mxu0 %v9240_v14  ;;  %v4874_v0 = vld [vmem:[#allocation11 + $0xb58] sm:$0xff]  ;;  %v9296_v22 = vcombine.high %v4873_v12, %v4877_v19 }
 0x4fd   :  { %8211 = vmatprep.subr.bf16.mxu1 %v9242_v13  ;;  %v4878_v14 = vld [vmem:[#allocation11 + $0xb78] sm:$0xff]  ;;  %v9287_v13 = vcombine.low %v4865_v43, %v4869_v5  ;;  %v9336_v5 = vcombine.high %v4913_v61, %v4917_v62 }
 0x4fe   :  { %v9298_v24 = vcombine.high %v4874_v0, %v4878_v14  ;;  %v9297_v35 = vcombine.low %v4874_v0, %v4878_v14  ;;  %v4929_v0 = vld [vmem:[#allocation11 + $0xd10] sm:$0xff] }
 0x4ff   :  { %8048 = vmatpush1.bf16.msra.mxu0 %v9239_v30  ;;  %v4885_v30 = vld [vmem:[#allocation11 + $0xbb0] sm:$0xff] }
 0x500   :  { %8212 = vmatpush1.bf16.msra.mxu1 %v9241_v32  ;;  %8049 = vmatprep.subr.bf16.mxu0 %v9248_v34  ;;  %v4882_v32 = vld [vmem:[#allocation11 + $0xb98] sm:$0xff]  ;;  %v9304_v58 = vcombine.high %v4881_v27, %v4885_v30  ;;  %v4933_v14 = vld [vmem:[#allocation11 + $0xd30] sm:$0xff] }
 0x501   :  { %8213 = vmatprep.subr.bf16.mxu1 %v9250_v57  ;;  %v4886_v34 = vld [vmem:[#allocation11 + $0xbb8] sm:$0xff]  ;;  %v9295_v57 = vcombine.low %v4873_v12, %v4877_v19 }
 0x502   :  { %v9306_v36 = vcombine.high %v4882_v32, %v4886_v34  ;;  %v9305_v44 = vcombine.low %v4882_v32, %v4886_v34  ;;  %v4941_v32 = vld [vmem:[#allocation11 + $0xd70] sm:$0xff]  ;;  %v4938_v34 = vld [vmem:[#allocation11 + $0xd58] sm:$0xff] }
 0x503   :  { %8050 = vmatpush1.bf16.msra.mxu0 %v9247_v33  ;;  %v4893_v33 = vld [vmem:[#allocation11 + $0xbf0] sm:$0xff] }
 0x504   :  { %8214 = vmatpush1.bf16.msra.mxu1 %v9249_v1  ;;  %8051 = vmatprep.subr.bf16.mxu0 %v9256_v40  ;;  %v4890_v1 = vld [vmem:[#allocation11 + $0xbd8] sm:$0xff]  ;;  %v9312_v45 = vcombine.high %v4889_v38, %v4893_v33 }
 0x505   :  { %8215 = vmatprep.subr.bf16.mxu1 %v9258_v42  ;;  %v4894_v40 = vld [vmem:[#allocation11 + $0xbf8] sm:$0xff]  ;;  %v9303_v42 = vcombine.low %v4881_v27, %v4885_v30  ;;  %v4937_v30 = vld [vmem:[#allocation11 + $0xd50] sm:$0xff] }
 0x506   :  { %v9314_v51 = vcombine.high %v4890_v1, %v4894_v40  ;;  %v9313_v53 = vcombine.low %v4890_v1, %v4894_v40  ;;  %v4945_v40 = vld [vmem:[#allocation11 + $0xd90] sm:$0xff] }
 0x507   :  { %8052 = vmatpush1.bf16.msra.mxu0 %v9255_v26  ;;  %v4901_v26 = vld [vmem:[#allocation11 + $0xc30] sm:$0xff] }
 0x508   :  { %8216 = vmatpush1.bf16.msra.mxu1 %v9257_v49  ;;  %8053 = vmatprep.subr.bf16.mxu0 %v9264_v25  ;;  %v4898_v49 = vld [vmem:[#allocation11 + $0xc18] sm:$0xff]  ;;  %v9320_v55 = vcombine.high %v4897_v47, %v4901_v26 }
 0x509   :  { %8217 = vmatprep.subr.bf16.mxu1 %v9266_v50  ;;  %v4902_v25 = vld [vmem:[#allocation11 + $0xc38] sm:$0xff]  ;;  %v9311_v50 = vcombine.low %v4889_v38, %v4893_v33  ;;  %v9360_v38 = vcombine.high %v4937_v30, %v4941_v32  ;;  %v10119_v33 = vld [vmem:[#allocation14] sm:$0xff] }
 0x50a   :  { %v9322_v63 = vcombine.high %v4898_v49, %v4902_v25  ;;  %v9321_v60 = vcombine.low %v4898_v49, %v4902_v25  ;;  %v9359_v49 = vcombine.low %v4937_v30, %v4941_v32  ;;  %v8286_v25 = vrot.slane %v10119_v33, %v9933_v15 }
 0x50b   :  { %8054 = vmatpush1.bf16.msra.mxu0 %v9263_v56  ;;  %v4909_v56 = vld [vmem:[#allocation11 + $0xc70] sm:$0xff] }
 0x50c   :  { %8218 = vmatpush1.bf16.msra.mxu1 %v9265_v16  ;;  %8055 = vmatprep.subr.bf16.mxu0 %v9272_v39  ;;  %v9319_v16 = vcombine.low %v4897_v47, %v4901_v26  ;;  %v4906_v39 = vld [vmem:[#allocation11 + $0xc58] sm:$0xff]  ;;  %v9328_v41 = vcombine.high %v4905_v54, %v4909_v56 }
 0x50d   :  { %8219 = vmatprep.subr.bf16.mxu1 %v9274_v59  ;;  %v4910_v59 = vld [vmem:[#allocation11 + $0xc78] sm:$0xff] }
 0x50e   :  { %v9329_v43 = vcombine.low %v4906_v39, %v4910_v59 }
 0x50f   :  { %8056 = vmatpush1.bf16.msra.mxu0 %v9271_v8  ;;  %v9330_v8 = vcombine.high %v4906_v39, %v4910_v59  ;;  %v4953_v39 = vld [vmem:[#allocation11 + $0xdd0] sm:$0xff] }
 0x510   :  { %8220 = vmatpush1.bf16.msra.mxu1 %v9273_v31  ;;  %8057 = vmatprep.subr.bf16.mxu0 %v9280_v2  ;;  %v4914_v31 = vld [vmem:[#allocation11 + $0xc98] sm:$0xff]  ;;  %v4957_v59 = vld [vmem:[#allocation11 + $0xdf0] sm:$0xff] }
 0x511   :  { %8221 = vmatprep.subr.bf16.mxu1 %v9282_v4  ;;  %v4918_v2 = vld [vmem:[#allocation11 + $0xcb8] sm:$0xff]  ;;  %v9327_v4 = vcombine.low %v4905_v54, %v4909_v56  ;;  %v8290_v54 = vrot.slane %v10119_v33, %v9938_v17 }
 0x512   :  { %v9338_v7 = vcombine.high %v4914_v31, %v4918_v2 }
 0x513   :  { %8058 = vmatpush1.bf16.msra.mxu0 %v9279_v20  ;;  %v4925_v20 = vld [vmem:[#allocation11 + $0xcf0] sm:$0xff] }
 0x514   :  { %8222 = vmatpush1.bf16.msra.mxu1 %v9281_v6  ;;  %8059 = vmatprep.subr.bf16.mxu0 %v9288_v10  ;;  %v4922_v6 = vld [vmem:[#allocation11 + $0xcd8] sm:$0xff]  ;;  %v9344_v12 = vcombine.high %v4921_v9, %v4925_v20 }
 0x515   :  { %8223 = vmatprep.subr.bf16.mxu1 %v9290_v11  ;;  %v4926_v10 = vld [vmem:[#allocation11 + $0xcf8] sm:$0xff]  ;;  %v9335_v11 = vcombine.low %v4913_v61, %v4917_v62 }
 0x516   :  { %v9346_v19 = vcombine.high %v4922_v6, %v4926_v10  ;;  %v4954_v62 = vld [vmem:[#allocation11 + $0xdd8] sm:$0xff] }
 0x517   :  { %8060 = vmatpush1.bf16.msra.mxu0 %v9287_v13  ;;  %v4930_v13 = vld [vmem:[#allocation11 + $0xd18] sm:$0xff] }
 0x518   :  { %8224 = vmatpush1.bf16.msra.mxu1 %v9289_v23  ;;  %8061 = vmatprep.subr.bf16.mxu0 %v9296_v22  ;;  %v4934_v23 = vld [vmem:[#allocation11 + $0xd38] sm:$0xff]  ;;  %v9345_v22 = vcombine.low %v4922_v6, %v4926_v10  ;;  %v9376_v6 = vcombine.high %v4953_v39, %v4957_v59 }
 0x519   :  { %8225 = vmatprep.subr.bf16.mxu1 %v9298_v24  ;;  %v9352_v24 = vcombine.high %v4929_v0, %v4933_v14  ;;  %v9354_v27 = vcombine.high %v4930_v13, %v4934_v23 }
 0x51b   :  { %8062 = vmatpush1.bf16.msra.mxu0 %v9295_v57  ;;  %v4942_v57 = vld [vmem:[#allocation11 + $0xd78] sm:$0xff] }
 0x51c   :  { %8226 = vmatpush1.bf16.msra.mxu1 %v9297_v35  ;;  %8063 = vmatprep.subr.bf16.mxu0 %v9304_v58  ;;  %v9351_v35 = vcombine.low %v4929_v0, %v4933_v14  ;;  %v10117_v58 = vld [vmem:[#allocation13] sm:$0xff]  ;;  %v9362_v1 = vcombine.high %v4938_v34, %v4942_v57  ;;  %v4962_v0 = vld [vmem:[#allocation11 + $0xe18] sm:$0xff] }
 0x51d   :  { %8227 = vmatprep.subr.bf16.mxu1 %v9306_v36  ;;  %v9353_v36 = vcombine.low %v4930_v13, %v4934_v23  ;;  %v5036_v47 = vrot.slane %v10117_v58, %v9972_v37  ;;  %v5032_v26 = vrot.slane %v10117_v58, %v9938_v17  ;;  %v5040_v56 = vrot.slane %v10117_v58, %v9945_v21  ;;  %v4966_v14 = vld [vmem:[#allocation11 + $0xe38] sm:$0xff] }
 0x51e   :  { %v9386_v32 = vcombine.high %v4962_v0, %v4966_v14 }
 0x51f   :  { %8064 = vmatpush1.bf16.msra.mxu0 %v9303_v42  ;;  %v4949_v42 = vld [vmem:[#allocation11 + $0xdb0] sm:$0xff] }
 0x520   :  { %8228 = vmatpush1.bf16.msra.mxu1 %v9305_v44  ;;  %8065 = vmatprep.subr.bf16.mxu0 %v9312_v45  ;;  %v5028_v44 = vrot.slane %v10117_v58, %v9933_v15  ;;  %v4946_v45 = vld [vmem:[#allocation11 + $0xd98] sm:$0xff]  ;;  %v9367_v17 = vcombine.low %v4945_v40, %v4949_v42 }
 0x521   :  { %8229 = vmatprep.subr.bf16.mxu1 %v9314_v51  ;;  %v4950_v51 = vld [vmem:[#allocation11 + $0xdb8] sm:$0xff] }
 0x522   :  { %v4958_v15 = vld [vmem:[#allocation11 + $0xdf8] sm:$0xff] }
 0x523   :  { %8066 = vmatpush1.bf16.msra.mxu0 %v9311_v50  ;;  %v9361_v50 = vcombine.low %v4938_v34, %v4942_v57  ;;  %v4969_v34 = vld [vmem:[#allocation11 + $0xe50] sm:$0xff]  ;;  %v4970_v57 = vld [vmem:[#allocation11 + $0xe58] sm:$0xff] }
 0x524   :  { %8230 = vmatpush1.bf16.msra.mxu1 %v9313_v53  ;;  %8076 = vmatprep.subr.bf16.mxu0 %v9320_v55  ;;  %v9368_v53 = vcombine.high %v4945_v40, %v4949_v42 }
 0x525   :  { %8240 = vmatprep.subr.bf16.mxu1 %v9322_v63 }
 0x526   :  { %8068 = vmatmul.mubr.bf16.vlgmr.msra.gmra.mrb[20].mxu0 %v10086_v46 }
 0x527   :  { %8232 = vmatmul.mubr.bf16.vlgmr.msra.gmra.mrb[20].mxu1 %v10086_v46  ;;  %8077 = vmatpush1.bf16.msra.mxu0 %v9319_v16  ;;  %v9337_v46 = vcombine.low %v4914_v31, %v4918_v2  ;;  %v9370_v16 = vcombine.high %v4946_v45, %v4950_v51  ;;  %v8294_v31 = vrot.slane %v10119_v33, %v9972_v37  ;;  %v4961_v37 = vld [vmem:[#allocation11 + $0xe10] sm:$0xff] }
 0x528   :  { %8108 = vmatprep.mubr.bf16.mxu0 %v10090_v52  ;;  %8241 = vmatpush1.bf16.msra.mxu1 %v9321_v60 }
 0x529   :  { %8272 = vmatprep.mubr.bf16.mxu1 %v10090_v52  ;;  %8078 = vmatprep.subr.bf16.mxu0 %v9328_v41  ;;  %v9343_v52 = vcombine.low %v4921_v9, %v4925_v20  ;;  %v9369_v20 = vcombine.low %v4946_v45, %v4950_v51  ;;  %v4981_v45 = vld [vmem:[#allocation11 + $0xeb0] sm:$0xff]  ;;  %v4978_v51 = vld [vmem:[#allocation11 + $0xe98] sm:$0xff] }
 0x52a   :  { %8242 = vmatprep.subr.bf16.mxu1 %v9330_v8 }
 0x52b   :  { %8079 = vmatpush1.bf16.msra.mxu0 %v9327_v4 }
 0x52c   :  { %8243 = vmatpush1.bf16.msra.mxu1 %v9329_v43  ;;  %8080 = vmatprep.subr.bf16.mxu0 %v9336_v5 }
 0x52d   :  { %8244 = vmatprep.subr.bf16.mxu1 %v9338_v7 }
 0x52f   :  { %8081 = vmatpush1.bf16.msra.mxu0 %v9335_v11 }
 0x530   :  { %8245 = vmatpush1.bf16.msra.mxu1 %v9337_v46  ;;  %8082 = vmatprep.subr.bf16.mxu0 %v9344_v12  ;;  %v8298_v46 = vrot.slane %v10119_v33, %v9945_v21  ;;  %v9378_v12 = vcombine.high %v4954_v62, %v4958_v15  ;;  %v4973_v21 = vld [vmem:[#allocation11 + $0xe70] sm:$0xff] }
 0x531   :  { %8246 = vmatprep.subr.bf16.mxu1 %v9346_v19  ;;  %v4965_v19 = vld [vmem:[#allocation11 + $0xe30] sm:$0xff]  ;;  %v9392_v40 = vcombine.high %v4969_v34, %v4973_v21 }
 0x533   :  { %8083 = vmatpush1.bf16.msra.mxu0 %v9343_v52  ;;  %v9375_v52 = vcombine.low %v4953_v39, %v4957_v59 }
 0x534   :  { %8247 = vmatpush1.bf16.msra.mxu1 %v9345_v22  ;;  %8084 = vmatprep.subr.bf16.mxu0 %v9352_v24  ;;  %v9377_v22 = vcombine.low %v4954_v62, %v4958_v15  ;;  %v9384_v24 = vcombine.high %v4961_v37, %v4965_v19  ;;  %v4998_v62 = vld [vmem:[#allocation11 + $0xf38] sm:$0xff] }
 0x535   :  { %8248 = vmatprep.subr.bf16.mxu1 %v9354_v27 }
 0x537   :  { %8085 = vmatpush1.bf16.msra.mxu0 %v9351_v35  ;;  %v4974_v35 = vld [vmem:[#allocation11 + $0xe78] sm:$0xff] }
 0x538   :  { %8249 = vmatpush1.bf16.msra.mxu1 %v9353_v36  ;;  %8086 = vmatprep.subr.bf16.mxu0 %v9360_v38  ;;  %v9383_v38 = vcombine.low %v4961_v37, %v4965_v19  ;;  %v9394_v42 = vcombine.high %v4970_v57, %v4974_v35 }
 0x539   :  { %v7782_v55 = vpop.f32.mrb[16].mxu0  ;;  %v7946_v63 = vpop.f32.mrb[16].mxu1  ;;  %8250 = vmatprep.subr.bf16.mxu1 %v9362_v1  ;;  %v9385_v1 = vcombine.low %v4962_v0, %v4966_v14 }
 0x53a   :  { %v9451_v60 = vadd.f32 %v7782_v55, %v5028_v44  ;;  %v7784_v41 = vpop.f32.mrb[17].mxu0  ;;  %v7948_v61 = vpop.f32.mrb[17].mxu1  ;;  %v9453_v8 = vadd.f32 %v7946_v63, %v5036_v47  ;;  %v4977_v44 = vld [vmem:[#allocation11 + $0xe90] sm:$0xff]  ;;  %v4982_v47 = vld [vmem:[#allocation11 + $0xeb8] sm:$0xff] }
 0x53b   :  { %v9452_v2 = vadd.f32 %v7784_v41, %v5032_v26  ;;  %v7786_v4 = vpop.f32.mrb[18].mxu0  ;;  %v7950_v43 = vpop.f32.mrb[18].mxu1  ;;  %8087 = vmatpush1.bf16.msra.mxu0 %v9359_v49  ;;  %v9454_v11 = vadd.f32 %v7948_v61, %v5040_v56  ;;  %v9391_v26 = vcombine.low %v4969_v34, %v4973_v21  ;;  %v9393_v49 = vcombine.low %v4970_v57, %v4974_v35  ;;  %v4989_v55 = vld [vmem:[#allocation11 + $0xef0] sm:$0xff]  ;;  %v4986_v63 = vld [vmem:[#allocation11 + $0xed8] sm:$0xff] }
 0x53c   :  { %v8323_v5 = vmul.f32 %v9451_v60, %v8286_v25  ;;  %8251 = vmatpush1.bf16.msra.mxu1 %v9361_v50  ;;  %v7787_v7 = vpop.f32.mrb[19].mxu0  ;;  %v7951_v9 = vpop.f32.mrb[19].mxu1  ;;  %8088 = vmatprep.subr.bf16.mxu0 %v9368_v53  ;;  %v8325_v13 = vmul.f32 %v9453_v8, %v8294_v31  ;;  %v9400_v25 = vcombine.high %v4977_v44, %v4981_v45  ;;  %v4985_v53 = vld [vmem:[#allocation11 + $0xed0] sm:$0xff]  ;;  %v4994_v61 = vld [vmem:[#allocation11 + $0xf18] sm:$0xff] }
 0x53d   :  { %v8324_v10 = vmul.f32 %v9452_v2, %v8290_v54  ;;  %8252 = vmatprep.subr.bf16.mxu1 %v9370_v16  ;;  %v8326_v27 = vmul.f32 %v9454_v11, %v8298_v46  ;;  %v9402_v50 = vcombine.high %v4978_v51, %v4982_v47  ;;  %v4990_v54 = vld [vmem:[#allocation11 + $0xef8] sm:$0xff]  ;;  %v9399_v56 = vcombine.low %v4977_v44, %v4981_v45  ;;  %v4993_v60 = vld [vmem:[#allocation11 + $0xf10] sm:$0xff] }
 0x53e   :  { %v9401_v16 = vcombine.low %v4978_v51, %v4982_v47  ;;  %v9408_v39 = vcombine.high %v4985_v53, %v4989_v55  ;;  %v9410_v59 = vcombine.high %v4986_v63, %v4990_v54  ;;  %v4997_v41 = vld [vmem:[#allocation11 + $0xf30] sm:$0xff]  ;;  %v9407_v15 = vcombine.low %v4985_v53, %v4989_v55  ;;  %v5010_v46 = vld [vmem:[#allocation11 + $0xf98] sm:$0xff] }
 0x53f   :  { %v8331_v23 = vadd.f32 %v8324_v10, %v8323_v5  ;;  %8089 = vmatpush1.bf16.msra.mxu0 %v9367_v17  ;;  %v9409_v8 = vcombine.low %v4986_v63, %v4990_v54  ;;  %v9416_v31 = vcombine.high %v4993_v60, %v4997_v41  ;;  %v9418_v2 = vcombine.high %v4994_v61, %v4998_v62  ;;  %v5001_v4 = vld [vmem:[#allocation11 + $0xf50] sm:$0xff]  ;;  %v5002_v17 = vld [vmem:[#allocation11 + $0xf58] sm:$0xff] }
 0x540   :  { %8253 = vmatpush1.bf16.msra.mxu1 %v9369_v20  ;;  %8090 = vmatprep.subr.bf16.mxu0 %v9376_v6  ;;  %v5005_v43 = vld [vmem:[#allocation11 + $0xf70] sm:$0xff]  ;;  %v5006_v5 = vld [vmem:[#allocation11 + $0xf78] sm:$0xff]  ;;  %v9415_v7 = vcombine.low %v4993_v60, %v4997_v41  ;;  %v9417_v9 = vcombine.low %v4994_v61, %v4998_v62  ;;  %v5044_v57 = vrot.slane %v10117_v58, %v9992_v18 }
 0x541   :  { %v8332_v30 = vadd.f32 %v8331_v23, %v8325_v13  ;;  %8254 = vmatprep.subr.bf16.mxu1 %v9378_v12  ;;  %v9424_v20 = vcombine.high %v5001_v4, %v5005_v43  ;;  %v9426_v6 = vcombine.high %v5002_v17, %v5006_v5  ;;  %v5009_v10 = vld [vmem:[#allocation11 + $0xf90] sm:$0xff]  ;;  %v5014_v12 = vld [vmem:[#allocation11 + $0xfb8] sm:$0xff]  ;;  %v9423_v37 = vcombine.low %v5001_v4, %v5005_v43 }
 0x542   :  { %v5013_v11 = vld [vmem:[#allocation11 + $0xfb0] sm:$0xff]  ;;  %v9425_v19 = vcombine.low %v5002_v17, %v5006_v5  ;;  %v9434_v14 = vcombine.high %v5010_v46, %v5014_v12  ;;  %v5048_v35 = vrot.slane %v10117_v58, %v9975_v48 }
 0x543   :  { %v10137_v36 = vadd.f32 %v8332_v30, %v8326_v27  ;;  %8091 = vmatpush1.bf16.msra.mxu0 %v9375_v52  ;;  %v9432_v0 = vcombine.high %v5009_v10, %v5013_v11  ;;  %v5017_v13 = vld [vmem:[#allocation11 + $0xfd0] sm:$0xff]  ;;  %v5018_v52 = vld [vmem:[#allocation11 + $0xfd8] sm:$0xff]  ;;  %v9433_v27 = vcombine.low %v5010_v46, %v5014_v12 }
 0x544   :  { %8255 = vmatpush1.bf16.msra.mxu1 %v9377_v22  ;;  %8092 = vmatprep.subr.bf16.mxu0 %v9384_v24  ;;  %v5021_v23 = vld [vmem:[#allocation11 + $0xff0] sm:$0xff]  ;;  %v5022_v22 = vld [vmem:[#allocation11 + $0xff8] sm:$0xff]  ;;  %v9431_v24 = vcombine.low %v5009_v10, %v5013_v11 }
 0x545   :  { %8256 = vmatprep.subr.bf16.mxu1 %v9386_v32  ;;  %v9440_v30 = vcombine.high %v5017_v13, %v5021_v23  ;;  %v9442_v32 = vcombine.high %v5018_v52, %v5022_v22  ;;  %v9439_v34 = vcombine.low %v5017_v13, %v5021_v23  ;;  %v9441_v21 = vcombine.low %v5018_v52, %v5022_v22 }
 0x547   :  { %8093 = vmatpush1.bf16.msra.mxu0 %v9383_v38  ;;  %v8302_v38 = vrot.slane %v10119_v33, %v9992_v18  ;;  %v8310_v18 = vrot.slane %v10119_v33, %v10012_v3 }
 0x548   :  { %8257 = vmatpush1.bf16.msra.mxu1 %v9385_v1  ;;  %8094 = vmatprep.subr.bf16.mxu0 %v9392_v40  ;;  %v5052_v1 = vrot.slane %v10117_v58, %v10012_v3  ;;  %v8341_v3 = vstv %s10172_s8 }
 0x549   :  { %8258 = vmatprep.subr.bf16.mxu1 %v9394_v42  ;;  %v8306_v42 = vrot.slane %v10119_v33, %v9975_v48 }
 0x54b   :  { %8095 = vmatpush1.bf16.msra.mxu0 %v9391_v26 }
 0x54c   :  { %8259 = vmatpush1.bf16.msra.mxu1 %v9393_v49  ;;  %8096 = vmatprep.subr.bf16.mxu0 %v9400_v25 }
 0x54d   :  { %8260 = vmatprep.subr.bf16.mxu1 %v9402_v50 }
 0x54f   :  { %8097 = vmatpush1.bf16.msra.mxu0 %v9399_v56 }
 0x550   :  { %8261 = vmatpush1.bf16.msra.mxu1 %v9401_v16  ;;  %8098 = vmatprep.subr.bf16.mxu0 %v9408_v39  ;;  %v8314_v16 = vrot.slane %v10119_v33, %v9995_v29 }
 0x551   :  { %8262 = vmatprep.subr.bf16.mxu1 %v9410_v59 }
 0x553   :  { %8099 = vmatpush1.bf16.msra.mxu0 %v9407_v15 }
 0x554   :  { %8263 = vmatpush1.bf16.msra.mxu1 %v9409_v8  ;;  %8100 = vmatprep.subr.bf16.mxu0 %v9416_v31 }
 0x555   :  { %8264 = vmatprep.subr.bf16.mxu1 %v9418_v2 }
 0x557   :  { %8101 = vmatpush1.bf16.msra.mxu0 %v9415_v7 }
 0x558   :  { %8265 = vmatpush1.bf16.msra.mxu1 %v9417_v9  ;;  %8102 = vmatprep.subr.bf16.mxu0 %v9424_v20 }
 0x559   :  { %8266 = vmatprep.subr.bf16.mxu1 %v9426_v6 }
 0x55b   :  { %8103 = vmatpush1.bf16.msra.mxu0 %v9423_v37 }
 0x55c   :  { %8267 = vmatpush1.bf16.msra.mxu1 %v9425_v19  ;;  %8104 = vmatprep.subr.bf16.mxu0 %v9432_v0 }
 0x55d   :  { %8268 = vmatprep.subr.bf16.mxu1 %v9434_v14 }
 0x55f   :  { %8105 = vmatpush1.bf16.msra.mxu0 %v9431_v24 }
 0x560   :  { %8269 = vmatpush1.bf16.msra.mxu1 %v9433_v27  ;;  %8106 = vmatprep.subr.bf16.mxu0 %v9440_v30 }
 0x561   :  { %8270 = vmatprep.subr.bf16.mxu1 %v9442_v32 }
 0x563   :  { %8107 = vmatpush1.bf16.msra.mxu0 %v9439_v34 }
 0x564   :  { %8271 = vmatpush1.bf16.msra.mxu1 %v9441_v21 }
 0x566   :  { %8109 = vmatmul.mubr.bf16.vlgmr.msra.gmra.mrb[20].mxu0 %v10099_v28 }
 0x567   :  { %8273 = vmatmul.mubr.bf16.vlgmr.msra.gmra.mrb[20].mxu1 %v10099_v28  ;;  %v5056_v28 = vrot.slane %v10117_v58, %v9995_v29 }
 0x639   :  { %v8110_v40 = vpop.f32.mrb[20].mxu0 }
 0x63a   :  { %v9455_v44 = vadd.f32 %v8110_v40, %v5044_v57  ;;  %v8274_v45 = vpop.f32.mrb[20].mxu1  ;;  %v8112_v51 = vpop.f32.mrb[21].mxu0 }
 0x63b   :  { %v9456_v47 = vadd.f32 %v8112_v51, %v5048_v35  ;;  %v8276_v26 = vpop.f32.mrb[21].mxu1  ;;  %v8114_v49 = vpop.f32.mrb[22].mxu0  ;;  %v9457_v50 = vadd.f32 %v8274_v45, %v5052_v1 }
 0x63c   :  { %v8327_v25 = vmul.f32 %v9455_v44, %v8302_v38  ;;  %v8278_v53 = vpop.f32.mrb[22].mxu1  ;;  %v8115_v55 = vpop.f32.mrb[23].mxu0  ;;  %v9458_v56 = vadd.f32 %v8276_v26, %v5056_v28 }
 0x63d   :  { %v8328_v63 = vmul.f32 %v9456_v47, %v8306_v42  ;;  %v8279_v54 = vpop.f32.mrb[23].mxu1  ;;  %v8329_v39 = vmul.f32 %v9457_v50, %v8310_v18 }
 0x63e   :  { %v8334_v48 = vadd.f32 %v10137_v36, %v8327_v25  ;;  %v8330_v59 = vmul.f32 %v9458_v56, %v8314_v16 }
 0x640   :  { %v8335_v58 = vadd.f32 %v8334_v48, %v8328_v63 }
 0x642   :  { %v8336_v60 = vadd.f32 %v8335_v58, %v8329_v39 }
 0x644   :  { %v8337_v41 = vadd.f32 %v8336_v60, %v8330_v59 }
 0x646   :  { %8338 = vadd.xlane.f32.xlu0 %v8337_v41 }
 0x6d3   :  { %v8339_v61 = vpop.xlane.xlu0 %8338 }
 0x6d4   :  { %v8342_v62 = vadd.f32 %v8341_v3, %v8339_v61 }
 0x6d6   :  { %v8343_v15 = vmax.f32 %v8342_v62, 0.0 }
 0x6d8   :  { %8345 = vst.msk [vmem:[%s10173_s9] sm:$0xff] %vm8344_vm0, %v8343_v15 }
 0x6d9   :  { %8350 = vsyncpa [#allocation4], 1 }
 0x6da   :  { %8351 = vsyncpa [#allocation6], 1 }
 0x6db   :  { %8352 = vsyncpa [#allocation9], 1 }
 0x6dc   :  { %8353 = vsyncpa [#allocation12], 1 }
 0x6dd   :  { %8354 = vsyncpa [#allocation15], 1 }

</bundles_post_ra>
